<compile_context>
chip_gen: v5e
topology: v5e:2x2
jax: 0.10.0
libtpu: 0.0.40
codegen_flags: <defaults>
</compile_context>

<pallas_src>
import jax
import jax.numpy as jnp
from jax import lax
from jax.experimental import pallas as pl
from jax.experimental.pallas import tpu as pltpu

BN_EPS = 1e-5
LANE = 128


def _round_up(x, m):
    return (x + m - 1) // m * m


# --------------------------------------------------------------------------
# Fused kernel: maxpool2x2 -> conv3x3+BN+ReLU -> conv3x3+BN+ReLU
# --------------------------------------------------------------------------
def _down_fused_kernel(x_ref, w1_ref, s1_ref, b1_ref, w2_ref, s2_ref, b2_ref,
                       o_ref, pool_pad, c1_pad):
    # x_ref    : (1, h, 2, w, 2*cin)  bf16  (free reshape of the NHWC input)
    # w1_ref   : (9, cin,    cmid_p)  bf16
    # s1/b1    : (1, cmid_p)          f32   (folded conv-bias + BN)
    # w2_ref   : (9, cmid_p, cout_p)  bf16
    # s2/b2    : (1, cout_p)          f32
    # o_ref    : (1, h, w, cout_p)    f32   (lane-dense store)
    # pool_pad : (h+2, w+2, cin)      bf16 VMEM scratch (pooled + zero halo)
    # c1_pad   : (h+2, w+2, cmid_p)   bf16 VMEM scratch (conv1 out + zero halo)
    h = x_ref.shape[1]
    w = x_ref.shape[3]
    cin = x_ref.shape[4] // 2
    cmid = w1_ref.shape[2]
    cout = w2_ref.shape[2]

    # ---- 2x2 max-pool, fully in-register -------------------------------
    row_max = jnp.maximum(x_ref[0, :, 0], x_ref[0, :, 1])          # (h, w, 2cin)
    pooled = jnp.maximum(row_max[:, :, :cin], row_max[:, :, cin:])  # (h, w, cin)

    # ---- pooled map -> zero-padded VMEM scratch (conv 'same' halo) -----
    pool_pad[...] = jnp.zeros_like(pool_pad)
    pool_pad[1:h + 1, 1:w + 1, :] = pooled

    # ---- conv1: 9 shifted matmuls, f32 accumulation, BN+ReLU epilogue --
    acc = jnp.zeros((h * w, cmid), jnp.float32)
    for k in range(9):
        dy, dx = k // 3, k % 3
        patch = pool_pad[dy:dy + h, dx:dx + w, :].reshape(h * w, cin)
        acc = acc + jnp.dot(patch, w1_ref[k],
                            preferred_element_type=jnp.float32)
    y1 = jnp.maximum(acc * s1_ref[...] + b1_ref[...], 0.0)

    # ---- conv1 output -> zero-padded bf16 scratch (stays in VMEM) ------
    c1_pad[...] = jnp.zeros_like(c1_pad)
    c1_pad[1:h + 1, 1:w + 1, :] = y1.reshape(h, w, cmid).astype(c1_pad.dtype)

    # ---- conv2: 9 shifted matmuls, f32 accumulation, BN+ReLU epilogue --
    acc2 = jnp.zeros((h * w, cout), jnp.float32)
    for k in range(9):
        dy, dx = k // 3, k % 3
        patch = c1_pad[dy:dy + h, dx:dx + w, :].reshape(h * w, cmid)
        acc2 = acc2 + jnp.dot(patch, w2_ref[k],
                              preferred_element_type=jnp.float32)
    y2 = jnp.maximum(acc2 * s2_ref[...] + b2_ref[...], 0.0)

    o_ref[0] = y2.reshape(h, w, cout).astype(o_ref.dtype)


# --------------------------------------------------------------------------
# Wrapper (glue: NCHW<->NHWC layout, weight fold/pad; all compute in Pallas)
# --------------------------------------------------------------------------
def _fold_conv_bn(p, cin_pad, cout_pad):
    """Torch (Cout,Cin,3,3) weight -> (9, cin_pad, cout_pad) bf16; f32 scale/bias."""
    wt = p["w"]
    cout, cin = wt.shape[0], wt.shape[1]
    wmat = jnp.transpose(wt, (2, 3, 1, 0)).reshape(9, cin, cout)
    wmat = jnp.pad(wmat, ((0, 0), (0, cin_pad - cin), (0, cout_pad - cout)))
    scale = p["gamma"] / jnp.sqrt(p["var"] + BN_EPS)
    bias = p["beta"] + (p["b"] - p["mean"]) * scale
    scale = jnp.pad(scale, (0, cout_pad - cout)).reshape(1, cout_pad)
    bias = jnp.pad(bias, (0, cout_pad - cout)).reshape(1, cout_pad)
    return (wmat.astype(jnp.bfloat16),
            scale.astype(jnp.float32),
            bias.astype(jnp.float32))


@jax.jit
def down_forward(x_nchw, params):
    N, Cin, H, W = x_nchw.shape
    h, w = H // 2, W // 2
    cmid = params["conv1"]["w"].shape[0]
    cout = params["conv2"]["w"].shape[0]
    cmid_p = _round_up(cmid, LANE)
    cout_p = _round_up(cout, LANE)

    # NCHW -> NHWC + bf16 cast (single layout pass); then a *free* reshape that
    # exposes the 2x2 pooling window to the kernel with no extra HBM copy.
    x = jnp.transpose(x_nchw, (0, 2, 3, 1)).astype(jnp.bfloat16)
    xr = x.reshape(N, h, 2, w, 2 * Cin)

    w1, s1, b1 = _fold_conv_bn(params["conv1"], Cin, cmid_p)
    w2, s2, b2 = _fold_conv_bn(params["conv2"], cmid_p, cout_p)

    flops = 2 * N * h * w * 9 * (Cin * cmid_p + cmid_p * cout_p)
    bytes_accessed = (xr.size * 2 + w1.size * 2 + w2.size * 2
                      + (s1.size + b1.size + s2.size + b2.size) * 4
                      + N * h * w * cout_p * 4)

    out = pl.pallas_call(
        _down_fused_kernel,
        out_shape=jax.ShapeDtypeStruct((N, h, w, cout_p), jnp.float32),
        grid_spec=pltpu.PrefetchScalarGridSpec(
            num_scalar_prefetch=0,
            grid=(N,),
            in_specs=[
                pl.BlockSpec((1, h, 2, w, 2 * Cin), lambda n: (n, 0, 0, 0, 0)),
                pl.BlockSpec((9, Cin, cmid_p), lambda n: (0, 0, 0)),
                pl.BlockSpec((1, cmid_p), lambda n: (0, 0)),
                pl.BlockSpec((1, cmid_p), lambda n: (0, 0)),
                pl.BlockSpec((9, cmid_p, cout_p), lambda n: (0, 0, 0)),
                pl.BlockSpec((1, cout_p), lambda n: (0, 0)),
                pl.BlockSpec((1, cout_p), lambda n: (0, 0)),
            ],
            out_specs=pl.BlockSpec((1, h, w, cout_p), lambda n: (n, 0, 0, 0)),
            scratch_shapes=[
                pltpu.VMEM((h + 2, w + 2, Cin), jnp.bfloat16),
                pltpu.VMEM((h + 2, w + 2, cmid_p), jnp.bfloat16),
            ],
        ),
        compiler_params=pltpu.CompilerParams(
            dimension_semantics=("parallel",),
            vmem_limit_bytes=32 * 1024 * 1024,
        ),
        cost_estimate=pl.CostEstimate(flops=flops, transcendentals=0,
                                      bytes_accessed=bytes_accessed),
    )(xr, w1, s1, b1, w2, s2, b2)

    # drop channel padding, NHWC -> NCHW
    return jnp.transpose(out[..., :cout], (0, 3, 1, 2))


# --------------------------------------------------------------------------
# Params + pure-JAX reference (mirrors the kernel's bf16/f32 precision points)
# --------------------------------------------------------------------------
def init_down_params(key, in_channels, out_channels, mid_channels=None):
    if mid_channels is None:
        mid_channels = out_channels
    k1, k2, k3, k4 = jax.random.split(key, 4)

    def conv_block(kw, kb, cin, cout):
        return dict(
            w=(jax.random.normal(kw, (cout, cin, 3, 3), jnp.float32) * 0.1),
            b=(jax.random.normal(kb, (cout,), jnp.float32) * 0.05),
            gamma=jnp.ones((cout,), jnp.float32),
            beta=jnp.zeros((cout,), jnp.float32),
            mean=jnp.zeros((cout,), jnp.float32),
            var=jnp.ones((cout,), jnp.float32),
        )

    return dict(conv1=conv_block(k1, k2, in_channels, mid_channels),
                conv2=conv_block(k3, k4, in_channels if False else mid_channels,
                                 out_channels))


def down_reference(x_nchw, params):
    """Pure-JAX reference with the same precision policy as the kernel:
    bf16 conv operands, f32 accumulation + BN/ReLU, bf16 intermediate."""
    x = jnp.transpose(x_nchw, (0, 2, 3, 1)).astype(jnp.bfloat16)
    N, H, W, C = x.shape
    x = x.reshape(N, H // 2, 2, W // 2, 2, C).max(axis=(2, 4))
    y = None
    for name in ("conv1", "conv2"):
        p = params[name]
        w_hwio = jnp.transpose(p["w"], (2, 3, 1, 0)).astype(jnp.bfloat16)
        y = lax.conv_general_dilated(
            x, w_hwio, window_strides=(1, 1), padding="SAME",
            dimension_numbers=("NHWC", "HWIO", "NHWC"),
            preferred_element_type=jnp.float32)
        scale = p["gamma"] / jnp.sqrt(p["var"] + BN_EPS)
        bias = p["beta"] + (p["b"] - p["mean"]) * scale
        y = jnp.maximum(y * scale + bias, 0.0)
        x = y.astype(jnp.bfloat16)
    return jnp.transpose(y, (0, 3, 1, 2))


if __name__ == "__main__":
    key = jax.random.PRNGKey(0)
    kx, kp = jax.random.split(key)

    in_channels, out_channels = 4, 8
    N, H, W = 2, 16, 16
    x = jax.random.normal(kx, (N, in_channels, H, W), jnp.float32)
    params = init_down_params(kp, in_channels, out_channels)

    out = jax.block_until_ready(down_forward(x, params))
    assert out.shape == (N, out_channels, H // 2, W // 2), out.shape

    ref = jax.block_until_ready(down_reference(x, params))
    max_err = float(jnp.max(jnp.abs(out - ref)))
    assert jnp.allclose(out, ref, atol=1e-2, rtol=1e-2), max_err

    print("KERNEL_OK")
</pallas_src>

<mosaic_0001>
module attributes {stable_mosaic.version = 11 : i64} {
  func.func @_down_fused_kernel(%arg0: i32, %arg1: memref<1x8x2x8x8xbf16, #tpu.memory_space<vmem>>, %arg2: memref<9x4x128xbf16, #tpu.memory_space<vmem>>, %arg3: memref<1x128xf32, #tpu.memory_space<vmem>>, %arg4: memref<1x128xf32, #tpu.memory_space<vmem>>, %arg5: memref<9x128x128xbf16, #tpu.memory_space<vmem>>, %arg6: memref<1x128xf32, #tpu.memory_space<vmem>>, %arg7: memref<1x128xf32, #tpu.memory_space<vmem>>, %arg8: memref<1x8x8x128xf32, #tpu.memory_space<vmem>>, %arg9: memref<10x10x4xbf16, #tpu.memory_space<vmem>>, %arg10: memref<10x10x128xbf16, #tpu.memory_space<vmem>>) attributes {dimension_semantics = [#tpu.dimension_semantics<parallel>], iteration_bounds = array<i64: 2>, scalar_prefetch = 0 : i64, scratch_operands = 2 : i64, tpu.core_type = #tpu.core_type<tc>, window_params = [{transform_indices = @transform_0, window_bounds = array<i64: 1, 8, 2, 8, 8>}, {pipeline_mode = #tpu.pipeline_mode<synchronous>, transform_indices = @transform_1, window_bounds = array<i64: 9, 4, 128>}, {pipeline_mode = #tpu.pipeline_mode<synchronous>, transform_indices = @transform_2, window_bounds = array<i64: 1, 128>}, {pipeline_mode = #tpu.pipeline_mode<synchronous>, transform_indices = @transform_3, window_bounds = array<i64: 1, 128>}, {pipeline_mode = #tpu.pipeline_mode<synchronous>, transform_indices = @transform_4, window_bounds = array<i64: 9, 128, 128>}, {pipeline_mode = #tpu.pipeline_mode<synchronous>, transform_indices = @transform_5, window_bounds = array<i64: 1, 128>}, {pipeline_mode = #tpu.pipeline_mode<synchronous>, transform_indices = @transform_6, window_bounds = array<i64: 1, 128>}, {transform_indices = @transform_7, window_bounds = array<i64: 1, 8, 8, 128>}]} {
    %c0 = arith.constant 0 : index
    %c0_0 = arith.constant 0 : index
    %c0_1 = arith.constant 0 : index
    %c0_2 = arith.constant 0 : index
    %c0_3 = arith.constant 0 : index
    %0 = vector.load %arg1[%c0, %c0_0, %c0_1, %c0_2, %c0_3] : memref<1x8x2x8x8xbf16, #tpu.memory_space<vmem>>, vector<1x8x1x8x8xbf16>
    %1 = vector.shape_cast %0 : vector<1x8x1x8x8xbf16> to vector<8x8x8xbf16>
    %c0_4 = arith.constant 0 : index
    %c0_5 = arith.constant 0 : index
    %c1 = arith.constant 1 : index
    %c0_6 = arith.constant 0 : index
    %c0_7 = arith.constant 0 : index
    %2 = vector.load %arg1[%c0_4, %c0_5, %c1, %c0_6, %c0_7] : memref<1x8x2x8x8xbf16, #tpu.memory_space<vmem>>, vector<1x8x1x8x8xbf16>
    %3 = vector.shape_cast %2 : vector<1x8x1x8x8xbf16> to vector<8x8x8xbf16>
    %4 = arith.maximumf %1, %3 : vector<8x8x8xbf16>
    %5 = vector.extract_strided_slice %4 {offsets = [0, 0, 0], sizes = [8, 8, 4], strides = [1, 1, 1]} : vector<8x8x8xbf16> to vector<8x8x4xbf16>
    %6 = vector.extract_strided_slice %4 {offsets = [0, 0, 4], sizes = [8, 8, 4], strides = [1, 1, 1]} : vector<8x8x8xbf16> to vector<8x8x4xbf16>
    %7 = arith.maximumf %5, %6 : vector<8x8x4xbf16>
    %cst = arith.constant 0.000000e+00 : bf16
    %8 = vector.broadcast %cst : bf16 to vector<10x10x4xbf16>
    %c0_8 = arith.constant 0 : index
    %c0_9 = arith.constant 0 : index
    %c0_10 = arith.constant 0 : index
    %9 = vector.load %arg9[%c0_8, %c0_9, %c0_10] : memref<10x10x4xbf16, #tpu.memory_space<vmem>>, vector<10x10x4xbf16>
    tpu.vector_store %arg9[%c0_8, %c0_9, %c0_10], %8 {strides = array<i32>} : memref<10x10x4xbf16, #tpu.memory_space<vmem>>, vector<10x10x4xbf16>,
    %c1_11 = arith.constant 1 : index
    %c1_12 = arith.constant 1 : index
    %c0_13 = arith.constant 0 : index
    %10 = vector.load %arg9[%c1_11, %c1_12, %c0_13] : memref<10x10x4xbf16, #tpu.memory_space<vmem>>, vector<8x8x4xbf16>
    tpu.vector_store %arg9[%c1_11, %c1_12, %c0_13], %7 {strides = array<i32>} : memref<10x10x4xbf16, #tpu.memory_space<vmem>>, vector<8x8x4xbf16>,
    %cst_14 = arith.constant 0.000000e+00 : f32
    %11 = vector.broadcast %cst_14 : f32 to vector<64x128xf32>
    %c0_15 = arith.constant 0 : index
    %c0_16 = arith.constant 0 : index
    %c0_17 = arith.constant 0 : index
    %12 = vector.load %arg9[%c0_15, %c0_16, %c0_17] : memref<10x10x4xbf16, #tpu.memory_space<vmem>>, vector<8x8x4xbf16>
    %13 = vector.shape_cast %12 : vector<8x8x4xbf16> to vector<64x4xbf16>
    %c0_18 = arith.constant 0 : index
    %c0_19 = arith.constant 0 : index
    %c0_20 = arith.constant 0 : index
    %14 = vector.load %arg2[%c0_18, %c0_19, %c0_20] : memref<9x4x128xbf16, #tpu.memory_space<vmem>>, vector<1x4x128xbf16>
    %15 = vector.shape_cast %14 : vector<1x4x128xbf16> to vector<4x128xbf16>
    %cst_21 = arith.constant dense<0.000000e+00> : vector<64x128xf32>
    %16 = tpu.matmul %13, %15, %cst_21 {dimension_numbers = #tpu.dot_dimension_numbers<[1], [0], [0], [1], [0, 0, 1, 1], [], []>} : vector<64x4xbf16>, vector<4x128xbf16>, vector<64x128xf32> -> vector<64x128xf32>
    %17 = arith.addf %11, %16 : vector<64x128xf32>
    %c0_22 = arith.constant 0 : index
    %c1_23 = arith.constant 1 : index
    %c0_24 = arith.constant 0 : index
    %18 = vector.load %arg9[%c0_22, %c1_23, %c0_24] : memref<10x10x4xbf16, #tpu.memory_space<vmem>>, vector<8x8x4xbf16>
    %19 = vector.shape_cast %18 : vector<8x8x4xbf16> to vector<64x4xbf16>
    %c1_25 = arith.constant 1 : index
    %c0_26 = arith.constant 0 : index
    %c0_27 = arith.constant 0 : index
    %20 = vector.load %arg2[%c1_25, %c0_26, %c0_27] : memref<9x4x128xbf16, #tpu.memory_space<vmem>>, vector<1x4x128xbf16>
    %21 = vector.shape_cast %20 : vector<1x4x128xbf16> to vector<4x128xbf16>
    %cst_28 = arith.constant dense<0.000000e+00> : vector<64x128xf32>
    %22 = tpu.matmul %19, %21, %cst_28 {dimension_numbers = #tpu.dot_dimension_numbers<[1], [0], [0], [1], [0, 0, 1, 1], [], []>} : vector<64x4xbf16>, vector<4x128xbf16>, vector<64x128xf32> -> vector<64x128xf32>
    %23 = arith.addf %17, %22 : vector<64x128xf32>
    %c0_29 = arith.constant 0 : index
    %c2 = arith.constant 2 : index
    %c0_30 = arith.constant 0 : index
    %24 = vector.load %arg9[%c0_29, %c2, %c0_30] : memref<10x10x4xbf16, #tpu.memory_space<vmem>>, vector<8x8x4xbf16>
    %25 = vector.shape_cast %24 : vector<8x8x4xbf16> to vector<64x4xbf16>
    %c2_31 = arith.constant 2 : index
    %c0_32 = arith.constant 0 : index
    %c0_33 = arith.constant 0 : index
    %26 = vector.load %arg2[%c2_31, %c0_32, %c0_33] : memref<9x4x128xbf16, #tpu.memory_space<vmem>>, vector<1x4x128xbf16>
    %27 = vector.shape_cast %26 : vector<1x4x128xbf16> to vector<4x128xbf16>
    %cst_34 = arith.constant dense<0.000000e+00> : vector<64x128xf32>
    %28 = tpu.matmul %25, %27, %cst_34 {dimension_numbers = #tpu.dot_dimension_numbers<[1], [0], [0], [1], [0, 0, 1, 1], [], []>} : vector<64x4xbf16>, vector<4x128xbf16>, vector<64x128xf32> -> vector<64x128xf32>
    %29 = arith.addf %23, %28 : vector<64x128xf32>
    %c1_35 = arith.constant 1 : index
    %c0_36 = arith.constant 0 : index
    %c0_37 = arith.constant 0 : index
    %30 = vector.load %arg9[%c1_35, %c0_36, %c0_37] : memref<10x10x4xbf16, #tpu.memory_space<vmem>>, vector<8x8x4xbf16>
    %31 = vector.shape_cast %30 : vector<8x8x4xbf16> to vector<64x4xbf16>
    %c3 = arith.constant 3 : index
    %c0_38 = arith.constant 0 : index
    %c0_39 = arith.constant 0 : index
    %32 = vector.load %arg2[%c3, %c0_38, %c0_39] : memref<9x4x128xbf16, #tpu.memory_space<vmem>>, vector<1x4x128xbf16>
    %33 = vector.shape_cast %32 : vector<1x4x128xbf16> to vector<4x128xbf16>
    %cst_40 = arith.constant dense<0.000000e+00> : vector<64x128xf32>
    %34 = tpu.matmul %31, %33, %cst_40 {dimension_numbers = #tpu.dot_dimension_numbers<[1], [0], [0], [1], [0, 0, 1, 1], [], []>} : vector<64x4xbf16>, vector<4x128xbf16>, vector<64x128xf32> -> vector<64x128xf32>
    %35 = arith.addf %29, %34 : vector<64x128xf32>
    %c1_41 = arith.constant 1 : index
    %c1_42 = arith.constant 1 : index
    %c0_43 = arith.constant 0 : index
    %36 = vector.load %arg9[%c1_41, %c1_42, %c0_43] : memref<10x10x4xbf16, #tpu.memory_space<vmem>>, vector<8x8x4xbf16>
    %37 = vector.shape_cast %36 : vector<8x8x4xbf16> to vector<64x4xbf16>
    %c4 = arith.constant 4 : index
    %c0_44 = arith.constant 0 : index
    %c0_45 = arith.constant 0 : index
    %38 = vector.load %arg2[%c4, %c0_44, %c0_45] : memref<9x4x128xbf16, #tpu.memory_space<vmem>>, vector<1x4x128xbf16>
    %39 = vector.shape_cast %38 : vector<1x4x128xbf16> to vector<4x128xbf16>
    %cst_46 = arith.constant dense<0.000000e+00> : vector<64x128xf32>
    %40 = tpu.matmul %37, %39, %cst_46 {dimension_numbers = #tpu.dot_dimension_numbers<[1], [0], [0], [1], [0, 0, 1, 1], [], []>} : vector<64x4xbf16>, vector<4x128xbf16>, vector<64x128xf32> -> vector<64x128xf32>
    %41 = arith.addf %35, %40 : vector<64x128xf32>
    %c1_47 = arith.constant 1 : index
    %c2_48 = arith.constant 2 : index
    %c0_49 = arith.constant 0 : index
    %42 = vector.load %arg9[%c1_47, %c2_48, %c0_49] : memref<10x10x4xbf16, #tpu.memory_space<vmem>>, vector<8x8x4xbf16>
    %43 = vector.shape_cast %42 : vector<8x8x4xbf16> to vector<64x4xbf16>
    %c5 = arith.constant 5 : index
    %c0_50 = arith.constant 0 : index
    %c0_51 = arith.constant 0 : index
    %44 = vector.load %arg2[%c5, %c0_50, %c0_51] : memref<9x4x128xbf16, #tpu.memory_space<vmem>>, vector<1x4x128xbf16>
    %45 = vector.shape_cast %44 : vector<1x4x128xbf16> to vector<4x128xbf16>
    %cst_52 = arith.constant dense<0.000000e+00> : vector<64x128xf32>
    %46 = tpu.matmul %43, %45, %cst_52 {dimension_numbers = #tpu.dot_dimension_numbers<[1], [0], [0], [1], [0, 0, 1, 1], [], []>} : vector<64x4xbf16>, vector<4x128xbf16>, vector<64x128xf32> -> vector<64x128xf32>
    %47 = arith.addf %41, %46 : vector<64x128xf32>
    %c2_53 = arith.constant 2 : index
    %c0_54 = arith.constant 0 : index
    %c0_55 = arith.constant 0 : index
    %48 = vector.load %arg9[%c2_53, %c0_54, %c0_55] : memref<10x10x4xbf16, #tpu.memory_space<vmem>>, vector<8x8x4xbf16>
    %49 = vector.shape_cast %48 : vector<8x8x4xbf16> to vector<64x4xbf16>
    %c6 = arith.constant 6 : index
    %c0_56 = arith.constant 0 : index
    %c0_57 = arith.constant 0 : index
    %50 = vector.load %arg2[%c6, %c0_56, %c0_57] : memref<9x4x128xbf16, #tpu.memory_space<vmem>>, vector<1x4x128xbf16>
    %51 = vector.shape_cast %50 : vector<1x4x128xbf16> to vector<4x128xbf16>
    %cst_58 = arith.constant dense<0.000000e+00> : vector<64x128xf32>
    %52 = tpu.matmul %49, %51, %cst_58 {dimension_numbers = #tpu.dot_dimension_numbers<[1], [0], [0], [1], [0, 0, 1, 1], [], []>} : vector<64x4xbf16>, vector<4x128xbf16>, vector<64x128xf32> -> vector<64x128xf32>
    %53 = arith.addf %47, %52 : vector<64x128xf32>
    %c2_59 = arith.constant 2 : index
    %c1_60 = arith.constant 1 : index
    %c0_61 = arith.constant 0 : index
    %54 = vector.load %arg9[%c2_59, %c1_60, %c0_61] : memref<10x10x4xbf16, #tpu.memory_space<vmem>>, vector<8x8x4xbf16>
    %55 = vector.shape_cast %54 : vector<8x8x4xbf16> to vector<64x4xbf16>
    %c7 = arith.constant 7 : index
    %c0_62 = arith.constant 0 : index
    %c0_63 = arith.constant 0 : index
    %56 = vector.load %arg2[%c7, %c0_62, %c0_63] : memref<9x4x128xbf16, #tpu.memory_space<vmem>>, vector<1x4x128xbf16>
    %57 = vector.shape_cast %56 : vector<1x4x128xbf16> to vector<4x128xbf16>
    %cst_64 = arith.constant dense<0.000000e+00> : vector<64x128xf32>
    %58 = tpu.matmul %55, %57, %cst_64 {dimension_numbers = #tpu.dot_dimension_numbers<[1], [0], [0], [1], [0, 0, 1, 1], [], []>} : vector<64x4xbf16>, vector<4x128xbf16>, vector<64x128xf32> -> vector<64x128xf32>
    %59 = arith.addf %53, %58 : vector<64x128xf32>
    %c2_65 = arith.constant 2 : index
    %c2_66 = arith.constant 2 : index
    %c0_67 = arith.constant 0 : index
    %60 = vector.load %arg9[%c2_65, %c2_66, %c0_67] : memref<10x10x4xbf16, #tpu.memory_space<vmem>>, vector<8x8x4xbf16>
    %61 = vector.shape_cast %60 : vector<8x8x4xbf16> to vector<64x4xbf16>
    %c8 = arith.constant 8 : index
    %c0_68 = arith.constant 0 : index
    %c0_69 = arith.constant 0 : index
    %62 = vector.load %arg2[%c8, %c0_68, %c0_69] : memref<9x4x128xbf16, #tpu.memory_space<vmem>>, vector<1x4x128xbf16>
    %63 = vector.shape_cast %62 : vector<1x4x128xbf16> to vector<4x128xbf16>
    %cst_70 = arith.constant dense<0.000000e+00> : vector<64x128xf32>
    %64 = tpu.matmul %61, %63, %cst_70 {dimension_numbers = #tpu.dot_dimension_numbers<[1], [0], [0], [1], [0, 0, 1, 1], [], []>} : vector<64x4xbf16>, vector<4x128xbf16>, vector<64x128xf32> -> vector<64x128xf32>
    %65 = arith.addf %59, %64 : vector<64x128xf32>
    %c0_71 = arith.constant 0 : index
    %c0_72 = arith.constant 0 : index
    %66 = vector.load %arg3[%c0_71, %c0_72] : memref<1x128xf32, #tpu.memory_space<vmem>>, vector<1x128xf32>
    %67 = vector.broadcast %66 : vector<1x128xf32> to vector<64x128xf32>
    %68 = arith.mulf %65, %67 : vector<64x128xf32>
    %c0_73 = arith.constant 0 : index
    %c0_74 = arith.constant 0 : index
    %69 = vector.load %arg4[%c0_73, %c0_74] : memref<1x128xf32, #tpu.memory_space<vmem>>, vector<1x128xf32>
    %70 = vector.broadcast %69 : vector<1x128xf32> to vector<64x128xf32>
    %71 = arith.addf %68, %70 : vector<64x128xf32>
    %cst_75 = arith.constant 0.000000e+00 : f32
    %72 = vector.broadcast %cst_75 : f32 to vector<64x128xf32>
    %73 = arith.maximumf %71, %72 : vector<64x128xf32>
    %cst_76 = arith.constant 0.000000e+00 : bf16
    %74 = vector.broadcast %cst_76 : bf16 to vector<10x10x128xbf16>
    %c0_77 = arith.constant 0 : index
    %c0_78 = arith.constant 0 : index
    %c0_79 = arith.constant 0 : index
    %75 = vector.load %arg10[%c0_77, %c0_78, %c0_79] : memref<10x10x128xbf16, #tpu.memory_space<vmem>>, vector<10x10x128xbf16>
    tpu.vector_store %arg10[%c0_77, %c0_78, %c0_79], %74 {strides = array<i32>} : memref<10x10x128xbf16, #tpu.memory_space<vmem>>, vector<10x10x128xbf16>,
    %76 = vector.shape_cast %73 : vector<64x128xf32> to vector<8x8x128xf32>
    %77 = arith.truncf %76 : vector<8x8x128xf32> to vector<8x8x128xbf16>
    %c1_80 = arith.constant 1 : index
    %c1_81 = arith.constant 1 : index
    %c0_82 = arith.constant 0 : index
    %78 = vector.load %arg10[%c1_80, %c1_81, %c0_82] : memref<10x10x128xbf16, #tpu.memory_space<vmem>>, vector<8x8x128xbf16>
    tpu.vector_store %arg10[%c1_80, %c1_81, %c0_82], %77 {strides = array<i32>} : memref<10x10x128xbf16, #tpu.memory_space<vmem>>, vector<8x8x128xbf16>,
    %cst_83 = arith.constant 0.000000e+00 : f32
    %79 = vector.broadcast %cst_83 : f32 to vector<64x128xf32>
    %c0_84 = arith.constant 0 : index
    %c0_85 = arith.constant 0 : index
    %c0_86 = arith.constant 0 : index
    %80 = vector.load %arg10[%c0_84, %c0_85, %c0_86] : memref<10x10x128xbf16, #tpu.memory_space<vmem>>, vector<8x8x128xbf16>
    %81 = vector.shape_cast %80 : vector<8x8x128xbf16> to vector<64x128xbf16>
    %c0_87 = arith.constant 0 : index
    %c0_88 = arith.constant 0 : index
    %c0_89 = arith.constant 0 : index
    %82 = vector.load %arg5[%c0_87, %c0_88, %c0_89] : memref<9x128x128xbf16, #tpu.memory_space<vmem>>, vector<1x128x128xbf16>
    %83 = vector.shape_cast %82 : vector<1x128x128xbf16> to vector<128x128xbf16>
    %cst_90 = arith.constant dense<0.000000e+00> : vector<64x128xf32>
    %84 = tpu.matmul %81, %83, %cst_90 {dimension_numbers = #tpu.dot_dimension_numbers<[1], [0], [0], [1], [0, 0, 1, 1], [], []>} : vector<64x128xbf16>, vector<128x128xbf16>, vector<64x128xf32> -> vector<64x128xf32>
    %85 = arith.addf %79, %84 : vector<64x128xf32>
    %c0_91 = arith.constant 0 : index
    %c1_92 = arith.constant 1 : index
    %c0_93 = arith.constant 0 : index
    %86 = vector.load %arg10[%c0_91, %c1_92, %c0_93] : memref<10x10x128xbf16, #tpu.memory_space<vmem>>, vector<8x8x128xbf16>
    %87 = vector.shape_cast %86 : vector<8x8x128xbf16> to vector<64x128xbf16>
    %c1_94 = arith.constant 1 : index
    %c0_95 = arith.constant 0 : index
    %c0_96 = arith.constant 0 : index
    %88 = vector.load %arg5[%c1_94, %c0_95, %c0_96] : memref<9x128x128xbf16, #tpu.memory_space<vmem>>, vector<1x128x128xbf16>
    %89 = vector.shape_cast %88 : vector<1x128x128xbf16> to vector<128x128xbf16>
    %cst_97 = arith.constant dense<0.000000e+00> : vector<64x128xf32>
    %90 = tpu.matmul %87, %89, %cst_97 {dimension_numbers = #tpu.dot_dimension_numbers<[1], [0], [0], [1], [0, 0, 1, 1], [], []>} : vector<64x128xbf16>, vector<128x128xbf16>, vector<64x128xf32> -> vector<64x128xf32>
    %91 = arith.addf %85, %90 : vector<64x128xf32>
    %c0_98 = arith.constant 0 : index
    %c2_99 = arith.constant 2 : index
    %c0_100 = arith.constant 0 : index
    %92 = vector.load %arg10[%c0_98, %c2_99, %c0_100] : memref<10x10x128xbf16, #tpu.memory_space<vmem>>, vector<8x8x128xbf16>
    %93 = vector.shape_cast %92 : vector<8x8x128xbf16> to vector<64x128xbf16>
    %c2_101 = arith.constant 2 : index
    %c0_102 = arith.constant 0 : index
    %c0_103 = arith.constant 0 : index
    %94 = vector.load %arg5[%c2_101, %c0_102, %c0_103] : memref<9x128x128xbf16, #tpu.memory_space<vmem>>, vector<1x128x128xbf16>
    %95 = vector.shape_cast %94 : vector<1x128x128xbf16> to vector<128x128xbf16>
    %cst_104 = arith.constant dense<0.000000e+00> : vector<64x128xf32>
    %96 = tpu.matmul %93, %95, %cst_104 {dimension_numbers = #tpu.dot_dimension_numbers<[1], [0], [0], [1], [0, 0, 1, 1], [], []>} : vector<64x128xbf16>, vector<128x128xbf16>, vector<64x128xf32> -> vector<64x128xf32>
    %97 = arith.addf %91, %96 : vector<64x128xf32>
    %c1_105 = arith.constant 1 : index
    %c0_106 = arith.constant 0 : index
    %c0_107 = arith.constant 0 : index
    %98 = vector.load %arg10[%c1_105, %c0_106, %c0_107] : memref<10x10x128xbf16, #tpu.memory_space<vmem>>, vector<8x8x128xbf16>
    %99 = vector.shape_cast %98 : vector<8x8x128xbf16> to vector<64x128xbf16>
    %c3_108 = arith.constant 3 : index
    %c0_109 = arith.constant 0 : index
    %c0_110 = arith.constant 0 : index
    %100 = vector.load %arg5[%c3_108, %c0_109, %c0_110] : memref<9x128x128xbf16, #tpu.memory_space<vmem>>, vector<1x128x128xbf16>
    %101 = vector.shape_cast %100 : vector<1x128x128xbf16> to vector<128x128xbf16>
    %cst_111 = arith.constant dense<0.000000e+00> : vector<64x128xf32>
    %102 = tpu.matmul %99, %101, %cst_111 {dimension_numbers = #tpu.dot_dimension_numbers<[1], [0], [0], [1], [0, 0, 1, 1], [], []>} : vector<64x128xbf16>, vector<128x128xbf16>, vector<64x128xf32> -> vector<64x128xf32>
    %103 = arith.addf %97, %102 : vector<64x128xf32>
    %c1_112 = arith.constant 1 : index
    %c1_113 = arith.constant 1 : index
    %c0_114 = arith.constant 0 : index
    %104 = vector.load %arg10[%c1_112, %c1_113, %c0_114] : memref<10x10x128xbf16, #tpu.memory_space<vmem>>, vector<8x8x128xbf16>
    %105 = vector.shape_cast %104 : vector<8x8x128xbf16> to vector<64x128xbf16>
    %c4_115 = arith.constant 4 : index
    %c0_116 = arith.constant 0 : index
    %c0_117 = arith.constant 0 : index
    %106 = vector.load %arg5[%c4_115, %c0_116, %c0_117] : memref<9x128x128xbf16, #tpu.memory_space<vmem>>, vector<1x128x128xbf16>
    %107 = vector.shape_cast %106 : vector<1x128x128xbf16> to vector<128x128xbf16>
    %cst_118 = arith.constant dense<0.000000e+00> : vector<64x128xf32>
    %108 = tpu.matmul %105, %107, %cst_118 {dimension_numbers = #tpu.dot_dimension_numbers<[1], [0], [0], [1], [0, 0, 1, 1], [], []>} : vector<64x128xbf16>, vector<128x128xbf16>, vector<64x128xf32> -> vector<64x128xf32>
    %109 = arith.addf %103, %108 : vector<64x128xf32>
    %c1_119 = arith.constant 1 : index
    %c2_120 = arith.constant 2 : index
    %c0_121 = arith.constant 0 : index
    %110 = vector.load %arg10[%c1_119, %c2_120, %c0_121] : memref<10x10x128xbf16, #tpu.memory_space<vmem>>, vector<8x8x128xbf16>
    %111 = vector.shape_cast %110 : vector<8x8x128xbf16> to vector<64x128xbf16>
    %c5_122 = arith.constant 5 : index
    %c0_123 = arith.constant 0 : index
    %c0_124 = arith.constant 0 : index
    %112 = vector.load %arg5[%c5_122, %c0_123, %c0_124] : memref<9x128x128xbf16, #tpu.memory_space<vmem>>, vector<1x128x128xbf16>
    %113 = vector.shape_cast %112 : vector<1x128x128xbf16> to vector<128x128xbf16>
    %cst_125 = arith.constant dense<0.000000e+00> : vector<64x128xf32>
    %114 = tpu.matmul %111, %113, %cst_125 {dimension_numbers = #tpu.dot_dimension_numbers<[1], [0], [0], [1], [0, 0, 1, 1], [], []>} : vector<64x128xbf16>, vector<128x128xbf16>, vector<64x128xf32> -> vector<64x128xf32>
    %115 = arith.addf %109, %114 : vector<64x128xf32>
    %c2_126 = arith.constant 2 : index
    %c0_127 = arith.constant 0 : index
    %c0_128 = arith.constant 0 : index
    %116 = vector.load %arg10[%c2_126, %c0_127, %c0_128] : memref<10x10x128xbf16, #tpu.memory_space<vmem>>, vector<8x8x128xbf16>
    %117 = vector.shape_cast %116 : vector<8x8x128xbf16> to vector<64x128xbf16>
    %c6_129 = arith.constant 6 : index
    %c0_130 = arith.constant 0 : index
    %c0_131 = arith.constant 0 : index
    %118 = vector.load %arg5[%c6_129, %c0_130, %c0_131] : memref<9x128x128xbf16, #tpu.memory_space<vmem>>, vector<1x128x128xbf16>
    %119 = vector.shape_cast %118 : vector<1x128x128xbf16> to vector<128x128xbf16>
    %cst_132 = arith.constant dense<0.000000e+00> : vector<64x128xf32>
    %120 = tpu.matmul %117, %119, %cst_132 {dimension_numbers = #tpu.dot_dimension_numbers<[1], [0], [0], [1], [0, 0, 1, 1], [], []>} : vector<64x128xbf16>, vector<128x128xbf16>, vector<64x128xf32> -> vector<64x128xf32>
    %121 = arith.addf %115, %120 : vector<64x128xf32>
    %c2_133 = arith.constant 2 : index
    %c1_134 = arith.constant 1 : index
    %c0_135 = arith.constant 0 : index
    %122 = vector.load %arg10[%c2_133, %c1_134, %c0_135] : memref<10x10x128xbf16, #tpu.memory_space<vmem>>, vector<8x8x128xbf16>
    %123 = vector.shape_cast %122 : vector<8x8x128xbf16> to vector<64x128xbf16>
    %c7_136 = arith.constant 7 : index
    %c0_137 = arith.constant 0 : index
    %c0_138 = arith.constant 0 : index
    %124 = vector.load %arg5[%c7_136, %c0_137, %c0_138] : memref<9x128x128xbf16, #tpu.memory_space<vmem>>, vector<1x128x128xbf16>
    %125 = vector.shape_cast %124 : vector<1x128x128xbf16> to vector<128x128xbf16>
    %cst_139 = arith.constant dense<0.000000e+00> : vector<64x128xf32>
    %126 = tpu.matmul %123, %125, %cst_139 {dimension_numbers = #tpu.dot_dimension_numbers<[1], [0], [0], [1], [0, 0, 1, 1], [], []>} : vector<64x128xbf16>, vector<128x128xbf16>, vector<64x128xf32> -> vector<64x128xf32>
    %127 = arith.addf %121, %126 : vector<64x128xf32>
    %c2_140 = arith.constant 2 : index
    %c2_141 = arith.constant 2 : index
    %c0_142 = arith.constant 0 : index
    %128 = vector.load %arg10[%c2_140, %c2_141, %c0_142] : memref<10x10x128xbf16, #tpu.memory_space<vmem>>, vector<8x8x128xbf16>
    %129 = vector.shape_cast %128 : vector<8x8x128xbf16> to vector<64x128xbf16>
    %c8_143 = arith.constant 8 : index
    %c0_144 = arith.constant 0 : index
    %c0_145 = arith.constant 0 : index
    %130 = vector.load %arg5[%c8_143, %c0_144, %c0_145] : memref<9x128x128xbf16, #tpu.memory_space<vmem>>, vector<1x128x128xbf16>
    %131 = vector.shape_cast %130 : vector<1x128x128xbf16> to vector<128x128xbf16>
    %cst_146 = arith.constant dense<0.000000e+00> : vector<64x128xf32>
    %132 = tpu.matmul %129, %131, %cst_146 {dimension_numbers = #tpu.dot_dimension_numbers<[1], [0], [0], [1], [0, 0, 1, 1], [], []>} : vector<64x128xbf16>, vector<128x128xbf16>, vector<64x128xf32> -> vector<64x128xf32>
    %133 = arith.addf %127, %132 : vector<64x128xf32>
    %c0_147 = arith.constant 0 : index
    %c0_148 = arith.constant 0 : index
    %134 = vector.load %arg6[%c0_147, %c0_148] : memref<1x128xf32, #tpu.memory_space<vmem>>, vector<1x128xf32>
    %135 = vector.broadcast %134 : vector<1x128xf32> to vector<64x128xf32>
    %136 = arith.mulf %133, %135 : vector<64x128xf32>
    %c0_149 = arith.constant 0 : index
    %c0_150 = arith.constant 0 : index
    %137 = vector.load %arg7[%c0_149, %c0_150] : memref<1x128xf32, #tpu.memory_space<vmem>>, vector<1x128xf32>
    %138 = vector.broadcast %137 : vector<1x128xf32> to vector<64x128xf32>
    %139 = arith.addf %136, %138 : vector<64x128xf32>
    %cst_151 = arith.constant 0.000000e+00 : f32
    %140 = vector.broadcast %cst_151 : f32 to vector<64x128xf32>
    %141 = arith.maximumf %139, %140 : vector<64x128xf32>
    %142 = vector.shape_cast %141 : vector<64x128xf32> to vector<8x8x128xf32>
    %c0_152 = arith.constant 0 : index
    %c0_153 = arith.constant 0 : index
    %c0_154 = arith.constant 0 : index
    %c0_155 = arith.constant 0 : index
    %143 = vector.load %arg8[%c0_152, %c0_153, %c0_154, %c0_155] : memref<1x8x8x128xf32, #tpu.memory_space<vmem>>, vector<1x8x8x128xf32>
    %144 = vector.shape_cast %143 : vector<1x8x8x128xf32> to vector<8x8x128xf32>
    %145 = vector.shape_cast %142 : vector<8x8x128xf32> to vector<1x8x8x128xf32>
    tpu.vector_store %arg8[%c0_152, %c0_153, %c0_154, %c0_155], %145 {strides = array<i32>} : memref<1x8x8x128xf32, #tpu.memory_space<vmem>>, vector<1x8x8x128xf32>,
    return
  }
  func.func @transform_0(%arg0: i32) -> (i32, i32, i32, i32, i32) {
    %c0_i32 = arith.constant 0 : i32
    %c0_i32_0 = arith.constant 0 : i32
    %c0_i32_1 = arith.constant 0 : i32
    %c0_i32_2 = arith.constant 0 : i32
    %c0_i32_3 = arith.constant 0 : i32
    return %arg0, %c0_i32, %c0_i32_0, %c0_i32_1, %c0_i32_2 : i32, i32, i32, i32, i32
  }
  func.func @transform_1(%arg0: i32) -> (i32, i32, i32) {
    %c0_i32 = arith.constant 0 : i32
    %c0_i32_0 = arith.constant 0 : i32
    %c0_i32_1 = arith.constant 0 : i32
    %c0_i32_2 = arith.constant 0 : i32
    return %c0_i32, %c0_i32_0, %c0_i32_1 : i32, i32, i32
  }
  func.func @transform_2(%arg0: i32) -> (i32, i32) {
    %c0_i32 = arith.constant 0 : i32
    %c0_i32_0 = arith.constant 0 : i32
    %c0_i32_1 = arith.constant 0 : i32
    return %c0_i32, %c0_i32_0 : i32, i32
  }
  func.func @transform_3(%arg0: i32) -> (i32, i32) {
    %c0_i32 = arith.constant 0 : i32
    %c0_i32_0 = arith.constant 0 : i32
    %c0_i32_1 = arith.constant 0 : i32
    return %c0_i32, %c0_i32_0 : i32, i32
  }
  func.func @transform_4(%arg0: i32) -> (i32, i32, i32) {
    %c0_i32 = arith.constant 0 : i32
    %c0_i32_0 = arith.constant 0 : i32
    %c0_i32_1 = arith.constant 0 : i32
    %c0_i32_2 = arith.constant 0 : i32
    return %c0_i32, %c0_i32_0, %c0_i32_1 : i32, i32, i32
  }
  func.func @transform_5(%arg0: i32) -> (i32, i32) {
    %c0_i32 = arith.constant 0 : i32
    %c0_i32_0 = arith.constant 0 : i32
    %c0_i32_1 = arith.constant 0 : i32
    return %c0_i32, %c0_i32_0 : i32, i32
  }
  func.func @transform_6(%arg0: i32) -> (i32, i32) {
    %c0_i32 = arith.constant 0 : i32
    %c0_i32_0 = arith.constant 0 : i32
    %c0_i32_1 = arith.constant 0 : i32
    return %c0_i32, %c0_i32_0 : i32, i32
  }
  func.func @transform_7(%arg0: i32) -> (i32, i32, i32, i32) {
    %c0_i32 = arith.constant 0 : i32
    %c0_i32_0 = arith.constant 0 : i32
    %c0_i32_1 = arith.constant 0 : i32
    %c0_i32_2 = arith.constant 0 : i32
    return %arg0, %c0_i32, %c0_i32_0, %c0_i32_1 : i32, i32, i32, i32
  }
}

</mosaic_0001>

<bundles_post_ra>
// kernel: down_forward.1
= control target key start
LH: loop header
LB: loop body
LE: loop exit
PB: predicated region body
PF: predicated region fallthrough
CT: control target
= control target key end

     0   :  { %s4448_s24 = smov 0   ;;  %s5552_s0 = inlined_call_operand.vmem [shape: bf16[2,8,2,8,8], index: 0, kind: input, shape index: {}]   ;;  %s5553_s1 = inlined_call_operand.vmem [shape: bf16[9,4,128], index: 1, kind: input, shape index: {}]   ;;  %s5554_s2 = inlined_call_operand.vmem [shape: f32[1,128], index: 2, kind: input, shape index: {}]   ;;  %s5555_s3 = inlined_call_operand.vmem [shape: f32[1,128], index: 3, kind: input, shape index: {}]   ;;  %s5556_s4 = inlined_call_operand.vmem [shape: bf16[9,128,128], index: 4, kind: input, shape index: {}]   ;;  %s5557_s5 = inlined_call_operand.vmem [shape: f32[1,128], index: 5, kind: input, shape index: {}]   ;;  %s5558_s6 = inlined_call_operand.vmem [shape: f32[1,128], index: 6, kind: input, shape index: {}]   ;;  %s5559_s7 = inlined_call_operand.vmem [shape: f32[2,8,8,128], index: 7, kind: output, shape index: {}]  }
   0x1 LB: > { %s3646_s25 = sadd.s32 4294967295, %s4404_s24   ;;  %p3650_p0 = scmp.ge.s32.totalorder %s4404_s24, 1  ;;  %s4404_s24 = sphi %s4448_s24, %s17_s24  }
   0x2   : > { %p237_p1 = scmp.lt.s32.totalorder %s4404_s24, 3 }
   0x4   : > { %p238_p2 = pnand %p3650_p0, %p237_p1 }
   0x5   : > { %p269_p3 = scmp.lt.s32.totalorder (!%p238_p2), %s3646_s25, 1  ;;  %s4407_s30 = smov (!%p238_p2), 124  }
   0x6   : > { %241 = sbr.rel (%p238_p2) target bundleno = 775 (0x307), region = 48 }
   0xb   : > { %vm385_vm0 = vcmask 27648   ;;  %vm387_vm1 = vcmask 24576   ;;  %v4406_v0 = vmov 0   ;;  %s5573_s25 = smov (!%p269_p3, %s3646_s25), 1  ;;  %v550_v44 = vld [vmem:[%s5553_s1] sm:$0x3] }
   0xc   : > { %399 = vst.msk [vmem:[#allocation2 + $0x30] sm:$0xf] %vm385_vm0, %v4406_v0  ;;  %s4269_s26 = sshll.u32 %s5573_s25, 6  ;;  %vm701_vm2 = vcmask 1041408   ;;  %vm489_vm3 = vsmask.f32 7938 }
   0xd   : > { %400 = vst.msk [vmem:[#allocation2 + $0x34] sm:$0x1] %vm387_vm1, %v4406_v0  ;;  %s273_s29 = scalar_lea.vmem %s5552_s0, %s4269_s26  ;;  %v767_v45 = vsel %vm701_vm2, %v550_v44, 0  ;;  %vm495_vm4 = vsmask.f32 256  ;;  %vm4551_vm5 = vmand %vm385_vm0, %vm489_vm3  ;;  %vm688_vm7 = vcmask 31744   ;;  %s5506_s20 = scalar_lea.vmem %s5559_s7, %s4269_s26 }
   0xe   : > { %401 = vst.msk [vmem:[#allocation2 + $0x38] sm:$0xf] %vm385_vm0, %v4406_v0  ;;  %v285_v1 = vld [vmem:[%s273_s29 + $0x28] sm:$0xff]   ;;  %v286_v2 = vld [vmem:[%s273_s29 + $0x30] sm:$0xff]   ;;  %v283_v3 = vld [vmem:[%s273_s29 + $0x18] sm:$0xff]   ;;  %4368 = vmatpush.bf16.msra.mxu3 %v767_v45  ;;  %776 = vmatpush.bf16.msra.mxu1 %v767_v45  ;;  %vm822_vm11 = vcmask 1042432  }
   0xf   : > { %402 = vst.msk [vmem:[#allocation2 + $0x3c] sm:$0x1] %vm387_vm1, %v4406_v0  ;;  %v302_v4 = vunpack.c.l.bf16 %v285_v1  ;;  %v303_v5 = vunpack.c.l.bf16 %v286_v2  ;;  %v310_v6 = vunpack.c.h.bf16 %v285_v1  ;;  %v311_v7 = vunpack.c.h.bf16 %v286_v2  ;;  %v284_v8 = vld [vmem:[%s273_s29 + $0x20] sm:$0xff]   ;;  %v281_v9 = vld [vmem:[%s273_s29 + $0x8] sm:$0xff]   ;;  %v282_v10 = vld [vmem:[%s273_s29 + $0x10] sm:$0xff]  }
  0x10   : > { %386 = vst.msk [vmem:[#allocation2] sm:$0xf] %vm385_vm0, %v4406_v0  ;;  %v300_v11 = vunpack.c.l.bf16 %v283_v3  ;;  %v301_v12 = vunpack.c.l.bf16 %v284_v8  ;;  %v308_v13 = vunpack.c.h.bf16 %v283_v3  ;;  %v309_v14 = vunpack.c.h.bf16 %v284_v8  ;;  %v280_v15 = vld [vmem:[%s273_s29] sm:$0xff]   ;;  %v287_v24 = vld [vmem:[%s273_s29 + $0x38] sm:$0xff]   ;;  %vm4557_vm6 = vmand %vm387_vm1, %vm495_vm4 }
  0x11   : > { %388 = vst.msk [vmem:[#allocation2 + $0x4] sm:$0x1] %vm387_vm1, %v4406_v0  ;;  %v4480_v16 = vmax.f32 %v302_v4, %v310_v6  ;;  %v4482_v17 = vmax.f32 %v303_v5, %v311_v7  ;;  %v298_v18 = vunpack.c.l.bf16 %v281_v9  ;;  %v299_v19 = vunpack.c.l.bf16 %v282_v10 }
  0x12   : > { %389 = vst.msk [vmem:[#allocation2 + $0x8] sm:$0xf] %vm385_vm0, %v4406_v0  ;;  %v4486_v20 = vmax.f32 %v300_v11, %v308_v13  ;;  %v4488_v21 = vmax.f32 %v301_v12, %v309_v14  ;;  %v306_v22 = vunpack.c.h.bf16 %v281_v9  ;;  %v307_v23 = vunpack.c.h.bf16 %v282_v10 }
  0x13   : > { %390 = vst.msk [vmem:[#allocation2 + $0xc] sm:$0x1] %vm387_vm1, %v4406_v0  ;;  %v297_v25 = vunpack.c.l.bf16 %v280_v15  ;;  %v305_v26 = vunpack.c.h.bf16 %v280_v15  ;;  %v304_v30 = vunpack.c.l.bf16 %v287_v24  ;;  %v4384_v31 = vpack.i.bf16 %v4482_v17, %v4480_v16  ;;  %v524_v12 = vld [vmem:[#allocation2 + $0x30] sm:$0xf] }
  0x14   : > { %391 = vst.msk [vmem:[#allocation2 + $0x10] sm:$0xf] %vm385_vm0, %v4406_v0  ;;  %v4494_v27 = vmax.f32 %v298_v18, %v306_v22  ;;  %v4496_v28 = vmax.f32 %v299_v19, %v307_v23  ;;  %v312_v32 = vunpack.c.h.bf16 %v287_v24  ;;  %v4379_v33 = vpack.i.bf16 %v4488_v21, %v4486_v20  ;;  %v3696_v24 = vld [vmem:[%s5553_s1 + $0x4] sm:$0x3] }
  0x15   : > { %392 = vst.msk [vmem:[#allocation2 + $0x14] sm:$0x1] %vm387_vm1, %v4406_v0  ;;  %v313_v29 = vmax.f32 %v297_v25, %v305_v26  ;;  %4385 = vrot.lane.b32.xlu1 %v4384_v31, %s4407_s30  ;;  %v530_v13 = vld [vmem:[#allocation2 + $0x38] sm:$0xf]  ;;  %vm559_vm8 = vsmask.f32 3328 }
  0x16   : > { %393 = vst.msk [vmem:[#allocation2 + $0x18] sm:$0xf] %vm385_vm0, %v4406_v0  ;;  %v320_v34 = vmax.f32 %v304_v30, %v312_v32  ;;  %4380 = vrot.lane.b32.xlu0 %v4379_v33, %s4407_s30  ;;  %v4389_v37 = vpack.i.bf16 %v4496_v28, %v4494_v27  ;;  %v533_v26 = vld [vmem:[#allocation2 + $0x3c] sm:$0x1]  ;;  %v884_v32 = vsel %vm701_vm2, %v3696_v24, 0  ;;  %vm823_vm12 = vcmask 1046532  }
  0x17   : > { %394 = vst.msk [vmem:[#allocation2 + $0x1c] sm:$0x1] %vm387_vm1, %v4406_v0  ;;  %v321_v35 = vpack.c.bf16 %v313_v29, %v313_v29  ;;  %v542_v25 = vld [vmem:[#allocation2] sm:$0xf]  ;;  %v527_v33 = vld [vmem:[#allocation2 + $0x34] sm:$0x1]  ;;  %vm4696_vm13 = vmor %vm822_vm11, %vm823_vm12 }
  0x18   : > { %395 = vst.msk [vmem:[#allocation2 + $0x20] sm:$0xf] %vm385_vm0, %v4406_v0  ;;  %v328_v36 = vpack.c.bf16 %v320_v34, %v320_v34  ;;  %v566_v44 = vshll.u32 %v542_v25, 16  ;;  %vm560_vm9 = vsmask.f32 7440  ;;  %vm1861_vm14 = vcmask 1043456  }
  0x19   : > { %396 = vst.msk [vmem:[#allocation2 + $0x24] sm:$0x1] %vm387_vm1, %v4406_v0  ;;  %v4523_v39 = vunpack.c.l.bf16 %v321_v35  ;;  %vm4632_vm10 = vmor %vm559_vm8, %vm560_vm9  ;;  %vm1866_vm15 = vcmask 1040384  }
  0x1a   : > { %397 = vst.msk [vmem:[#allocation2 + $0x28] sm:$0xf] %vm385_vm0, %v4406_v0  ;;  %v336_v38 = vunpack.c.l.bf16 %v328_v36 }
  0x1b   : > { %398 = vst.msk [vmem:[#allocation2 + $0x2c] sm:$0x1] %vm387_vm1, %v4406_v0 }
  0x1c   : > { %403 = vst.msk [vmem:[#allocation2 + $0x40] sm:$0xf] %vm385_vm0, %v4406_v0  ;;  %359 = vrot.lane.b32.xlu2 %v336_v38, %s4407_s30 }
  0x1d   : > { %404 = vst.msk [vmem:[#allocation2 + $0x44] sm:$0x1] %vm387_vm1, %v4406_v0  ;;  %4390 = vrot.lane.b32.xlu1 %v4389_v37, %s4407_s30 }
  0x1e   : > { %405 = vst.msk [vmem:[#allocation2 + $0x48] sm:$0xf] %vm385_vm0, %v4406_v0  ;;  %345 = vrot.lane.b32.xlu0 %v4523_v39, %s4407_s30  ;;  %vm5026_vm0 = vmand %vm1861_vm14, %vm489_vm3 }
  0x1f   : > { %406 = vst.msk [vmem:[#allocation2 + $0x4c] sm:$0x1] %vm387_vm1, %v4406_v0  ;;  %vm5039_vm1 = vmand %vm1866_vm15, %vm495_vm4 }
  0x20   : > { %1752 = vst [vmem:[#allocation3] sm:$0xf] %v4406_v0 }
  0x21   : > { %1753 = vst [vmem:[#allocation3 + $0x4] sm:$0x1] %v4406_v0 }
  0x22   : > { %1754 = vst [vmem:[#allocation3 + $0x8] sm:$0xf] %v4406_v0 }
  0x23   : > { %1755 = vst [vmem:[#allocation3 + $0xc] sm:$0x1] %v4406_v0  ;;  %v536_v48 = vld [vmem:[#allocation2 + $0x40] sm:$0xf] }
  0x24   : > { %1756 = vst [vmem:[#allocation3 + $0x10] sm:$0xf] %v4406_v0  ;;  %v539_v49 = vld [vmem:[#allocation2 + $0x44] sm:$0x1] }
  0x25   : > { %1757 = vst [vmem:[#allocation3 + $0x14] sm:$0x1] %v4406_v0 }
  0x26   : > { %1758 = vst [vmem:[#allocation3 + $0x18] sm:$0xf] %v4406_v0 }
  0x27   : > { %1759 = vst [vmem:[#allocation3 + $0x1c] sm:$0x1] %v4406_v0 }
  0x28   : > { %1760 = vst [vmem:[#allocation3 + $0x20] sm:$0xf] %v4406_v0 }
  0x29   : > { %1761 = vst [vmem:[#allocation3 + $0x24] sm:$0x1] %v4406_v0 }
  0x2a   : > { %1762 = vst [vmem:[#allocation3 + $0x28] sm:$0xf] %v4406_v0 }
  0x2b   : > { %1763 = vst [vmem:[#allocation3 + $0x2c] sm:$0x1] %v4406_v0 }
  0x2c   : > { %1764 = vst [vmem:[#allocation3 + $0x30] sm:$0xf] %v4406_v0 }
  0x2d   : > { %1765 = vst [vmem:[#allocation3 + $0x34] sm:$0x1] %v4406_v0 }
  0x2e   : > { %1766 = vst [vmem:[#allocation3 + $0x38] sm:$0xf] %v4406_v0 }
  0x2f   : > { %1767 = vst [vmem:[#allocation3 + $0x3c] sm:$0x1] %v4406_v0 }
  0x30   : > { %1768 = vst [vmem:[#allocation3 + $0x40] sm:$0xf] %v4406_v0 }
  0x31   : > { %1769 = vst [vmem:[#allocation3 + $0x44] sm:$0x1] %v4406_v0 }
  0x32   : > { %1770 = vst [vmem:[#allocation3 + $0x48] sm:$0xf] %v4406_v0 }
  0x33   : > { %1771 = vst [vmem:[#allocation3 + $0x4c] sm:$0x1] %v4406_v0  ;;  %v3663_v0 = vld [vmem:[%s5553_s1 + $0x2] sm:$0x3] }
  0x34   : > { %v703_v3 = vsel %vm701_vm2, %v3663_v0, 0 }
  0x35   : > { %4367 = vmatpush.bf16.msra.mxu2 %v703_v3  ;;  %712 = vmatpush.bf16.msra.mxu0 %v703_v3 }
  0x39   : > { %893 = vmatpush.bf16.msrb.mxu2 %v884_v32 }
  0x76   : > { %v360_v40 = vpop.permute.xlu2 %359 }
  0x77   : > { %v376_v41 = vmax.f32 %v336_v38, %v360_v40  ;;  %v518_v38 = vld [vmem:[#allocation2 + $0x28] sm:$0xf] }
  0x79   : > { %v384_v42 = vpack.c.bf16 %v376_v41, %v376_v41 }
  0x7b   : > { %v464_v43 = vshrl.u32 %v384_v42, 16  ;;  %v467_v47 = vshll.u32 %v384_v42, 16  ;;  %v3701_v42 = vld [vmem:[%s5553_s1 + $0x6] sm:$0x3] }
  0x7d   : > { %v466_v46 = vrot.slane %v464_v43, 7  ;;  %v563_v43 = vshrl.u32 %v542_v25, 16 }
  0x7f   : > { %v469_v51 = vor.u32 %v467_v47, %v466_v46  ;;  %v470_v52 = vrot.slane %v466_v46, 4  ;;  %v512_v47 = vld [vmem:[#allocation2 + $0x20] sm:$0xf] }
  0x81   : > { %v537_v58 = vsel %vm4551_vm5, %v469_v51, %v536_v48  ;;  %v540_v59 = vsel %vm4557_vm6, %v470_v52, %v539_v49  ;;  %v521_v48 = vld [vmem:[#allocation2 + $0x2c] sm:$0x1]  ;;  %v515_v52 = vld [vmem:[#allocation2 + $0x24] sm:$0x1] }
  0x82   : > { %538 = vst [vmem:[#allocation2 + $0x40] sm:$0xf] %v537_v58 }
  0x83   : > { %541 = vst [vmem:[#allocation2 + $0x44] sm:$0x1] %v540_v59  ;;  %v966_v59 = vsel %vm701_vm2, %v3701_v42, 0 }
  0x84   : > { %975 = vmatpush.bf16.msrb.mxu3 %v966_v59 }
  0x87   : > { %v4386_v54 = vpop.permute.xlu1 %4385 }
  0x88   : > { %v4388_v55 = vunpack.i.h.bf16 %v4386_v54  ;;  %v4387_v56 = vunpack.i.l.bf16 %v4386_v54  ;;  %v4381_v57 = vpop.permute.xlu0 %4380 }
  0x89   : > { %v4383_v60 = vunpack.i.h.bf16 %v4381_v57  ;;  %v4382_v61 = vunpack.i.l.bf16 %v4381_v57 }
  0x8a   : > { %v375_v62 = vmax.f32 %v4482_v17, %v4388_v55  ;;  %v374_v63 = vmax.f32 %v4480_v16, %v4387_v56 }
  0x8b   : > { %v373_v1 = vmax.f32 %v4488_v21, %v4383_v60  ;;  %v372_v2 = vmax.f32 %v4486_v20, %v4382_v61  ;;  %v3722_v60 = vld [vmem:[%s5553_s1 + $0x8] sm:$0x3] }
  0x8c   : > { %v383_v4 = vpack.c.bf16 %v375_v62, %v375_v62  ;;  %v382_v5 = vpack.c.bf16 %v374_v63, %v374_v63  ;;  %v565_v62 = vrot.slane %v563_v43, 4  ;;  %v568_v63 = vrot.slane %v566_v44, 5 }
  0x8d   : > { %v381_v6 = vpack.c.bf16 %v373_v1, %v373_v1  ;;  %v380_v7 = vpack.c.bf16 %v372_v2, %v372_v2  ;;  %v1160_v0 = vsel %vm701_vm2, %v3722_v60, 0 }
  0x8e   : > { %v456_v8 = vshrl.u32 %v383_v4, 16  ;;  %v459_v9 = vshll.u32 %v383_v4, 16  ;;  %v448_v10 = vshrl.u32 %v382_v5, 16  ;;  %v451_v11 = vshll.u32 %v382_v5, 16  ;;  %1169 = vmatpush.bf16.msrb.mxu0 %v1160_v0  ;;  %v4604_v5 = vld [vmem:[#allocation2 + $0x4] sm:$0x1] }
  0x8f   : > { %v440_v14 = vshrl.u32 %v381_v6, 16  ;;  %v443_v15 = vshll.u32 %v381_v6, 16  ;;  %v432_v16 = vshrl.u32 %v380_v7, 16  ;;  %v435_v17 = vshll.u32 %v380_v7, 16  ;;  %v4391_v18 = vpop.permute.xlu1 %4390 }
  0x90   : > { %v458_v19 = vrot.slane %v456_v8, 7  ;;  %v450_v20 = vrot.slane %v448_v10, 7  ;;  %v4393_v21 = vunpack.i.h.bf16 %v4391_v18  ;;  %v4392_v22 = vunpack.i.l.bf16 %v4391_v18  ;;  %v346_v23 = vpop.permute.xlu0 %345  ;;  %v500_v10 = vld [vmem:[#allocation2 + $0x10] sm:$0xf]  ;;  %v509_v18 = vld [vmem:[#allocation2 + $0x1c] sm:$0x1] }
  0x91   : > { %v442_v29 = vrot.slane %v440_v14, 7  ;;  %v434_v30 = vrot.slane %v432_v16, 7  ;;  %v369_v31 = vmax.f32 %v4523_v39, %v346_v23  ;;  %v572_v14 = vshll.u32 %v4604_v5, 16 }
  0x92   : > { %v461_v34 = vor.u32 %v459_v9, %v458_v19  ;;  %v462_v35 = vrot.slane %v458_v19, 4  ;;  %v453_v36 = vor.u32 %v451_v11, %v450_v20  ;;  %v454_v37 = vrot.slane %v450_v20, 4  ;;  %v506_v11 = vld [vmem:[#allocation2 + $0x18] sm:$0xf] }
  0x93   : > { %v445_v40 = vor.u32 %v443_v15, %v442_v29  ;;  %v446_v41 = vrot.slane %v442_v29, 4  ;;  %v437_v49 = vor.u32 %v435_v17, %v434_v30  ;;  %v438_v55 = vrot.slane %v434_v30, 4  ;;  %v491_v17 = vld [vmem:[#allocation2 + $0x8] sm:$0xf] }
  0x94   : > { %v531_v39 = vsel %vm4551_vm5, %v461_v34, %v530_v13  ;;  %v534_v45 = vsel %vm4557_vm6, %v462_v35, %v533_v26  ;;  %v525_v46 = vsel %vm4551_vm5, %v453_v36, %v524_v12  ;;  %v528_v51 = vsel %vm4557_vm6, %v454_v37, %v527_v33  ;;  %v497_v26 = vld [vmem:[#allocation2 + $0xc] sm:$0x1] }
  0x95   : > { %532 = vst [vmem:[#allocation2 + $0x38] sm:$0xf] %v531_v39  ;;  %v519_v54 = vsel %vm4551_vm5, %v445_v40, %v518_v38  ;;  %v371_v56 = vmax.f32 %v4496_v28, %v4393_v21  ;;  %v370_v57 = vmax.f32 %v4494_v27, %v4392_v22  ;;  %v377_v58 = vpack.c.bf16 %v369_v31, %v369_v31  ;;  %v503_v21 = vld [vmem:[#allocation2 + $0x14] sm:$0x1] }
  0x96   : > { %535 = vst [vmem:[#allocation2 + $0x3c] sm:$0x1] %v534_v45  ;;  %v522_v61 = vsel %vm4557_vm6, %v446_v41, %v521_v48  ;;  %v513_v27 = vsel %vm4551_vm5, %v437_v49, %v512_v47  ;;  %v516_v3 = vsel %vm4557_vm6, %v438_v55, %v515_v52  ;;  %v569_v13 = vor.u32 %v568_v63, %v565_v62  ;;  %v3670_v45 = vld [vmem:[#allocation2] sm:$0xf] }
  0x97   : > { %526 = vst [vmem:[#allocation2 + $0x30] sm:$0xf] %v525_v46  ;;  %v379_v28 = vpack.c.bf16 %v371_v56, %v371_v56  ;;  %v378_v1 = vpack.c.bf16 %v370_v57, %v370_v57  ;;  %v408_v2 = vshrl.u32 %v377_v58, 16  ;;  %v411_v4 = vshll.u32 %v377_v58, 16 }
  0x98   : > { %529 = vst [vmem:[#allocation2 + $0x34] sm:$0x1] %v528_v51  ;;  %v4609_v30 = vrot.slane %v569_v13, 4  ;;  %v4611_v31 = vrot.slane %v572_v14, 5 }
  0x99   : > { %520 = vst [vmem:[#allocation2 + $0x28] sm:$0xf] %v519_v54  ;;  %v424_v6 = vshrl.u32 %v379_v28, 16  ;;  %v427_v7 = vshll.u32 %v379_v28, 16  ;;  %v416_v8 = vshrl.u32 %v378_v1, 16  ;;  %v419_v9 = vshll.u32 %v378_v1, 16 }
  0x9a   : > { %523 = vst [vmem:[#allocation2 + $0x2c] sm:$0x1] %v522_v61  ;;  %v410_v12 = vrot.slane %v408_v2, 7 }
  0x9b   : > { %514 = vst [vmem:[#allocation2 + $0x20] sm:$0xf] %v513_v27  ;;  %v426_v15 = vrot.slane %v424_v6, 7  ;;  %v418_v16 = vrot.slane %v416_v8, 7  ;;  %v575_v8 = vsel %vm4632_vm10, %v4609_v30, %v4611_v31 }
  0x9c   : > { %517 = vst [vmem:[#allocation2 + $0x24] sm:$0x1] %v516_v3  ;;  %v413_v19 = vor.u32 %v411_v4, %v410_v12  ;;  %v414_v20 = vrot.slane %v410_v12, 4  ;;  %v549_v60 = vld [vmem:[#allocation2 + $0x38] sm:$0xf] }
  0x9d   : > { %v429_v22 = vor.u32 %v427_v7, %v426_v15  ;;  %v430_v23 = vrot.slane %v426_v15, 4  ;;  %v421_v24 = vor.u32 %v419_v9, %v418_v16  ;;  %v422_v25 = vrot.slane %v418_v16, 4 }
  0x9e   : > { %v492_v29 = vsel %vm4551_vm5, %v413_v19, %v491_v17  ;;  %v548_v37 = vld [vmem:[#allocation2 + $0x30] sm:$0xf]  ;;  %v498_v43 = vsel %vm4557_vm6, %v414_v20, %v497_v26  ;;  %v661_v9 = vshrl.u32 %v549_v60, 16  ;;  %v664_v14 = vshll.u32 %v549_v60, 16  ;;  %v4647_v17 = vld [vmem:[#allocation2 + $0x3c] sm:$0x1] }
  0x9f   : > { %v507_v32 = vsel %vm4551_vm5, %v429_v22, %v506_v11  ;;  %v510_v33 = vsel %vm4557_vm6, %v430_v23, %v509_v18  ;;  %v501_v34 = vsel %vm4551_vm5, %v421_v24, %v500_v10  ;;  %493 = vst [vmem:[#allocation2 + $0x8] sm:$0xf] %v492_v29  ;;  %v504_v38 = vsel %vm4557_vm6, %v422_v25, %v503_v21  ;;  %v4643_v13 = vld [vmem:[#allocation2 + $0x34] sm:$0x1] }
  0xa0   : > { %v4273_v35 = vld [vmem:[#allocation2 + $0x24] sm:$0xf0]  ;;  %508 = vst [vmem:[#allocation2 + $0x18] sm:$0xf] %v507_v32  ;;  %v647_v56 = vshrl.u32 %v548_v37, 16  ;;  %v650_v57 = vshll.u32 %v548_v37, 16  ;;  %v676_v37 = vunpack.c.l.b16 %v575_v8 }
  0xa1   : > { %v547_v36 = vld [vmem:[#allocation2 + $0x28] sm:$0xf]  ;;  %v4621_v40 = vld [vmem:[#allocation2 + $0x2c] sm:$0x1]  ;;  %511 = vst [vmem:[#allocation2 + $0x1c] sm:$0x1] %v510_v33 }
  0xa2   : > { %v633_v41 = vshrl.u32 %v547_v36, 16  ;;  %v636_v42 = vshll.u32 %v547_v36, 16  ;;  %v3678_v44 = vld [vmem:[#allocation2 + $0x20] sm:$0xf]  ;;  %502 = vst [vmem:[#allocation2 + $0x10] sm:$0xf] %v501_v34 }
  0xa3   : > { %v546_v39 = vld [vmem:[#allocation2 + $0x20] sm:$0xf]  ;;  %v3679_v50 = vor.u32 %v4273_v35, %v3678_v44  ;;  %v4625_v46 = vld [vmem:[#allocation2 + $0x24] sm:$0x1]  ;;  %505 = vst [vmem:[#allocation2 + $0x14] sm:$0x1] %v504_v38 }
  0xa4   : > { %v619_v47 = vshrl.u32 %v546_v39, 16  ;;  %v622_v48 = vshll.u32 %v546_v39, 16  ;;  %v628_v49 = vshll.u32 %v4625_v46, 16  ;;  %v635_v51 = vrot.slane %v633_v41, 4  ;;  %499 = vst [vmem:[#allocation2 + $0xc] sm:$0x1] %v498_v43 }
  0xa5   : > { %v638_v52 = vrot.slane %v636_v42, 5  ;;  %v642_v54 = vshll.u32 %v4621_v40, 16  ;;  %3686 = vmatmul.msk.bf16.vlgmr.msra.gmra.mxu3 %vm688_vm7, %v3679_v50  ;;  %v649_v27 = vrot.slane %v647_v56, 4  ;;  %v652_v28 = vrot.slane %v650_v57, 5  ;;  %v4274_v32 = vld [vmem:[#allocation2 + $0x34] sm:$0xf0] }
  0xa6   : > { %v621_v53 = vrot.slane %v619_v47, 4  ;;  %v624_v55 = vrot.slane %v622_v48, 5  ;;  %v4271_v61 = vld [vmem:[#allocation2 + $0x4] sm:$0xf0]  ;;  %v630_v7 = vrot.slane %v628_v49, 5  ;;  %v656_v19 = vshll.u32 %v4643_v13, 16 }
  0xa7   : > { %v639_v58 = vor.u32 %v638_v52, %v635_v51  ;;  %v644_v59 = vrot.slane %v642_v54, 5  ;;  %v543_v0 = vld [vmem:[#allocation2 + $0x8] sm:$0xf]  ;;  %v3671_v1 = vor.u32 %v4271_v61, %v3670_v45  ;;  %v653_v18 = vor.u32 %v652_v28, %v649_v27  ;;  %v545_v30 = vld [vmem:[#allocation2 + $0x18] sm:$0xf] }
  0xa8   : > { %v625_v63 = vor.u32 %v624_v55, %v621_v53  ;;  %v577_v3 = vshrl.u32 %v543_v0, 16  ;;  %v580_v4 = vshll.u32 %v543_v0, 16  ;;  %v663_v23 = vrot.slane %v661_v9, 4  ;;  %v3682_v35 = vld [vmem:[#allocation2 + $0x30] sm:$0xf] }
  0xa9   : > { %v640_v2 = vrot.slane %v639_v58, 4  ;;  %3684 = vmatmul.msk.bf16.vlgmr.msra.gmra.mxu1 %vm688_vm7, %v3671_v1  ;;  %v666_v24 = vrot.slane %v664_v14, 5  ;;  %v544_v25 = vld [vmem:[#allocation2 + $0x10] sm:$0xf]  ;;  %v670_v29 = vshll.u32 %v4647_v17, 16  ;;  %v654_v44 = vrot.slane %v653_v18, 4 }
  0xaa   : > { %v626_v6 = vrot.slane %v625_v63, 4  ;;  %v579_v11 = vrot.slane %v577_v3, 4  ;;  %v582_v12 = vrot.slane %v580_v4, 5  ;;  %v591_v38 = vshrl.u32 %v544_v25, 16  ;;  %v3735_v41 = vld [vmem:[%s5553_s1 + $0xa] sm:$0x3] }
  0xab   : > { %v645_v10 = vsel %vm4632_vm10, %v640_v2, %v644_v59  ;;  %v4650_v21 = vld [vmem:[#allocation2 + $0xc] sm:$0x1]  ;;  %v667_v34 = vor.u32 %v666_v24, %v663_v23  ;;  %v3674_v42 = vld [vmem:[#allocation2 + $0x10] sm:$0xf]  ;;  %v4272_v43 = vld [vmem:[#allocation2 + $0x14] sm:$0xf0]  ;;  %v3683_v58 = vor.u32 %v4274_v32, %v3682_v35 }
  0xac   : > { %v631_v15 = vsel %vm4632_vm10, %v626_v6, %v630_v7  ;;  %v681_v16 = vunpack.c.l.b16 %v645_v10  ;;  %v583_v22 = vor.u32 %v582_v12, %v579_v11  ;;  %v586_v26 = vshll.u32 %v4650_v21, 16  ;;  %v4660_v49 = vld [vmem:[#allocation2 + $0x14] sm:$0x1]  ;;  %v4662_v55 = vld [vmem:[#allocation2 + $0x1c] sm:$0x1] }
  0xad   : > { %v680_v20 = vunpack.c.l.b16 %v631_v15  ;;  %v658_v39 = vrot.slane %v656_v19, 5  ;;  %v594_v50 = vshll.u32 %v544_v25, 16  ;;  %v605_v45 = vshrl.u32 %v545_v30, 16  ;;  %v3740_v63 = vld [vmem:[%s5553_s1 + $0xc] sm:$0x3] }
  0xae   : > { %v584_v33 = vrot.slane %v583_v22, 4  ;;  %v588_v36 = vrot.slane %v586_v26, 5  ;;  %v672_v48 = vrot.slane %v670_v29, 5  ;;  %v593_v51 = vrot.slane %v591_v38, 4  ;;  %v3761_v1 = vld [vmem:[%s5553_s1 + $0xe] sm:$0x3] }
  0xaf   : > { %v686_v31 = vpack.c.b16 %v681_v16, %v680_v20  ;;  %v608_v52 = vshll.u32 %v545_v30, 16  ;;  %v668_v53 = vrot.slane %v667_v34, 4  ;;  %v596_v56 = vrot.slane %v594_v50, 5  ;;  %v4681_v14 = vld [vmem:[#allocation2 + $0xc] sm:$0x1] }
  0xb0   : > { %v589_v47 = vsel %vm4632_vm10, %v584_v33, %v588_v36  ;;  %v600_v57 = vshll.u32 %v4660_v49, 16  ;;  %v607_v59 = vrot.slane %v605_v45, 4  ;;  %v614_v61 = vshll.u32 %v4662_v55, 16  ;;  %v1199_v15 = vld [vmem:[#allocation2 + $0x8] sm:$0xe] }
  0xb1   : > { %3666 = vmatmul.msk.bf16.vlgmr.msra.gmra.mxu2 %vm688_vm7, %v686_v31  ;;  %v677_v54 = vunpack.c.l.b16 %v589_v47  ;;  %v610_v60 = vrot.slane %v608_v52, 5  ;;  %v597_v27 = vor.u32 %v596_v56, %v593_v51  ;;  %v1282_v28 = vsel %vm701_vm2, %v3735_v41, 0  ;;  %v1007_v16 = vld [vmem:[#allocation2 + $0x10] sm:$0xf]  ;;  %v1008_v20 = vld [vmem:[#allocation2 + $0x14] sm:$0x1] }
  0xb2   : > { %v3675_v2 = vor.u32 %v4272_v43, %v3674_v42  ;;  %1291 = vmatpush.bf16.msrb.mxu1 %v1282_v28  ;;  %v659_v4 = vsel %vm4632_vm10, %v654_v44, %v658_v39  ;;  %v673_v6 = vsel %vm4632_vm10, %v668_v53, %v672_v48  ;;  %v602_v7 = vrot.slane %v600_v57, 5  ;;  %v1200_v22 = vld [vmem:[#allocation2 + $0x10] sm:$0xe]  ;;  %v1005_v29 = vld [vmem:[#allocation2 + $0x8] sm:$0xf] }
  0xb3   : > { %v684_v0 = vpack.c.b16 %v677_v54, %v676_v37  ;;  %v611_v3 = vor.u32 %v610_v60, %v607_v59  ;;  %v1365_v8 = vsel %vm701_vm2, %v3740_v63, 0  ;;  %v598_v9 = vrot.slane %v597_v27, 4  ;;  %v3774_v23 = vld [vmem:[%s5553_s1 + $0x10] sm:$0x3]  ;;  %v3704_v41 = vld [vmem:[#allocation2 + $0x8] sm:$0xf] }
  0xb4   : > { %v616_v11 = vrot.slane %v614_v61, 5  ;;  %1374 = vmatpush.bf16.msra.mxu2 %v1365_v8  ;;  %v1559_v12 = vsel %vm701_vm2, %v3761_v1, 0  ;;  %v682_v18 = vunpack.c.l.b16 %v659_v4  ;;  %v683_v19 = vunpack.c.l.b16 %v673_v6  ;;  %v798_v42 = vld [vmem:[#allocation2] sm:$0xe]  ;;  %v4275_v39 = vld [vmem:[#allocation2 + $0xc] sm:$0xf0] }
  0xb5   : > { %3687 = vmatmul.msk.bf16.gmra.mxu3 %vm688_vm7, %v3683_v58  ;;  %3664 = vmatmul.msk.bf16.vlgmr.msra.gmra.mxu0 %vm688_vm7, %v684_v0  ;;  %v612_v10 = vrot.slane %v611_v3, 4  ;;  %v603_v24 = vsel %vm4632_vm10, %v598_v9, %v602_v7  ;;  %v3727_v26 = vrot.slane %v1199_v15, 9  ;;  %v1036_v30 = vshrl.u32 %v1007_v16, 16  ;;  %v799_v45 = vld [vmem:[#allocation2 + $0x8] sm:$0xe] }
  0xb6   : > { %1568 = vmatpush.bf16.msra.mxu3 %v1559_v12  ;;  %v1039_v31 = vshll.u32 %v1007_v16, 16  ;;  %v1225_v32 = vrot.slane %v4681_v14, 5  ;;  %v3728_v33 = vrot.slane %v1200_v22, 9  ;;  %v1229_v34 = vrot.slane %v1008_v20, 5  ;;  %v803_v4 = vld [vmem:[#allocation2 + $0x28] sm:$0xe] }
  0xb7   : > { %v617_v25 = vsel %vm4632_vm10, %v612_v10, %v616_v11  ;;  %v1681_v35 = vsel %vm701_vm2, %v3774_v23, 0  ;;  %v687_v36 = vpack.c.b16 %v683_v19, %v682_v18  ;;  %v678_v37 = vunpack.c.l.b16 %v603_v24  ;;  %v1201_v9 = vld [vmem:[#allocation2 + $0x18] sm:$0xe]  ;;  %v4713_v11 = vld [vmem:[#allocation2 + $0x1c] sm:$0x1] }
  0xb8   : > { %v679_v38 = vunpack.c.l.b16 %v617_v25  ;;  %1690 = vmatpush.bf16.msra.mxu0 %v1681_v35  ;;  %v1022_v43 = vshrl.u32 %v1005_v29, 16  ;;  %v1025_v44 = vshll.u32 %v1005_v29, 16  ;;  %v1038_v47 = vrot.slane %v1036_v30, 4  ;;  %v4715_v12 = vld [vmem:[#allocation2 + $0x24] sm:$0x1] }
  0xb9   : > { %3685 = vmatmul.msk.bf16.gmra.mxu1 %vm688_vm7, %v3675_v2  ;;  %v1041_v48 = vrot.slane %v1039_v31, 5  ;;  %v1226_v51 = vsel %vm4696_vm13, %v3727_v26, %v1225_v32  ;;  %v1230_v52 = vsel %vm4696_vm13, %v3728_v33, %v1229_v34  ;;  %v827_v54 = vrot.slane %v4604_v5, 5  ;;  %v802_v5 = vld [vmem:[#allocation2 + $0x20] sm:$0xe]  ;;  %v1009_v18 = vld [vmem:[#allocation2 + $0x18] sm:$0xf] }
  0xba   : > { %v831_v53 = vrot.slane %v4650_v21, 5  ;;  %v685_v56 = vpack.c.b16 %v679_v38, %v678_v37  ;;  %v3688_v57 = vrot.slane %v798_v42, 9  ;;  %v3705_v58 = vor.u32 %v4275_v39, %v3704_v41  ;;  %v1202_v24 = vld [vmem:[#allocation2 + $0x20] sm:$0xe]  ;;  %v800_v33 = vld [vmem:[#allocation2 + $0x10] sm:$0xe] }
  0xbb   : > { %v3689_v59 = vrot.slane %v799_v45, 9  ;;  %v1024_v60 = vrot.slane %v1022_v43, 4  ;;  %v1027_v61 = vrot.slane %v1025_v44, 5  ;;  %v1257_v63 = vunpack.c.l.b16 %v1226_v51  ;;  %v1011_v30 = vld [vmem:[#allocation2 + $0x20] sm:$0xf] }
  0xbc   : > { %v1258_v0 = vunpack.c.l.b16 %v1230_v52  ;;  %v1042_v27 = vor.u32 %v1041_v48, %v1038_v47  ;;  %v1045_v28 = vshll.u32 %v1008_v20, 16  ;;  %v828_v1 = vsel %vm4696_vm13, %v3688_v57, %v827_v54  ;;  %v4276_v42 = vld [vmem:[#allocation2 + $0x1c] sm:$0xf0]  ;;  %v801_v44 = vld [vmem:[#allocation2 + $0x18] sm:$0xe] }
  0xbd   : > { %v832_v21 = vsel %vm4696_vm13, %v3689_v59, %v831_v53  ;;  %v1028_v2 = vor.u32 %v1027_v61, %v1024_v60  ;;  %v1031_v3 = vshll.u32 %v4681_v14, 16  ;;  %v859_v10 = vunpack.c.l.b16 %v828_v1  ;;  %v804_v54 = vld [vmem:[#allocation2 + $0x30] sm:$0xe]  ;;  %v805_v59 = vld [vmem:[#allocation2 + $0x38] sm:$0xe] }
  0xbe   : > { %v1265_v6 = vpack.c.b16 %v1258_v0, %v1257_v63  ;;  %v1043_v7 = vrot.slane %v1042_v27, 4  ;;  %v1047_v8 = vrot.slane %v1045_v28, 5  ;;  %v3692_v15 = vrot.slane %v802_v5, 9 }
  0xbf   : > { %v860_v16 = vunpack.c.l.b16 %v832_v21  ;;  %v843_v19 = vrot.slane %v4625_v46, 5  ;;  %v3693_v20 = vrot.slane %v803_v4, 9  ;;  %v847_v14 = vrot.slane %v4621_v40, 5  ;;  %v3708_v46 = vld [vmem:[#allocation2 + $0x18] sm:$0xf] }
  0xc0   : > { %v1029_v22 = vrot.slane %v1028_v2, 4  ;;  %v1033_v23 = vrot.slane %v1031_v3, 5  ;;  %v3729_v25 = vrot.slane %v1201_v9, 9  ;;  %v1048_v26 = vsel %vm4632_vm10, %v1043_v7, %v1047_v8 }
  0xc1   : > { %3667 = vmatmul.msk.bf16.gmra.mxu2 %vm688_vm7, %v687_v36  ;;  %v1233_v29 = vrot.slane %v4713_v11, 5  ;;  %v844_v31 = vsel %vm4696_vm13, %v3692_v15, %v843_v19  ;;  %v848_v32 = vsel %vm4696_vm13, %v3693_v20, %v847_v14  ;;  %v1050_v34 = vshrl.u32 %v1009_v18, 16  ;;  %v1013_v19 = vld [vmem:[#allocation2 + $0x28] sm:$0xf] }
  0xc2   : > { %v1053_v40 = vshll.u32 %v1009_v18, 16  ;;  %v863_v35 = vunpack.c.l.b16 %v844_v31  ;;  %v864_v36 = vunpack.c.l.b16 %v848_v32  ;;  %v867_v37 = vpack.c.b16 %v860_v16, %v859_v10  ;;  %v1203_v18 = vld [vmem:[#allocation2 + $0x28] sm:$0xe] }
  0xc3   : > { %v3730_v38 = vrot.slane %v1202_v24, 9  ;;  %v1237_v41 = vrot.slane %v4715_v12, 5  ;;  %v1034_v43 = vsel %vm4632_vm10, %v1029_v22, %v1033_v23  ;;  %v1064_v39 = vshrl.u32 %v1011_v30, 16  ;;  %v1015_v23 = vld [vmem:[#allocation2 + $0x30] sm:$0xf] }
  0xc4   : > { %v1067_v45 = vshll.u32 %v1011_v30, 16  ;;  %v4730_v47 = vpack.c.b16 %v864_v36, %v863_v35  ;;  %v3709_v48 = vor.u32 %v4276_v42, %v3708_v46  ;;  %v1136_v51 = vunpack.c.l.b16 %v1048_v26  ;;  %v1204_v30 = vld [vmem:[#allocation2 + $0x30] sm:$0xe] }
  0xc5   : > { %3718 = vmatmul.msk.bf16.vlgmr.msrb.gmra.mxu3 %vm688_vm7, %v3705_v58  ;;  %3665 = vmatmul.msk.bf16.gmra.mxu0 %vm688_vm7, %v685_v56  ;;  %v3690_v52 = vrot.slane %v800_v33, 9  ;;  %v1234_v53 = vsel %vm4696_vm13, %v3729_v25, %v1233_v29  ;;  %v835_v56 = vrot.slane %v4660_v49, 5  ;;  %v1052_v57 = vrot.slane %v1050_v34, 4  ;;  %v1016_v29 = vld [vmem:[#allocation2 + $0x34] sm:$0x1] }
  0xc6   : > { %v1055_v58 = vrot.slane %v1053_v40, 5  ;;  %v1135_v60 = vunpack.c.l.b16 %v1034_v43  ;;  %v1238_v61 = vsel %vm4696_vm13, %v3730_v38, %v1237_v41  ;;  %v3691_v63 = vrot.slane %v801_v44, 9 }
  0xc7   : > { %v839_v0 = vrot.slane %v4662_v55, 5  ;;  %v1066_v27 = vrot.slane %v1064_v39, 4  ;;  %v1069_v28 = vrot.slane %v1067_v45, 5  ;;  %v3694_v1 = vrot.slane %v804_v54, 9  ;;  %v3712_v39 = vld [vmem:[#allocation2 + $0x28] sm:$0xf] }
  0xc8   : > { %v851_v5 = vrot.slane %v4643_v13, 5  ;;  %v1143_v21 = vpack.c.b16 %v1136_v51, %v1135_v60  ;;  %v1259_v2 = vunpack.c.l.b16 %v1234_v53  ;;  %v3695_v3 = vrot.slane %v805_v59, 9  ;;  %v4277_v45 = vld [vmem:[#allocation2 + $0x2c] sm:$0xf0] }
  0xc9   : > { %3736 = vmatmul.msk.bf16.vlgmr.msrb.gmra.mxu1 %vm688_vm7, %v1265_v6  ;;  %v855_v49 = vrot.slane %v4647_v17, 5  ;;  %v1056_v4 = vor.u32 %v1055_v58, %v1052_v57  ;;  %v1059_v6 = vshll.u32 %v4713_v11, 16  ;;  %v1260_v55 = vunpack.c.l.b16 %v1238_v61  ;;  %v1014_v11 = vld [vmem:[#allocation2 + $0x2c] sm:$0x1] }
  0xca   : > { %v852_v7 = vsel %vm4696_vm13, %v3694_v1, %v851_v5  ;;  %v836_v9 = vsel %vm4696_vm13, %v3690_v52, %v835_v56  ;;  %v840_v17 = vsel %vm4696_vm13, %v3691_v63, %v839_v0  ;;  %v1070_v10 = vor.u32 %v1069_v28, %v1066_v27  ;;  %v4767_v28 = vld [vmem:[#allocation2 + $0x3c] sm:$0x1]  ;;  %v4769_v5 = vld [vmem:[#allocation2 + $0x44] sm:$0x1] }
  0xcb   : > { %v856_v8 = vsel %vm4696_vm13, %v3695_v3, %v855_v49  ;;  %v865_v13 = vunpack.c.l.b16 %v852_v7  ;;  %v1266_v16 = vpack.c.b16 %v1260_v55, %v1259_v2  ;;  %v1057_v20 = vrot.slane %v1056_v4, 4  ;;  %v1206_v4 = vld [vmem:[#allocation2 + $0x40] sm:$0xe]  ;;  %v1406_v55 = vld [vmem:[#allocation2 + $0x18] sm:$0xf] }
  0xcc   : > { %v866_v15 = vunpack.c.l.b16 %v856_v8  ;;  %v1061_v14 = vrot.slane %v1059_v6, 5  ;;  %v1073_v22 = vshll.u32 %v4715_v12, 16  ;;  %v861_v25 = vunpack.c.l.b16 %v836_v9  ;;  %v1404_v6 = vld [vmem:[#allocation2 + $0x10] sm:$0xf]  ;;  %v1017_v9 = vld [vmem:[#allocation2 + $0x38] sm:$0xf] }
  0xcd   : > { %v862_v26 = vunpack.c.l.b16 %v840_v17  ;;  %v1071_v31 = vrot.slane %v1070_v10, 4  ;;  %v1078_v32 = vshrl.u32 %v1013_v19, 16  ;;  %v1081_v46 = vshll.u32 %v1013_v19, 16  ;;  %v1019_v17 = vld [vmem:[#allocation2 + $0x40] sm:$0xf] }
  0xce   : > { %v4753_v24 = vpack.c.b16 %v866_v15, %v865_v13  ;;  %v3731_v33 = vrot.slane %v1203_v18, 9  ;;  %v1241_v34 = vrot.slane %v1014_v11, 5  ;;  %v1092_v40 = vshrl.u32 %v1015_v23, 16 }
  0xcf   : > { %v1095_v35 = vshll.u32 %v1015_v23, 16  ;;  %v1062_v36 = vsel %vm4632_vm10, %v1057_v20, %v1061_v14  ;;  %v1075_v12 = vrot.slane %v1073_v22, 5  ;;  %v1245_v38 = vrot.slane %v1016_v29, 5 }
  0xd0   : > { %v868_v41 = vpack.c.b16 %v862_v26, %v861_v25  ;;  %v1080_v43 = vrot.slane %v1078_v32, 4  ;;  %v1083_v44 = vrot.slane %v1081_v46, 5  ;;  %v1242_v51 = vsel %vm4696_vm13, %v3731_v33, %v1241_v34  ;;  %v4278_v33 = vld [vmem:[#allocation2 + $0x3c] sm:$0xf0] }
  0xd1   : > { %3697 = vmatmul.msk.bf16.vlgmr.msrb.gmra.mxu2 %vm688_vm7, %v867_v37  ;;  %v3732_v37 = vrot.slane %v1204_v30, 9  ;;  %v1076_v42 = vsel %vm4632_vm10, %v1071_v31, %v1075_v12  ;;  %v1094_v52 = vrot.slane %v1092_v40, 4  ;;  %v1097_v54 = vrot.slane %v1095_v35, 5 }
  0xd2   : > { %v1138_v56 = vunpack.c.l.b16 %v1076_v42  ;;  %v3713_v57 = vor.u32 %v4277_v45, %v3712_v39  ;;  %v1261_v58 = vunpack.c.l.b16 %v1242_v51  ;;  %v1084_v59 = vor.u32 %v1083_v44, %v1080_v43  ;;  %v4784_v42 = vld [vmem:[#allocation2 + $0x14] sm:$0x1]  ;;  %v4786_v45 = vld [vmem:[#allocation2 + $0x1c] sm:$0x1] }
  0xd3   : > { %v1246_v53 = vsel %vm4696_vm13, %v3732_v37, %v1245_v38  ;;  %v1098_v63 = vor.u32 %v1097_v54, %v1094_v52  ;;  %v1101_v0 = vshll.u32 %v1016_v29, 16  ;;  %v1087_v27 = vshll.u32 %v1014_v11, 16  ;;  %v3716_v29 = vld [vmem:[#allocation2 + $0x38] sm:$0xf] }
  0xd4   : > { %v1262_v61 = vunpack.c.l.b16 %v1246_v53  ;;  %v1085_v1 = vrot.slane %v1084_v59, 4  ;;  %v1249_v13 = vrot.slane %v4767_v28, 5  ;;  %v3734_v15 = vrot.slane %v1206_v4, 9 }
  0xd5   : > { %3719 = vmatmul.msk.bf16.gmra.mxu3 %vm688_vm7, %v3709_v48  ;;  %3723 = vmatmul.msk.bf16.vlgmr.msrb.gmra.mxu0 %vm688_vm7, %v1143_v21  ;;  %v1137_v48 = vunpack.c.l.b16 %v1062_v36  ;;  %v1205_v21 = vld [vmem:[#allocation2 + $0x38] sm:$0xe]  ;;  %v1099_v3 = vrot.slane %v1098_v63, 4  ;;  %v1103_v49 = vrot.slane %v1101_v0, 5  ;;  %v1089_v7 = vrot.slane %v1087_v27, 5 }
  0xd6   : > { %v1267_v2 = vpack.c.b16 %v1262_v61, %v1261_v58  ;;  %v3733_v8 = vrot.slane %v1205_v21, 9  ;;  %v1421_v11 = vshrl.u32 %v1404_v6, 16  ;;  %v1424_v19 = vshll.u32 %v1404_v6, 16  ;;  %v1408_v27 = vld [vmem:[#allocation2 + $0x20] sm:$0xf] }
  0xd7   : > { %v1144_v60 = vpack.c.b16 %v1138_v56, %v1137_v48  ;;  %v1090_v10 = vsel %vm4632_vm10, %v1085_v1, %v1089_v7  ;;  %v1104_v18 = vsel %vm4632_vm10, %v1099_v3, %v1103_v49  ;;  %v1435_v20 = vshrl.u32 %v1406_v55, 16  ;;  %v1410_v49 = vld [vmem:[#allocation2 + $0x28] sm:$0xf] }
  0xd8   : > { %v1438_v14 = vshll.u32 %v1406_v55, 16  ;;  %v1106_v22 = vshrl.u32 %v1017_v9, 16  ;;  %v1109_v23 = vshll.u32 %v1017_v9, 16  ;;  %v1120_v25 = vshrl.u32 %v1019_v17, 16 }
  0xd9   : > { %3737 = vmatmul.msk.bf16.gmra.mxu1 %vm688_vm7, %v1266_v16  ;;  %v1253_v16 = vrot.slane %v4769_v5, 5  ;;  %v1123_v26 = vshll.u32 %v1019_v17, 16  ;;  %v1139_v30 = vunpack.c.l.b16 %v1090_v10  ;;  %v1140_v31 = vunpack.c.l.b16 %v1104_v18 }
  0xda   : > { %v1250_v32 = vsel %vm4696_vm13, %v3733_v8, %v1249_v13  ;;  %v1423_v34 = vrot.slane %v1421_v11, 4  ;;  %v1426_v40 = vrot.slane %v1424_v19, 5  ;;  %v1437_v35 = vrot.slane %v1435_v20, 4  ;;  %v4805_v20 = vld [vmem:[#allocation2 + $0x24] sm:$0x1] }
  0xdb   : > { %v1254_v46 = vsel %vm4696_vm13, %v3734_v15, %v1253_v16  ;;  %v1440_v36 = vrot.slane %v1438_v14, 5  ;;  %v1108_v12 = vrot.slane %v1106_v22, 4  ;;  %v1111_v37 = vrot.slane %v1109_v23, 5  ;;  %v4807_v22 = vld [vmem:[#allocation2 + $0x2c] sm:$0x1] }
  0xdc   : > { %v1122_v38 = vrot.slane %v1120_v25, 4  ;;  %v3717_v43 = vor.u32 %v4278_v33, %v3716_v29  ;;  %v1263_v44 = vunpack.c.l.b16 %v1250_v32  ;;  %v1264_v39 = vunpack.c.l.b16 %v1254_v46  ;;  %v1412_v46 = vld [vmem:[#allocation2 + $0x30] sm:$0xf] }
  0xdd   : > { %v1430_v48 = vshll.u32 %v4784_v42, 16  ;;  %v1145_v51 = vpack.c.b16 %v1140_v31, %v1139_v30  ;;  %v1441_v52 = vor.u32 %v1440_v36, %v1437_v35  ;;  %v1444_v54 = vshll.u32 %v4786_v45, 16  ;;  %v1598_v30 = vld [vmem:[#allocation2 + $0x10] sm:$0xe]  ;;  %v1599_v31 = vld [vmem:[#allocation2 + $0x18] sm:$0xe] }
  0xde   : > { %v1112_v53 = vor.u32 %v1111_v37, %v1108_v12  ;;  %v1115_v56 = vshll.u32 %v4767_v28, 16  ;;  %v1129_v58 = vshll.u32 %v4769_v5, 16  ;;  %v1268_v59 = vpack.c.b16 %v1264_v39, %v1263_v44  ;;  %v4279_v44 = vld [vmem:[#allocation2 + $0x14] sm:$0xf0] }
  0xdf   : > { %v1432_v61 = vrot.slane %v1430_v48, 5  ;;  %v1442_v63 = vrot.slane %v1441_v52, 4  ;;  %v1446_v0 = vrot.slane %v1444_v54, 5  ;;  %v1449_v4 = vshrl.u32 %v1408_v27, 16 }
  0xe0   : > { %v1113_v1 = vrot.slane %v1112_v53, 4  ;;  %v1117_v21 = vrot.slane %v1115_v56, 5  ;;  %v1131_v3 = vrot.slane %v1129_v58, 5  ;;  %v1452_v28 = vshll.u32 %v1408_v27, 16  ;;  %v4826_v27 = vld [vmem:[#allocation2 + $0x3c] sm:$0x1] }
  0xe1   : > { %3698 = vmatmul.msk.bf16.gmra.mxu2 %vm688_vm7, %v868_v41  ;;  %v1125_v41 = vrot.slane %v1123_v26, 5  ;;  %v1447_v6 = vsel %vm4632_vm10, %v1442_v63, %v1446_v0  ;;  %v1463_v7 = vshrl.u32 %v1410_v49, 16  ;;  %v1466_v55 = vshll.u32 %v1410_v49, 16  ;;  %v4824_v0 = vld [vmem:[#allocation2 + $0x34] sm:$0x1] }
  0xe2   : > { %v1118_v8 = vsel %vm4632_vm10, %v1113_v1, %v1117_v21  ;;  %v1535_v17 = vunpack.c.l.b16 %v1447_v6  ;;  %v1451_v10 = vrot.slane %v1449_v4, 4  ;;  %v1454_v15 = vrot.slane %v1452_v28, 5  ;;  %v1600_v4 = vld [vmem:[#allocation2 + $0x20] sm:$0xe] }
  0xe3   : > { %v1141_v16 = vunpack.c.l.b16 %v1118_v8  ;;  %v1465_v18 = vrot.slane %v1463_v7, 4  ;;  %v1468_v19 = vrot.slane %v1466_v55, 5  ;;  %v1458_v26 = vshll.u32 %v4805_v20, 16 }
  0xe4   : > { %v1455_v23 = vor.u32 %v1454_v15, %v1451_v10  ;;  %v3766_v35 = vrot.slane %v1598_v30, 9  ;;  %v1624_v36 = vrot.slane %v4784_v42, 5  ;;  %v3767_v12 = vrot.slane %v1599_v31, 9  ;;  %v1416_v15 = vld [vmem:[#allocation2 + $0x40] sm:$0xf] }
  0xe5   : > { %3720 = vmatmul.msk.bf16.gmra.mxu3 %vm688_vm7, %v3713_v57  ;;  %3724 = vmatmul.msk.bf16.gmra.mxu0 %vm688_vm7, %v1144_v60  ;;  %v1126_v57 = vor.u32 %v1125_v41, %v1122_v38  ;;  %v1469_v29 = vor.u32 %v1468_v19, %v1465_v18  ;;  %v1460_v33 = vrot.slane %v1458_v26, 5  ;;  %v1628_v37 = vrot.slane %v4786_v45, 5  ;;  %v3743_v38 = vld [vmem:[#allocation2 + $0x10] sm:$0xf]  ;;  %v4280_v18 = vld [vmem:[#allocation2 + $0x24] sm:$0xf0] }
  0xe6   : > { %v1456_v32 = vrot.slane %v1455_v23, 4  ;;  %v1480_v48 = vshll.u32 %v1412_v46, 16  ;;  %v1625_v54 = vsel %vm4696_vm13, %v3766_v35, %v1624_v36  ;;  %v3744_v45 = vor.u32 %v4279_v44, %v3743_v38  ;;  %v1419_v38 = vld [vmem:[#allocation2 + $0x4c] sm:$0x1] }
  0xe7   : > { %v1629_v42 = vsel %vm4696_vm13, %v3767_v12, %v1628_v37  ;;  %v1486_v1 = vshll.u32 %v4824_v0, 16  ;;  %v1500_v21 = vshll.u32 %v4826_v27, 16  ;;  %v3768_v55 = vrot.slane %v1600_v4, 9  ;;  %v1417_v37 = vld [vmem:[#allocation2 + $0x44] sm:$0x1] }
  0xe8   : > { %v1461_v39 = vsel %vm4632_vm10, %v1456_v32, %v1460_v33  ;;  %v1482_v58 = vrot.slane %v1480_v48, 5  ;;  %v1657_v63 = vunpack.c.l.b16 %v1629_v42  ;;  %v1632_v8 = vrot.slane %v4805_v20, 5  ;;  %v1602_v48 = vld [vmem:[#allocation2 + $0x30] sm:$0xe] }
  0xe9   : > { %3738 = vmatmul.msk.bf16.gmra.mxu1 %vm688_vm7, %v1267_v2  ;;  %v1127_v2 = vrot.slane %v1126_v57, 4  ;;  %v1536_v53 = vunpack.c.l.b16 %v1461_v39  ;;  %v1488_v6 = vrot.slane %v1486_v1, 5  ;;  %v1502_v7 = vrot.slane %v1500_v21, 5 }
  0xea   : > { %v1636_v10 = vrot.slane %v4807_v22, 5  ;;  %v1633_v23 = vsel %vm4696_vm13, %v3768_v55, %v1632_v8  ;;  %v1508_v26 = vshll.u32 %v1416_v15, 16  ;;  %v1528_v39 = vshll.u32 %v1419_v38, 16  ;;  %v1604_v8 = vld [vmem:[#allocation2 + $0x40] sm:$0xe] }
  0xeb   : > { %v1132_v13 = vsel %vm4632_vm10, %v1127_v2, %v1131_v3  ;;  %v1658_v32 = vunpack.c.l.b16 %v1633_v23 }
  0xec   : > { %v1142_v11 = vunpack.c.l.b16 %v1132_v13 }
  0xee   : > { %v1146_v25 = vpack.c.b16 %v1142_v11, %v1141_v16  ;;  %v1418_v16 = vld [vmem:[#allocation2 + $0x48] sm:$0xf]  ;;  %v3747_v11 = vld [vmem:[#allocation2 + $0x20] sm:$0xf] }
  0xf1   : > { %3699 = vmatmul.msk.bf16.gmra.mxu2 %vm688_vm7, %v4730_v47  ;;  %v1427_v47 = vor.u32 %v1426_v40, %v1423_v34  ;;  %v1470_v34 = vrot.slane %v1469_v29, 4  ;;  %v1414_v40 = vld [vmem:[#allocation2 + $0x38] sm:$0xf]  ;;  %v1519_v29 = vshrl.u32 %v1418_v16, 16 }
  0xf3   : > { %v1428_v60 = vrot.slane %v1427_v47, 4  ;;  %v1494_v47 = vshll.u32 %v1414_v40, 16 }
  0xf5   : > { %3721 = vmatmul.msk.bf16.gmra.mxu3 %vm688_vm7, %v3717_v43  ;;  %3725 = vmatmul.msk.bf16.gmra.mxu0 %vm688_vm7, %v1145_v51  ;;  %v1433_v5 = vsel %vm4632_vm10, %v1428_v60, %v1432_v61  ;;  %v1477_v43 = vshrl.u32 %v1412_v46, 16  ;;  %v1491_v51 = vshrl.u32 %v1414_v40, 16  ;;  %v1496_v60 = vrot.slane %v1494_v47, 5 }
  0xf6   : > { %v1534_v9 = vunpack.c.l.b16 %v1433_v5  ;;  %v1656_v61 = vunpack.c.l.b16 %v1625_v54  ;;  %v1601_v5 = vld [vmem:[#allocation2 + $0x28] sm:$0xe]  ;;  %v1521_v40 = vrot.slane %v1519_v29, 4 }
  0xf7   : > { %v1479_v56 = vrot.slane %v1477_v43, 4  ;;  %v1514_v43 = vshll.u32 %v1417_v37, 16 }
  0xf8   : > { %v1542_v14 = vpack.c.b16 %v1535_v17, %v1534_v9  ;;  %v1664_v28 = vpack.c.b16 %v1657_v63, %v1656_v61  ;;  %v3769_v17 = vrot.slane %v1601_v5, 9 }
  0xf9   : > { %3739 = vmatmul.msk.bf16.gmra.mxu1 %vm688_vm7, %v1268_v59  ;;  %v1493_v59 = vrot.slane %v1491_v51, 4  ;;  %v1483_v3 = vor.u32 %v1482_v58, %v1479_v56  ;;  %v1603_v51 = vld [vmem:[#allocation2 + $0x38] sm:$0xe]  ;;  %v1516_v54 = vrot.slane %v1514_v43, 5  ;;  %v1640_v56 = vrot.slane %v4824_v0, 5 }
  0xfa   : > { %v1637_v20 = vsel %vm4696_vm13, %v3769_v17, %v1636_v10  ;;  %v1644_v58 = vrot.slane %v4826_v27, 5  ;;  %v3772_v17 = vrot.slane %v1604_v8, 9  ;;  %v1648_v10 = vrot.slane %v1417_v37, 5  ;;  %v4299_v8 = vld [vmem:[%s5556_s4 + $0x60] sm:$0xff] }
  0xfb   : > { %v1497_v49 = vor.u32 %v1496_v60, %v1493_v59  ;;  %v1484_v13 = vrot.slane %v1483_v3, 4  ;;  %v1659_v46 = vunpack.c.l.b16 %v1637_v20  ;;  %v3751_v59 = vld [vmem:[#allocation2 + $0x30] sm:$0xf]  ;;  %v4281_v60 = vld [vmem:[#allocation2 + $0x34] sm:$0xf0] }
  0xfc   : > { %v1649_v23 = vsel %vm4696_vm13, %v3772_v17, %v1648_v10  ;;  %v4293_v10 = vld [vmem:[%s5556_s4 + $0x30] sm:$0xff] }
  0xfd   : > { %v1498_v9 = vrot.slane %v1497_v49, 4  ;;  %v1489_v19 = vsel %vm4632_vm10, %v1484_v13, %v1488_v6  ;;  %v1665_v12 = vpack.c.b16 %v1659_v46, %v1658_v32  ;;  %v1605_v13 = vld [vmem:[#allocation2 + $0x48] sm:$0xe]  ;;  %v1662_v29 = vunpack.c.l.b16 %v1649_v23 }
  0xfe   : > { %v1538_v30 = vunpack.c.l.b16 %v1489_v19  ;;  %v3755_v19 = vld [vmem:[#allocation2 + $0x40] sm:$0xf] }
 0x101   : > { %3700 = vmatmul.msk.bf16.gmra.mxu2 %vm688_vm7, %v4753_v24  ;;  %v1472_v24 = vshll.u32 %v4807_v22, 16  ;;  %v1522_v22 = vshll.u32 %v1418_v16, 16  ;;  %v1652_v16 = vrot.slane %v1419_v38, 5 }
 0x103   : > { %v1474_v41 = vrot.slane %v1472_v24, 5  ;;  %v3748_v24 = vor.u32 %v4280_v18, %v3747_v11  ;;  %v1524_v35 = vrot.slane %v1522_v22, 5 }
 0x105   : > { %3762 = vmatmul.msk.bf16.vlgmr.msra.gmra.mxu3 %vm688_vm7, %v1542_v14  ;;  %3726 = vmatmul.msk.bf16.gmra.mxu0 %vm688_vm7, %v1146_v25  ;;  %v1475_v52 = vsel %vm4632_vm10, %v1470_v34, %v1474_v41  ;;  %v1503_v14 = vsel %vm4632_vm10, %v1498_v9, %v1502_v7  ;;  %v1505_v25 = vshrl.u32 %v1416_v15, 16  ;;  %v1510_v34 = vrot.slane %v1508_v26, 5 }
 0x106   : > { %v1537_v57 = vunpack.c.l.b16 %v1475_v52  ;;  %v1539_v31 = vunpack.c.l.b16 %v1503_v14  ;;  %v1525_v44 = vor.u32 %v1524_v35, %v1521_v40  ;;  %v3773_v15 = vrot.slane %v1605_v13, 9  ;;  %v4282_v14 = vld [vmem:[#allocation2 + $0x44] sm:$0xf0] }
 0x107   : > { %v1507_v33 = vrot.slane %v1505_v25, 4  ;;  %v3756_v25 = vor.u32 %v4282_v14, %v3755_v19 }
 0x108   : > { %v1543_v2 = vpack.c.b16 %v1537_v57, %v1536_v53  ;;  %v1544_v36 = vpack.c.b16 %v1539_v31, %v1538_v30  ;;  %v1526_v42 = vrot.slane %v1525_v44, 4  ;;  %v3770_v53 = vrot.slane %v1602_v48, 9 }
 0x109   : > { %v1511_v41 = vor.u32 %v1510_v34, %v1507_v33  ;;  %v3771_v57 = vrot.slane %v1603_v51, 9  ;;  %v1653_v20 = vsel %vm4696_vm13, %v3773_v15, %v1652_v16 }
 0x10a   : > { %v1641_v1 = vsel %vm4696_vm13, %v3770_v53, %v1640_v56  ;;  %v1663_v22 = vunpack.c.l.b16 %v1653_v20 }
 0x10b   : > { %v1512_v52 = vrot.slane %v1511_v41, 4  ;;  %v1645_v21 = vsel %vm4696_vm13, %v3771_v57, %v1644_v58  ;;  %v1660_v27 = vunpack.c.l.b16 %v1641_v1  ;;  %v4300_v57 = vld [vmem:[%s5556_s4 + $0x68] sm:$0xff] }
 0x10c   : > { %v1661_v4 = vunpack.c.l.b16 %v1645_v21  ;;  %v1667_v32 = vpack.c.b16 %v1663_v22, %v1662_v29  ;;  %v4309_v29 = vld [vmem:[%s5556_s4 + $0xb0] sm:$0xff] }
 0x10d   : > { %v1517_v61 = vsel %vm4632_vm10, %v1512_v52, %v1516_v54  ;;  %v4301_v54 = vld [vmem:[%s5556_s4 + $0x70] sm:$0xff] }
 0x10e   : > { %v1540_v3 = vunpack.c.l.b16 %v1517_v61  ;;  %v1666_v55 = vpack.c.b16 %v1661_v4, %v1660_v27 }
 0x111   : > { %3757 = vmatmul.msk.bf16.vlgmr.msra.gmra.mxu2 %vm688_vm7, %v3744_v45  ;;  %v1530_v45 = vrot.slane %v1528_v39, 5  ;;  %v4302_v39 = vld [vmem:[%s5556_s4 + $0x78] sm:$0xff] }
 0x112   : > { %2138 = vmatpush.bf16.msra.mxu1 %v4302_v39  ;;  %v4970_v39 = vld [vmem:[%s5554_s2] ss:$0 sm:$0xff] }
 0x113   : > { %v1531_v63 = vsel %vm4632_vm10, %v1526_v42, %v1530_v45 }
 0x114   : > { %v1541_v0 = vunpack.c.l.b16 %v1531_v63 }
 0x115   : > { %3763 = vmatmul.msk.bf16.gmra.mxu3 %vm688_vm7, %v1543_v2  ;;  %3775 = vmatmul.msk.bf16.vlgmr.msra.gmra.mxu0 %vm688_vm7, %v1664_v28  ;;  %v3752_v2 = vor.u32 %v4281_v60, %v3751_v59 }
 0x116   : > { %v1545_v6 = vpack.c.b16 %v1541_v0, %v1540_v3  ;;  %2139 = vmatpush.bf16.msra.mxu1 %v4301_v54 }
 0x11a   : > { %2140 = vmatpush.bf16.msra.mxu1 %v4300_v57  ;;  %v4977_v57 = vld [vmem:[%s5555_s3] ss:$0 sm:$0xff] }
 0x11e   : > { %2141 = vmatpush.bf16.msra.mxu1 %v4299_v8 }
 0x121   : > { %3758 = vmatmul.msk.bf16.gmra.mxu2 %vm688_vm7, %v3748_v24 }
 0x125   : > { %3764 = vmatmul.msk.bf16.gmra.mxu3 %vm688_vm7, %v1544_v36  ;;  %3776 = vmatmul.msk.bf16.gmra.mxu0 %vm688_vm7, %v1665_v12 }
 0x126   : > { %v778_v35 = vpop.f32.mrf.mxu1 }
 0x128   : > { %v788_v47 = vpop.f32.mrf.mxu3 }
 0x12e   : > { %v780_v43 = vpop.f32.mrf.mxu1 }
 0x130   : > { %v4855_v49 = vpop.f32.mrf.mxu3 }
 0x131   : > { %3759 = vmatmul.msk.bf16.gmra.mxu2 %vm688_vm7, %v3752_v2 }
 0x132   : > { %v4858_v28 = vpop.f32.mrf.mxu0 }
 0x133   : > { %v779_v0 = vadd.f32 %v778_v35, %v4858_v28  ;;  %v4310_v28 = vld [vmem:[%s5556_s4 + $0xb8] sm:$0xff]  ;;  %v4291_v35 = vld [vmem:[%s5556_s4 + $0x20] sm:$0xff] }
 0x134   : > { %v724_v5 = vpop.f32.mrf.mxu2  ;;  %2405 = vmatpush.bf16.msrb.mxu3 %v4310_v28 }
 0x135   : > { %v4860_v7 = vadd.f32 %v788_v47, %v724_v5  ;;  %3765 = vmatmul.msk.bf16.gmra.mxu3 %vm688_vm7, %v1545_v6  ;;  %3777 = vmatmul.msk.bf16.gmra.mxu0 %vm688_vm7, %v1666_v55  ;;  %v4294_v55 = vld [vmem:[%s5556_s4 + $0x38] sm:$0xff] }
 0x136   : > { %v783_v47 = vpop.f32.mrf.mxu1  ;;  %2239 = vmatpush.bf16.msrb.mxu2 %v4294_v55 }
 0x138   : > { %v793_v9 = vpop.f32.mrf.mxu3  ;;  %2406 = vmatpush.bf16.msrb.mxu3 %v4309_v29 }
 0x13a   : > { %v716_v11 = vpop.f32.mrf.mxu0  ;;  %2240 = vmatpush.bf16.msrb.mxu2 %v4293_v10  ;;  %v4289_v10 = vld [vmem:[%s5556_s4 + $0x10] sm:$0xff] }
 0x13b   : > { %v781_v17 = vadd.f32 %v780_v43, %v716_v11  ;;  %v4322_v11 = vld [vmem:[%s5556_s4 + $0xf8] sm:$0xff] }
 0x13c   : > { %v4864_v18 = vpop.f32.mrf.mxu2  ;;  %2539 = vmatpush.bf16.msrb.mxu0 %v4322_v11 }
 0x13e   : > { %v4902_v53 = vpop.f32.mrf.mxu1 }
 0x140   : > { %v4870_v26 = vpop.f32.mrf.mxu3 }
 0x141   : > { %3760 = vmatmul.msk.bf16.gmra.mxu2 %vm688_vm7, %v3756_v25  ;;  %v4292_v25 = vld [vmem:[%s5556_s4 + $0x28] sm:$0xff] }
 0x142   : > { %v4873_v24 = vpop.f32.mrf.mxu0  ;;  %2241 = vmatpush.bf16.msrb.mxu2 %v4292_v25 }
 0x144   : > { %v729_v30 = vpop.f32.mrf.mxu2 }
 0x145   : > { %v4875_v31 = vadd.f32 %v793_v9, %v729_v30  ;;  %3778 = vmatmul.msk.bf16.gmra.mxu0 %vm688_vm7, %v1667_v32  ;;  %v4298_v32 = vld [vmem:[%s5556_s4 + $0x58] sm:$0xff] }
 0x146   : > { %v1293_v61 = vpop.f32.mrf.mxu1  ;;  %2142 = vmatpush.bf16.msra.mxu1 %v4298_v32  ;;  %2242 = vmatpush.bf16.msrb.mxu2 %v4291_v35 }
 0x148   : > { %v977_v46 = vpop.f32.mrf.mxu3 }
 0x14a   : > { %v4878_v33 = vpop.f32.mrf.mxu0 }
 0x14b   : > { %v786_v55 = vadd.f32 %v4902_v53, %v4878_v33  ;;  %v4306_v53 = vld [vmem:[%s5556_s4 + $0x98] sm:$0xff] }
 0x14c   : > { %v4880_v34 = vpop.f32.mrf.mxu2 }
 0x14e   : > { %v1295_v27 = vpop.f32.mrf.mxu1 }
 0x150   : > { %v979_v40 = vpop.f32.mrf.mxu3 }
 0x152   : > { %v1171_v12 = vpop.f32.mrf.mxu0 }
 0x154   : > { %v895_v36 = vpop.f32.mrf.mxu2 }
 0x155   : > { %v915_v4 = vadd.f32 %v895_v36, %v779_v0  ;;  %v4321_v36 = vld [vmem:[%s5556_s4 + $0xf0] sm:$0xff] }
 0x156   : > { %v4942_v16 = vpop.f32.mrf.mxu1  ;;  %2540 = vmatpush.bf16.msrb.mxu0 %v4321_v36  ;;  %v4296_v36 = vld [vmem:[%s5556_s4 + $0x48] sm:$0xff] }
 0x157   : > { %v997_v6 = vadd.f32 %v977_v46, %v915_v4  ;;  %v784_v46 = vadd.f32 %v783_v47, %v4873_v24  ;;  %v4290_v4 = vld [vmem:[%s5556_s4 + $0x18] sm:$0xff] }
 0x158   : > { %v4882_v37 = vpop.f32.mrf.mxu3  ;;  %2243 = vmatpush.bf16.msrb.mxu2 %v4290_v4 }
 0x159   : > { %v1191_v15 = vadd.f32 %v1171_v12, %v997_v6  ;;  %v4308_v12 = vld [vmem:[%s5556_s4 + $0xa8] sm:$0xff]  ;;  %v4307_v6 = vld [vmem:[%s5556_s4 + $0xa0] sm:$0xff] }
 0x15a   : > { %v4884_v41 = vpop.f32.mrf.mxu0  ;;  %2407 = vmatpush.bf16.msrb.mxu3 %v4308_v12 }
 0x15b   : > { %v1313_v20 = vadd.f32 %v1293_v61, %v1191_v15  ;;  %v4319_v15 = vld [vmem:[%s5556_s4 + $0xe0] sm:$0xff] }
 0x15c   : > { %v897_v38 = vpop.f32.mrf.mxu2  ;;  %2244 = vmatpush.bf16.msrb.mxu2 %v4289_v10 }
 0x15d   : > { %v916_v19 = vadd.f32 %v897_v38, %v781_v17 }
 0x15e   : > { %v4972_v47 = vpop.f32.mrf.mxu1  ;;  %2408 = vmatpush.bf16.msrb.mxu3 %v4307_v6  ;;  %v4317_v6 = vld [vmem:[%s5556_s4 + $0xd0] sm:$0xff] }
 0x15f   : > { %v998_v23 = vadd.f32 %v979_v40, %v916_v19 }
 0x160   : > { %v4886_v44 = vpop.f32.mrf.mxu3 }
 0x161   : > { %v1192_v38 = vadd.f32 %v4884_v41, %v998_v23 }
 0x162   : > { %v4891_v51 = vpop.f32.mrf.mxu0  ;;  %2409 = vmatpush.bf16.msrb.mxu3 %v4306_v53  ;;  %v796_v53 = vadd.f32 %v4870_v26, %v4880_v34 }
 0x163   : > { %v1314_v0 = vadd.f32 %v1295_v27, %v1192_v38  ;;  %v4297_v27 = vld [vmem:[%s5556_s4 + $0x50] sm:$0xff]  ;;  %v4343_v38 = vld [vmem:[%s5556_s4 + $0x180] sm:$0xff] }
 0x164   : > { %v900_v48 = vpop.f32.mrf.mxu2  ;;  %2143 = vmatpush.bf16.msra.mxu1 %v4297_v27 }
 0x165   : > { %v917_v24 = vadd.f32 %v900_v48, %v784_v46  ;;  %v1863_v46 = vld [vmem:[#allocation3 + $0x8] sm:$0xf] }
 0x167   : > { %v999_v41 = vadd.f32 %v4882_v37, %v917_v24  ;;  %v1868_v24 = vld [vmem:[#allocation3 + $0xc] sm:$0x1] }
 0x168   : > { %v4893_v52 = vpop.f32.mrf.mxu3  ;;  %2144 = vmatpush.bf16.msra.mxu1 %v4296_v36 }
 0x169   : > { %v1193_v19 = vadd.f32 %v4891_v51, %v999_v41  ;;  %v4288_v51 = vld [vmem:[%s5556_s4 + $0x8] sm:$0xff]  ;;  %v4287_v41 = vld [vmem:[%s5556_s4] sm:$0xff] }
 0x16a   : > { %v4900_v45 = vpop.f32.mrf.mxu0  ;;  %2245 = vmatpush.bf16.msrb.mxu2 %v4288_v51  ;;  %v1874_v51 = vld [vmem:[#allocation3 + $0x14] sm:$0x1] }
 0x16b   : > { %v1315_v32 = vadd.f32 %v4942_v16, %v1193_v19 }
 0x16c   : > { %v4898_v42 = vpop.f32.mrf.mxu2 }
 0x16d   : > { %v918_v33 = vadd.f32 %v4898_v42, %v786_v55 }
 0x16e   : > { %2246 = vmatpush.bf16.msrb.mxu2 %v4287_v41 }
 0x16f   : > { %v1000_v29 = vadd.f32 %v4886_v44, %v918_v33  ;;  %v4305_v44 = vld [vmem:[%s5556_s4 + $0x90] sm:$0xff] }
 0x170   : > { %v4904_v56 = vpop.f32.mrf.mxu3  ;;  %2410 = vmatpush.bf16.msrb.mxu3 %v4305_v44 }
 0x172   : > { %v4911_v59 = vpop.f32.mrf.mxu0 }
 0x174   : > { %v4909_v58 = vpop.f32.mrf.mxu2 }
 0x178   : > { %v4913_v60 = vpop.f32.mrf.mxu3 }
 0x17a   : > { %v4917_v1 = vpop.f32.mrf.mxu0 }
 0x17c   : > { %v4915_v63 = vpop.f32.mrf.mxu2 }
 0x180   : > { %v4919_v21 = vpop.f32.mrf.mxu3 }
 0x182   : > { %v4923_v3 = vpop.f32.mrf.mxu0 }
 0x184   : > { %v4921_v2 = vpop.f32.mrf.mxu2 }
 0x185   : > { %v921_v19 = vadd.f32 %v4921_v2, %v4875_v31  ;;  %v5073_v2 = vld [vmem:[#allocation3 + $0x4] sm:$0x1] }
 0x186   : > { %v2294_v44 = vrot.slane %v5073_v2, 5 }
 0x188   : > { %v1570_v5 = vpop.f32.mrf.mxu3 }
 0x18a   : > { %v4934_v9 = vpop.f32.mrf.mxu0 }
 0x18c   : > { %v4932_v13 = vpop.f32.mrf.mxu2 }
 0x190   : > { %v1572_v14 = vpop.f32.mrf.mxu3 }
 0x192   : > { %v1692_v30 = vpop.f32.mrf.mxu0 }
 0x194   : > { %v1376_v22 = vpop.f32.mrf.mxu2 }
 0x195   : > { %v1396_v40 = vadd.f32 %v1376_v22, %v1313_v20  ;;  %v5008_v22 = vpop.f32.mrf.mxu1 }
 0x197   : > { %v1590_v43 = vadd.f32 %v1570_v5, %v1396_v40  ;;  %v4320_v5 = vld [vmem:[%s5556_s4 + $0xe8] sm:$0xff] }
 0x198   : > { %v1575_v61 = vpop.f32.mrf.mxu3  ;;  %2541 = vmatpush.bf16.msrb.mxu0 %v4320_v5 }
 0x199   : > { %v1712_v54 = vadd.f32 %v1692_v30, %v1590_v43 }
 0x19a   : > { %v1694_v8 = vpop.f32.mrf.mxu0 }
 0x19b   : > { %v1724_v48 = vmul.f32 %v4970_v39, %v1712_v54 }
 0x19c   : > { %v1378_v37 = vpop.f32.mrf.mxu2  ;;  %2542 = vmatpush.bf16.msrb.mxu0 %v4319_v15 }
 0x19d   : > { %v1736_v28 = vadd.f32 %v4977_v57, %v1724_v48  ;;  %v1397_v17 = vadd.f32 %v1378_v37, %v1314_v0  ;;  %v1194_v48 = vadd.f32 %v4900_v45, %v1000_v29  ;;  %v919_v0 = vadd.f32 %v4909_v58, %v4860_v7  ;;  %v4304_v45 = vld [vmem:[%s5556_s4 + $0x88] sm:$0xff]  ;;  %v2268_v29 = vld [vmem:[#allocation3] sm:$0xe] }
 0x19e   : > { %2411 = vmatpush.bf16.msrb.mxu3 %v4304_v45 }
 0x19f   : > { %v1744_v23 = vmax.f32 %v1736_v28, 0.0  ;;  %v1591_v20 = vadd.f32 %v1572_v14, %v1397_v17  ;;  %v4318_v14 = vld [vmem:[%s5556_s4 + $0xd8] sm:$0xff]  ;;  %v1001_v15 = vadd.f32 %v4893_v52, %v919_v0 }
 0x1a0   : > { %2543 = vmatpush.bf16.msrb.mxu0 %v4318_v14  ;;  %v1577_v5 = vpop.f32.mrf.mxu3  ;;  %v3875_v14 = vrot.slane %v2268_v29, 9 }
 0x1a1   : > { %v1772_v25 = vpack.c.bf16 %v1744_v23, %v1744_v23  ;;  %v1713_v11 = vadd.f32 %v1694_v8, %v1591_v20  ;;  %v791_v8 = vadd.f32 %v4855_v49, %v4864_v18  ;;  %v1316_v18 = vadd.f32 %v4972_v47, %v1194_v48  ;;  %v1871_v23 = vld [vmem:[#allocation3 + $0x10] sm:$0xf] }
 0x1a2   : > { %v1697_v35 = vpop.f32.mrf.mxu0  ;;  %v4295_v47 = vld [vmem:[%s5556_s4 + $0x40] sm:$0xff] }
 0x1a3   : > { %v1781_v42 = vshrl.u32 %v1772_v25, 16  ;;  %v1725_v30 = vmul.f32 %v4970_v39, %v1713_v11  ;;  %v1784_v12 = vshll.u32 %v1772_v25, 16  ;;  %v920_v33 = vadd.f32 %v4915_v63, %v791_v8  ;;  %v4316_v63 = vld [vmem:[%s5556_s4 + $0xc8] sm:$0xff]  ;;  %v4303_v25 = vld [vmem:[%s5556_s4 + $0x80] sm:$0xff]  ;;  %2145 = vmatpush.bf16.msra.mxu1 %v4295_v47 }
 0x1a4   : > { %v1381_v40 = vpop.f32.mrf.mxu2  ;;  %2544 = vmatpush.bf16.msrb.mxu0 %v4317_v6  ;;  %2412 = vmatpush.bf16.msrb.mxu3 %v4303_v25 }
 0x1a5   : > { %v1783_v16 = vrot.slane %v1781_v42, 7  ;;  %v1737_v43 = vadd.f32 %v4977_v57, %v1725_v30  ;;  %v1398_v54 = vadd.f32 %v1381_v40, %v1315_v32  ;;  %v5075_v42 = vpop.f32.mrf.mxu1  ;;  %v1195_v30 = vadd.f32 %v4911_v59, %v1001_v15 }
 0x1a6   : > { %v1002_v32 = vadd.f32 %v4904_v56, %v920_v33  ;;  %v1003_v59 = vadd.f32 %v4913_v60, %v921_v19  ;;  %v922_v56 = vadd.f32 %v4932_v13, %v796_v53 }
 0x1a7   : > { %v1786_v55 = vor.u32 %v1784_v12, %v1783_v16  ;;  %v1787_v37 = vrot.slane %v1783_v16, 4  ;;  %v1745_v7 = vmax.f32 %v1737_v43, 0.0  ;;  %v1592_v58 = vadd.f32 %v1575_v61, %v1398_v54  ;;  %v3829_v12 = vld [vmem:[#allocation3] sm:$0xf] }
 0x1a8   : > { %2545 = vmatpush.bf16.msrb.mxu0 %v4316_v63  ;;  %v2295_v43 = vsel %vm4696_vm13, %v3875_v14, %v2294_v44  ;;  %v1196_v45 = vadd.f32 %v4917_v1, %v1002_v32  ;;  %v5101_v1 = vadd.f32 %v4923_v3, %v1003_v59 }
 0x1a9   : > { %v1864_v27 = vsel %vm5026_vm0, %v1786_v55, %v1863_v46  ;;  %v1869_v28 = vsel %vm5039_vm1, %v1787_v37, %v1868_v24  ;;  %v1773_v17 = vpack.c.bf16 %v1745_v7, %v1745_v7  ;;  %v1714_v10 = vadd.f32 %v1697_v35, %v1592_v58  ;;  %v4315_v46 = vld [vmem:[%s5556_s4 + $0xc0] sm:$0xff]  ;;  %v1580_v24 = vpop.f32.mrf.mxu3 }
 0x1aa   : > { %1865 = vst [vmem:[#allocation3 + $0x8] sm:$0xf] %v1864_v27  ;;  %v1699_v52 = vpop.f32.mrf.mxu0  ;;  %v1317_v58 = vadd.f32 %v5008_v22, %v1195_v30  ;;  %v4330_v27 = vld [vmem:[%s5556_s4 + $0x138] sm:$0xff]  ;;  %v2341_v33 = vunpack.c.l.b16 %v2295_v43 }
 0x1ab   : > { %1870 = vst [vmem:[#allocation3 + $0xc] sm:$0x1] %v1869_v28  ;;  %v1789_v61 = vshrl.u32 %v1773_v17, 16  ;;  %v1726_v49 = vmul.f32 %v4970_v39, %v1714_v10  ;;  %v1792_v26 = vshll.u32 %v1773_v17, 16  ;;  %v1004_v28 = vadd.f32 %v4919_v21, %v922_v56  ;;  %2785 = vmatpush.bf16.msrb.mxu1 %v4330_v27  ;;  %v1886_v27 = vld [vmem:[#allocation3 + $0x24] sm:$0x1] }
 0x1ac   : > { %v1383_v20 = vpop.f32.mrf.mxu2  ;;  %2546 = vmatpush.bf16.msrb.mxu0 %v4315_v46  ;;  %v1955_v21 = vshll.u32 %v5073_v2, 16 }
 0x1ad   : > { %v1791_v11 = vrot.slane %v1789_v61, 7  ;;  %v1738_v34 = vadd.f32 %v4977_v57, %v1726_v49  ;;  %v1399_v31 = vadd.f32 %v1383_v20, %v1316_v18  ;;  %v1913_v61 = vld [vmem:[#allocation3] sm:$0xf]  ;;  %v1877_v18 = vld [vmem:[#allocation3 + $0x18] sm:$0xf]  ;;  %v1198_v56 = vadd.f32 %v4934_v9, %v1004_v28 }
 0x1ae   : > { %v1946_v20 = vshrl.u32 %v1913_v61, 16  ;;  %v1957_v32 = vrot.slane %v1955_v21, 5 }
 0x1af   : > { %v1794_v40 = vor.u32 %v1792_v26, %v1791_v11  ;;  %v1795_v35 = vrot.slane %v1791_v11, 4  ;;  %v1746_v36 = vmax.f32 %v1738_v34, 0.0  ;;  %v1593_v16 = vadd.f32 %v1577_v5, %v1399_v31  ;;  %v5108_v34 = vpop.f32.mrf.mxu1 }
 0x1b0   : > { %v1948_v29 = vrot.slane %v1946_v20, 4 }
 0x1b1   : > { %v1872_v54 = vsel %vm5026_vm0, %v1794_v40, %v1871_v23  ;;  %v1875_v41 = vsel %vm5039_vm1, %v1795_v35, %v1874_v51  ;;  %v1774_v48 = vpack.c.bf16 %v1746_v36, %v1746_v36  ;;  %v1715_v0 = vadd.f32 %v1699_v52, %v1593_v16  ;;  %v4283_v6 = vld [vmem:[#allocation3 + $0x4] sm:$0xf0]  ;;  %v1880_v23 = vld [vmem:[#allocation3 + $0x1c] sm:$0x1]  ;;  %v1582_v35 = vpop.f32.mrf.mxu3 }
 0x1b2   : > { %v2269_v5 = vld [vmem:[#allocation3 + $0x8] sm:$0xe]  ;;  %1873 = vst [vmem:[#allocation3 + $0x10] sm:$0xf] %v1872_v54  ;;  %v3830_v60 = vor.u32 %v4283_v6, %v3829_v12  ;;  %v5092_v55 = vld [vmem:[#allocation3 + $0xc] sm:$0x1]  ;;  %v1702_v15 = vpop.f32.mrf.mxu0  ;;  %v1318_v54 = vadd.f32 %v5075_v42, %v1196_v45 }
 0x1b3   : > { %v3876_v13 = vrot.slane %v2269_v5, 9  ;;  %1876 = vst [vmem:[#allocation3 + $0x14] sm:$0x1] %v1875_v41  ;;  %v1797_v37 = vshrl.u32 %v1774_v48, 16  ;;  %v1727_v7 = vmul.f32 %v4970_v39, %v1715_v0  ;;  %v2298_v8 = vrot.slane %v5092_v55, 5  ;;  %v4329_v41 = vld [vmem:[%s5556_s4 + $0x130] sm:$0xff] }
 0x1b4   : > { %v1800_v17 = vshll.u32 %v1774_v48, 16  ;;  %v1386_v10 = vpop.f32.mrf.mxu2  ;;  %2247 = vmatmul.bf16.vlgmr.msrb.gmra.mxu2 %v3830_v60  ;;  %v1949_v52 = vshll.u32 %v1913_v61, 16  ;;  %v1914_v26 = vld [vmem:[#allocation3 + $0x8] sm:$0xf]  ;;  %2786 = vmatpush.bf16.msrb.mxu1 %v4329_v41  ;;  %v1883_v45 = vld [vmem:[#allocation3 + $0x20] sm:$0xf] }
 0x1b5   : > { %v1799_v49 = vrot.slane %v1797_v37, 7  ;;  %v1739_v22 = vadd.f32 %v4977_v57, %v1727_v7  ;;  %v1400_v53 = vadd.f32 %v1386_v10, %v1317_v58  ;;  %v2299_v19 = vsel %vm4696_vm13, %v3876_v13, %v2298_v8  ;;  %v3949_v2 = vld [vmem:[#allocation3 + $0x8] sm:$0xf] }
 0x1b6   : > { %v2342_v3 = vunpack.c.l.b16 %v2299_v19  ;;  %v1951_v30 = vrot.slane %v1949_v52, 5  ;;  %v1960_v12 = vshrl.u32 %v1914_v26, 16  ;;  %v1963_v59 = vshll.u32 %v1914_v26, 16  ;;  %v4338_v41 = vld [vmem:[%s5556_s4 + $0x178] sm:$0xff] }
 0x1b7   : > { %v1802_v63 = vor.u32 %v1800_v17, %v1799_v49  ;;  %v1803_v25 = vrot.slane %v1799_v49, 4  ;;  %v1747_v47 = vmax.f32 %v1739_v22, 0.0  ;;  %v1594_v11 = vadd.f32 %v1580_v24, %v1400_v53  ;;  %2959 = vmatpush.bf16.msra.mxu2 %v4338_v41  ;;  %v4335_v41 = vld [vmem:[%s5556_s4 + $0x160] sm:$0xff] }
 0x1b8   : > { %v2349_v31 = vpack.c.b16 %v2342_v3, %v2341_v33  ;;  %v1952_v16 = vor.u32 %v1951_v30, %v1948_v29  ;;  %v1962_v5 = vrot.slane %v1960_v12, 4  ;;  %v1965_v60 = vrot.slane %v1963_v59, 5 }
 0x1b9   : > { %v1878_v51 = vsel %vm5026_vm0, %v1802_v63, %v1877_v18  ;;  %v1881_v14 = vsel %vm5039_vm1, %v1803_v25, %v1880_v23  ;;  %v1775_v44 = vpack.c.bf16 %v1747_v47, %v1747_v47  ;;  %v1716_v46 = vadd.f32 %v1702_v15, %v1594_v11  ;;  %v4311_v40 = vld [vmem:[#allocation3 + $0xc] sm:$0xf0]  ;;  %v1310_v47 = vpop.f32.mrf.mxu1 }
 0x1ba   : > { %1879 = vst [vmem:[#allocation3 + $0x18] sm:$0xf] %v1878_v51  ;;  %2413 = vmatmul.bf16.vlgmr.msrb.gmra.mxu3 %v2349_v31  ;;  %v3950_v36 = vor.u32 %v4311_v40, %v3949_v2  ;;  %v1704_v0 = vpop.f32.mrf.mxu0  ;;  %v1953_v6 = vrot.slane %v1952_v16, 4  ;;  %v1969_v13 = vshll.u32 %v5092_v55, 16  ;;  %v1939_v8 = vld [vmem:[#allocation3 + $0x14] sm:$0x1]  ;;  %v1966_v17 = vor.u32 %v1965_v60, %v1962_v5  ;;  %v1585_v40 = vpop.f32.mrf.mxu3 }
 0x1bb   : > { %1882 = vst [vmem:[#allocation3 + $0x1c] sm:$0x1] %v1881_v14  ;;  %v1805_v24 = vshrl.u32 %v1775_v44, 16  ;;  %v1728_v43 = vmul.f32 %v4970_v39, %v1716_v46  ;;  %v1808_v9 = vshll.u32 %v1775_v44, 16  ;;  %v2270_v42 = vld [vmem:[#allocation3 + $0x10] sm:$0xe]  ;;  %v1319_v26 = vadd.f32 %v5108_v34, %v5101_v1 }
 0x1bc   : > { %v1388_v48 = vpop.f32.mrf.mxu2  ;;  %2547 = vmatmul.bf16.vlgmr.msrb.gmra.mxu0 %v3950_v36  ;;  %v1958_v28 = vsel %vm4632_vm10, %v1953_v6, %v1957_v32  ;;  %v3877_v10 = vrot.slane %v2270_v42, 9  ;;  %v2302_v15 = vrot.slane %v1939_v8, 5  ;;  %v1967_v18 = vrot.slane %v1966_v17, 4  ;;  %v3833_v21 = vld [vmem:[#allocation3 + $0x10] sm:$0xf]  ;;  %v4337_v42 = vld [vmem:[%s5556_s4 + $0x170] sm:$0xff] }
 0x1bd   : > { %v1807_v37 = vrot.slane %v1805_v24, 7  ;;  %v1740_v7 = vadd.f32 %v4977_v57, %v1728_v43  ;;  %v1401_v58 = vadd.f32 %v1388_v48, %v1318_v54  ;;  %v1971_v22 = vrot.slane %v1969_v13, 5  ;;  %v1889_v2 = vld [vmem:[#allocation3 + $0x28] sm:$0xf]  ;;  %v1915_v34 = vld [vmem:[#allocation3 + $0x10] sm:$0xf]  ;;  %2960 = vmatpush.bf16.msra.mxu2 %v4337_v42 }
 0x1be   : > { %v2074_v53 = vunpack.c.l.b16 %v1958_v28  ;;  %v5126_v19 = vsel %vm4696_vm13, %v3877_v10, %v2302_v15  ;;  %v5139_v44 = vadd.f32 %v1310_v47, %v1198_v56  ;;  %v1983_v16 = vshll.u32 %v1939_v8, 16  ;;  %v4328_v56 = vld [vmem:[%s5556_s4 + $0x128] sm:$0xff]  ;;  %v1892_v48 = vld [vmem:[#allocation3 + $0x2c] sm:$0x1] }
 0x1bf   : > { %v1810_v33 = vor.u32 %v1808_v9, %v1807_v37  ;;  %v1811_v61 = vrot.slane %v1807_v37, 4  ;;  %v1748_v49 = vmax.f32 %v1740_v7, 0.0  ;;  %v1595_v55 = vadd.f32 %v1582_v35, %v1401_v58  ;;  %v4350_v37 = vld [vmem:[%s5556_s4 + $0x1b8] sm:$0xff]  ;;  %2787 = vmatpush.bf16.msrb.mxu1 %v4328_v56 }
 0x1c0   : > { %v1972_v11 = vsel %vm4632_vm10, %v1967_v18, %v1971_v22  ;;  %v2343_v1 = vunpack.c.l.b16 %v5126_v19  ;;  %v1974_v5 = vshrl.u32 %v1915_v34, 16  ;;  %v1977_v60 = vshll.u32 %v1915_v34, 16  ;;  %3094 = vmatpush.bf16.msra.mxu3 %v4350_v37  ;;  %v4349_v19 = vld [vmem:[%s5556_s4 + $0x1b0] sm:$0xff]  ;;  %v1895_v34 = vld [vmem:[#allocation3 + $0x30] sm:$0xf] }
 0x1c1   : > { %v1884_v23 = vsel %vm5026_vm0, %v1810_v33, %v1883_v45  ;;  %v1887_v3 = vsel %vm5039_vm1, %v1811_v61, %v1886_v27  ;;  %v1776_v20 = vpack.c.bf16 %v1748_v49, %v1748_v49  ;;  %v1717_v52 = vadd.f32 %v1704_v0, %v1595_v55  ;;  %v4284_v63 = vld [vmem:[#allocation3 + $0x14] sm:$0xf0]  ;;  %v4358_v45 = vld [vmem:[%s5556_s4 + $0x1f8] sm:$0xff]  ;;  %v4327_v33 = vld [vmem:[%s5556_s4 + $0x120] sm:$0xff] }
 0x1c2   : > { %v2271_v25 = vld [vmem:[#allocation3 + $0x18] sm:$0xe]  ;;  %1885 = vst [vmem:[#allocation3 + $0x20] sm:$0xf] %v1884_v23  ;;  %v3834_v31 = vor.u32 %v4284_v63, %v3833_v21  ;;  %v5136_v29 = vld [vmem:[#allocation3 + $0x1c] sm:$0x1]  ;;  %v2075_v14 = vunpack.c.l.b16 %v1972_v11  ;;  %v1707_v0 = vpop.f32.mrf.mxu0  ;;  %3340 = vmatpush.bf16.msra.mxu0 %v4358_v45 }
 0x1c3   : > { %v3878_v30 = vrot.slane %v2271_v25, 9  ;;  %1888 = vst [vmem:[#allocation3 + $0x24] sm:$0x1] %v1887_v3  ;;  %v1813_v32 = vshrl.u32 %v1776_v20, 16  ;;  %v1729_v51 = vmul.f32 %v4970_v39, %v1717_v52  ;;  %v1816_v46 = vshll.u32 %v1776_v20, 16  ;;  %2788 = vmatpush.bf16.msrb.mxu1 %v4327_v33 }
 0x1c4   : > { %v1391_v35 = vpop.f32.mrf.mxu2  ;;  %2252 = vmatmul.bf16.gmra.mxu2 %v3834_v31  ;;  %v2306_v36 = vrot.slane %v5136_v29, 5  ;;  %v2082_v24 = vpack.c.b16 %v2075_v14, %v2074_v53  ;;  %v1916_v54 = vld [vmem:[#allocation3 + $0x18] sm:$0xf]  ;;  %v5152_v13 = vrot.slane %v1983_v16, 5  ;;  %v1976_v17 = vrot.slane %v1974_v5, 4  ;;  %3095 = vmatpush.bf16.msra.mxu3 %v4349_v19  ;;  %v4355_v19 = vld [vmem:[%s5556_s4 + $0x1e0] sm:$0xff] }
 0x1c5   : > { %v1815_v12 = vrot.slane %v1813_v32, 7  ;;  %v1741_v59 = vadd.f32 %v4977_v57, %v1729_v51  ;;  %v1402_v43 = vadd.f32 %v1391_v35, %v1319_v26  ;;  %v3953_v28 = vld [vmem:[#allocation3 + $0x18] sm:$0xf]  ;;  %v1979_v10 = vrot.slane %v1977_v60, 5  ;;  %v1898_v16 = vld [vmem:[#allocation3 + $0x34] sm:$0x1] }
 0x1c6   : > { %v2307_v6 = vsel %vm4696_vm13, %v3878_v30, %v2306_v36  ;;  %2146 = vmatmul.bf16.vlgmr.msra.gmra.mxu1 %v2082_v24  ;;  %v1988_v15 = vshrl.u32 %v1916_v54, 16  ;;  %v1991_v11 = vshll.u32 %v1916_v54, 16  ;;  %v4336_v26 = vld [vmem:[%s5556_s4 + $0x168] sm:$0xff]  ;;  %v1997_v32 = vshll.u32 %v5136_v29, 16  ;;  %v4357_v29 = vld [vmem:[%s5556_s4 + $0x1f0] sm:$0xff] }
 0x1c7   : > { %v1818_v9 = vor.u32 %v1816_v46, %v1815_v12  ;;  %v1819_v7 = vrot.slane %v1815_v12, 4  ;;  %v1749_v58 = vmax.f32 %v1741_v59, 0.0  ;;  %v1596_v8 = vadd.f32 %v1585_v40, %v1402_v43  ;;  %v1587_v12 = vpop.f32.mrf.mxu3  ;;  %2961 = vmatpush.bf16.msra.mxu2 %v4336_v26  ;;  %3341 = vmatpush.bf16.msra.mxu0 %v4357_v29 }
 0x1c8   : > { %v2344_v27 = vunpack.c.l.b16 %v2307_v6  ;;  %v1980_v20 = vor.u32 %v1979_v10, %v1976_v17  ;;  %v1990_v52 = vrot.slane %v1988_v15, 4  ;;  %v1993_v35 = vrot.slane %v1991_v11, 5 }
 0x1c9   : > { %v1890_v61 = vsel %vm5026_vm0, %v1818_v9, %v1889_v2  ;;  %v1893_v49 = vsel %vm5039_vm1, %v1819_v7, %v1892_v48  ;;  %v1777_v55 = vpack.c.bf16 %v1749_v58, %v1749_v58  ;;  %v1718_v18 = vadd.f32 %v1707_v0, %v1596_v8  ;;  %v4312_v22 = vld [vmem:[#allocation3 + $0x1c] sm:$0xf0]  ;;  %v4356_v48 = vld [vmem:[%s5556_s4 + $0x1e8] sm:$0xff]  ;;  %v4347_v9 = vld [vmem:[%s5556_s4 + $0x1a0] sm:$0xff] }
 0x1ca   : > { %v2272_v53 = vld [vmem:[#allocation3 + $0x20] sm:$0xe]  ;;  %1891 = vst [vmem:[#allocation3 + $0x28] sm:$0xf] %v1890_v61  ;;  %v2350_v23 = vpack.c.b16 %v2344_v27, %v2343_v1  ;;  %v3954_v3 = vor.u32 %v4312_v22, %v3953_v28  ;;  %v5173_v21 = vld [vmem:[#allocation3 + $0x24] sm:$0x1]  ;;  %v1709_v0 = vpop.f32.mrf.mxu0  ;;  %v1994_v6 = vor.u32 %v1993_v35, %v1990_v52 }
 0x1cb   : > { %1894 = vst [vmem:[#allocation3 + $0x2c] sm:$0x1] %v1893_v49  ;;  %v1821_v63 = vshrl.u32 %v1777_v55, 16  ;;  %v1824_v25 = vshll.u32 %v1777_v55, 16  ;;  %v1730_v47 = vmul.f32 %v4970_v39, %v1718_v18  ;;  %v1981_v30 = vrot.slane %v1980_v20, 4  ;;  %v4326_v1 = vld [vmem:[%s5556_s4 + $0x118] sm:$0xff]  ;;  %2962 = vmatpush.bf16.msra.mxu2 %v4335_v41  ;;  %3342 = vmatpush.bf16.msra.mxu0 %v4356_v48 }
 0x1cc   : > { %2418 = vmatmul.bf16.gmra.mxu3 %v2350_v23  ;;  %v1393_v31 = vpop.f32.mrf.mxu2  ;;  %2552 = vmatmul.bf16.gmra.mxu0 %v3954_v3  ;;  %v3879_v51 = vrot.slane %v2272_v53, 9  ;;  %v2310_v14 = vrot.slane %v5173_v21, 5  ;;  %v1917_v36 = vld [vmem:[#allocation3 + $0x20] sm:$0xf]  ;;  %v1999_v5 = vrot.slane %v1997_v32, 5  ;;  %v1995_v17 = vrot.slane %v1994_v6, 4 }
 0x1cd   : > { %v1823_v46 = vrot.slane %v1821_v63, 7  ;;  %v1742_v2 = vadd.f32 %v4977_v57, %v1730_v47  ;;  %v1403_v40 = vadd.f32 %v1393_v31, %v5139_v44  ;;  %v1986_v59 = vsel %vm4632_vm10, %v1981_v30, %v5152_v13  ;;  %v4348_v44 = vld [vmem:[%s5556_s4 + $0x1a8] sm:$0xff]  ;;  %v3837_v60 = vld [vmem:[#allocation3 + $0x20] sm:$0xf]  ;;  %2789 = vmatpush.bf16.msrb.mxu1 %v4326_v1  ;;  %v4334_v53 = vld [vmem:[%s5556_s4 + $0x158] sm:$0xff] }
 0x1ce   : > { %v2311_v13 = vsel %vm4696_vm13, %v3879_v51, %v2310_v14  ;;  %v2002_v37 = vshrl.u32 %v1917_v36, 16  ;;  %v4325_v28 = vld [vmem:[%s5556_s4 + $0x110] sm:$0xff]  ;;  %v2076_v10 = vunpack.c.l.b16 %v1986_v59  ;;  %3096 = vmatpush.bf16.msra.mxu3 %v4348_v44  ;;  %v2000_v3 = vsel %vm4632_vm10, %v1995_v17, %v1999_v5  ;;  %v1904_v31 = vld [vmem:[#allocation3 + $0x3c] sm:$0x1] }
 0x1cf   : > { %v1826_v24 = vor.u32 %v1824_v25, %v1823_v46  ;;  %v1827_v43 = vrot.slane %v1823_v46, 4  ;;  %v1750_v54 = vmax.f32 %v1742_v2, 0.0  ;;  %v1597_v56 = vadd.f32 %v1587_v12, %v1403_v40  ;;  %v1901_v25 = vld [vmem:[#allocation3 + $0x38] sm:$0xf]  ;;  %v4346_v46 = vld [vmem:[%s5556_s4 + $0x198] sm:$0xff]  ;;  %2963 = vmatpush.bf16.msra.mxu2 %v4334_v53  ;;  %3343 = vmatpush.bf16.msra.mxu0 %v4355_v19  ;;  %v4345_v12 = vld [vmem:[%s5556_s4 + $0x190] sm:$0xff] }
 0x1d0   : > { %v2345_v22 = vunpack.c.l.b16 %v2311_v13  ;;  %v2005_v52 = vshll.u32 %v1917_v36, 16  ;;  %v2077_v11 = vunpack.c.l.b16 %v2000_v3  ;;  %v2011_v51 = vshll.u32 %v5173_v21, 16  ;;  %v4333_v36 = vld [vmem:[%s5556_s4 + $0x150] sm:$0xff]  ;;  %v4354_v21 = vld [vmem:[%s5556_s4 + $0x1d8] sm:$0xff]  ;;  %v4332_v13 = vld [vmem:[%s5556_s4 + $0x148] sm:$0xff] }
 0x1d1   : > { %v1896_v7 = vsel %vm5026_vm0, %v1826_v24, %v1895_v34  ;;  %v1899_v58 = vsel %vm5039_vm1, %v1827_v43, %v1898_v16  ;;  %v1778_v8 = vpack.c.bf16 %v1750_v54, %v1750_v54  ;;  %v1719_v42 = vadd.f32 %v1709_v0, %v1597_v56  ;;  %v4285_v45 = vld [vmem:[#allocation3 + $0x24] sm:$0xf0]  ;;  %2790 = vmatpush.bf16.msrb.mxu1 %v4325_v28  ;;  %v4324_v56 = vld [vmem:[%s5556_s4 + $0x108] sm:$0xff]  ;;  %v1910_v28 = vld [vmem:[#allocation3 + $0x44] sm:$0x1] }
 0x1d2   : > { %v2273_v27 = vld [vmem:[#allocation3 + $0x28] sm:$0xe]  ;;  %1897 = vst [vmem:[#allocation3 + $0x30] sm:$0xf] %v1896_v7  ;;  %v3838_v15 = vor.u32 %v4285_v45, %v3837_v60  ;;  %v5213_v33 = vld [vmem:[#allocation3 + $0x2c] sm:$0x1]  ;;  %3097 = vmatpush.bf16.msra.mxu3 %v4347_v9 }
 0x1d3   : > { %v3880_v61 = vrot.slane %v2273_v27, 9  ;;  %1900 = vst [vmem:[#allocation3 + $0x34] sm:$0x1] %v1899_v58  ;;  %v1829_v49 = vshrl.u32 %v1778_v8, 16  ;;  %v1731_v55 = vmul.f32 %v4970_v39, %v1719_v42  ;;  %v2314_v18 = vrot.slane %v5213_v33, 5  ;;  %2964 = vmatpush.bf16.msra.mxu2 %v4333_v36  ;;  %3344 = vmatpush.bf16.msra.mxu0 %v4354_v21  ;;  %v4353_v42 = vld [vmem:[%s5556_s4 + $0x1d0] sm:$0xff] }
 0x1d4   : > { %v1832_v23 = vshll.u32 %v1778_v8, 16  ;;  %2257 = vmatmul.bf16.gmra.mxu2 %v3838_v15  ;;  %v1918_v20 = vld [vmem:[#allocation3 + $0x28] sm:$0xf]  ;;  %v2004_v39 = vrot.slane %v2002_v37, 4  ;;  %v2007_v32 = vrot.slane %v2005_v52, 5  ;;  %v2025_v0 = vshll.u32 %v5213_v33, 16 }
 0x1d5   : > { %v1831_v63 = vrot.slane %v1829_v49, 7  ;;  %v1743_v47 = vadd.f32 %v4977_v57, %v1731_v55  ;;  %v2315_v26 = vsel %vm4696_vm13, %v3880_v61, %v2314_v18  ;;  %v2016_v14 = vshrl.u32 %v1918_v20, 16  ;;  %v3957_v43 = vld [vmem:[#allocation3 + $0x28] sm:$0xf]  ;;  %v1907_v37 = vld [vmem:[#allocation3 + $0x40] sm:$0xf]  ;;  %2791 = vmatpush.bf16.msrb.mxu1 %v4324_v56 }
 0x1d6   : > { %v2346_v30 = vunpack.c.l.b16 %v2315_v26  ;;  %v2083_v57 = vpack.c.b16 %v2077_v11, %v2076_v10  ;;  %v2008_v29 = vor.u32 %v2007_v32, %v2004_v39  ;;  %v2019_v16 = vshll.u32 %v1918_v20, 16  ;;  %3098 = vmatpush.bf16.msra.mxu3 %v4346_v46  ;;  %v4344_v55 = vld [vmem:[%s5556_s4 + $0x188] sm:$0xff]  ;;  %v4331_v53 = vld [vmem:[%s5556_s4 + $0x140] sm:$0xff] }
 0x1d7   : > { %v1834_v2 = vor.u32 %v1832_v23, %v1831_v63  ;;  %v1835_v40 = vrot.slane %v1831_v63, 4  ;;  %v1751_v35 = vmax.f32 %v1743_v47, 0.0  ;;  %v2018_v34 = vrot.slane %v2016_v14, 4  ;;  %2965 = vmatpush.bf16.msra.mxu2 %v4332_v13  ;;  %3345 = vmatpush.bf16.msra.mxu0 %v4353_v42  ;;  %v4352_v19 = vld [vmem:[%s5556_s4 + $0x1c8] sm:$0xff]  ;;  %v4323_v52 = vld [vmem:[%s5556_s4 + $0x100] sm:$0xff] }
 0x1d8   : > { %v2351_v1 = vpack.c.b16 %v2346_v30, %v2345_v22  ;;  %2151 = vmatmul.bf16.gmra.mxu1 %v2083_v57  ;;  %v2021_v48 = vrot.slane %v2019_v16, 5  ;;  %v2009_v9 = vrot.slane %v2008_v29, 4  ;;  %v2013_v7 = vrot.slane %v2011_v51, 5  ;;  %v5280_v46 = vld [vmem:[#allocation3 + $0x14] sm:$0x1] }
 0x1d9   : > { %v1902_v59 = vsel %vm5026_vm0, %v1834_v2, %v1901_v25  ;;  %v1905_v44 = vsel %vm5039_vm1, %v1835_v40, %v1904_v31  ;;  %v1779_v24 = vpack.c.bf16 %v1751_v35, %v1751_v35  ;;  %v4313_v54 = vld [vmem:[#allocation3 + $0x2c] sm:$0xf0]  ;;  %v2027_v33 = vrot.slane %v2025_v0, 5  ;;  %v2822_v2 = vld [vmem:[#allocation3 + $0x8] sm:$0xe]  ;;  %2792 = vmatpush.bf16.msrb.mxu1 %v4323_v52 }
 0x1da   : > { %1903 = vst [vmem:[#allocation3 + $0x38] sm:$0xf] %v1902_v59  ;;  %v3958_v41 = vor.u32 %v4313_v54, %v3957_v43  ;;  %v5249_v6 = vld [vmem:[#allocation3 + $0x34] sm:$0x1]  ;;  %v2274_v60 = vld [vmem:[#allocation3 + $0x30] sm:$0xe]  ;;  %v2022_v58 = vor.u32 %v2021_v48, %v2018_v34  ;;  %3099 = vmatpush.bf16.msra.mxu3 %v4345_v12  ;;  %v2014_v23 = vsel %vm4632_vm10, %v2009_v9, %v2013_v7 }
 0x1db   : > { %1906 = vst [vmem:[#allocation3 + $0x3c] sm:$0x1] %v1905_v44  ;;  %v1837_v5 = vshrl.u32 %v1779_v24, 16  ;;  %v1919_v8 = vld [vmem:[#allocation3 + $0x30] sm:$0xf]  ;;  %v1840_v27 = vshll.u32 %v1779_v24, 16  ;;  %v2078_v4 = vunpack.c.l.b16 %v2014_v23  ;;  %2966 = vmatpush.bf16.msra.mxu2 %v4331_v53  ;;  %3346 = vmatpush.bf16.msra.mxu0 %v4352_v19 }
 0x1dc   : > { %2423 = vmatmul.bf16.gmra.mxu3 %v2351_v1  ;;  %2557 = vmatmul.bf16.gmra.mxu0 %v3958_v41  ;;  %v2030_v17 = vshrl.u32 %v1919_v8, 16  ;;  %v2033_v10 = vshll.u32 %v1919_v8, 16  ;;  %v2023_v15 = vrot.slane %v2022_v58, 4  ;;  %v3881_v61 = vrot.slane %v2274_v60, 9  ;;  %v3841_v20 = vld [vmem:[#allocation3 + $0x30] sm:$0xf] }
 0x1dd   : > { %v1839_v45 = vrot.slane %v1837_v5, 7  ;;  %v2318_v49 = vrot.slane %v5249_v6, 5  ;;  %v2823_v21 = vld [vmem:[#allocation3 + $0x10] sm:$0xe]  ;;  %v5290_v59 = vld [vmem:[#allocation3 + $0xc] sm:$0x1] }
 0x1de   : > { %v2028_v3 = vsel %vm4632_vm10, %v2023_v15, %v2027_v33  ;;  %v2032_v39 = vrot.slane %v2030_v17, 4  ;;  %v2035_v31 = vrot.slane %v2033_v10, 5  ;;  %3100 = vmatpush.bf16.msra.mxu3 %v4344_v55  ;;  %v4351_v1 = vld [vmem:[%s5556_s4 + $0x1c0] sm:$0xff]  ;;  %v3133_v41 = vld [vmem:[#allocation3 + $0x18] sm:$0xf]  ;;  %v2039_v48 = vshll.u32 %v5249_v6, 16 }
 0x1df   : > { %v1842_v18 = vor.u32 %v1840_v27, %v1839_v45  ;;  %v1843_v22 = vrot.slane %v1839_v45, 4  ;;  %v2079_v47 = vunpack.c.l.b16 %v2028_v3  ;;  %v2319_v51 = vsel %vm4696_vm13, %v3881_v61, %v2318_v49  ;;  %v3131_v44 = vld [vmem:[#allocation3 + $0x10] sm:$0xf]  ;;  %3347 = vmatpush.bf16.msra.mxu0 %v4351_v1  ;;  %v2576_v8 = vld [vmem:[#allocation3 + $0x8] sm:$0xf] }
 0x1e0   : > { %v2347_v16 = vunpack.c.l.b16 %v2319_v51  ;;  %v2036_v12 = vor.u32 %v2035_v31, %v2032_v39  ;;  %v4043_v0 = vrot.slane %v2822_v2, 9  ;;  %v4044_v5 = vrot.slane %v2823_v21, 9  ;;  %v5295_v33 = vld [vmem:[#allocation3 + $0x1c] sm:$0x1]  ;;  %v4366_v49 = vld [vmem:[%s5556_s4 + $0x238] sm:$0xff] }
 0x1e1   : > { %v1908_v63 = vsel %vm5026_vm0, %v1842_v18, %v1907_v37  ;;  %v1911_v25 = vsel %vm5039_vm1, %v1843_v22, %v1910_v28  ;;  %v4286_v11 = vld [vmem:[#allocation3 + $0x34] sm:$0xf0]  ;;  %v2084_v29 = vpack.c.b16 %v2079_v47, %v2078_v4  ;;  %v2852_v60 = vrot.slane %v5280_v46, 5  ;;  %v5302_v18 = vld [vmem:[#allocation3 + $0x14] sm:$0x1]  ;;  %3514 = vmatpush.bf16.msra.mxu1 %v4366_v49 }
 0x1e2   : > { %v2275_v26 = vld [vmem:[#allocation3 + $0x38] sm:$0xe]  ;;  %1909 = vst [vmem:[#allocation3 + $0x40] sm:$0xf] %v1908_v63  ;;  %v3842_v30 = vor.u32 %v4286_v11, %v3841_v20  ;;  %v1944_v32 = vld [vmem:[#allocation3 + $0x3c] sm:$0x1]  ;;  %3101 = vmatpush.bf16.msra.mxu3 %v4343_v38 }
 0x1e3   : > { %v3882_v14 = vrot.slane %v2275_v26, 9  ;;  %1912 = vst [vmem:[#allocation3 + $0x44] sm:$0x1] %v1911_v25  ;;  %v2322_v40 = vrot.slane %v1944_v32, 5  ;;  %v1920_v35 = vld [vmem:[#allocation3 + $0x38] sm:$0xf]  ;;  %v2853_v55 = vsel %vm4696_vm13, %v4044_v5, %v2852_v60 }
 0x1e4   : > { %2262 = vmatmul.bf16.gmra.mxu2 %v3842_v30  ;;  %v2044_v57 = vshrl.u32 %v1920_v35, 16  ;;  %v2047_v36 = vshll.u32 %v1920_v35, 16  ;;  %v2053_v56 = vshll.u32 %v1944_v32, 16  ;;  %v3961_v37 = vld [vmem:[#allocation3 + $0x38] sm:$0xf]  ;;  %v2848_v7 = vrot.slane %v5290_v59, 5 }
 0x1e5   : > { %v2323_v34 = vsel %vm4696_vm13, %v3882_v14, %v2322_v40  ;;  %v3148_v58 = vshrl.u32 %v3131_v44, 16  ;;  %v2037_v45 = vrot.slane %v2036_v12, 4  ;;  %v3151_v27 = vshll.u32 %v3131_v44, 16  ;;  %v2578_v20 = vld [vmem:[#allocation3 + $0x10] sm:$0xf]  ;;  %v4365_v26 = vld [vmem:[%s5556_s4 + $0x230] sm:$0xff] }
 0x1e6   : > { %v2348_v24 = vunpack.c.l.b16 %v2323_v34  ;;  %v2046_v43 = vrot.slane %v2044_v57, 4  ;;  %v2049_v54 = vrot.slane %v2047_v36, 5  ;;  %v3162_v28 = vshrl.u32 %v3133_v41, 16  ;;  %v5315_v21 = vld [vmem:[#allocation3 + $0x1c] sm:$0x1]  ;;  %3515 = vmatpush.bf16.msra.mxu1 %v4365_v26 }
 0x1e7   : > { %v3165_v17 = vshll.u32 %v3133_v41, 16  ;;  %v2055_v15 = vrot.slane %v2053_v56, 5  ;;  %v3150_v61 = vrot.slane %v3148_v58, 4  ;;  %v3153_v22 = vrot.slane %v3151_v27, 5  ;;  %v3135_v12 = vld [vmem:[#allocation3 + $0x20] sm:$0xf] }
 0x1e8   : > { %v2352_v13 = vpack.c.b16 %v2348_v24, %v2347_v16  ;;  %v2050_v9 = vor.u32 %v2049_v54, %v2046_v43  ;;  %2156 = vmatmul.bf16.gmra.mxu1 %v2084_v29  ;;  %v3164_v53 = vrot.slane %v3162_v28, 4  ;;  %v2041_v23 = vrot.slane %v2039_v48, 5  ;;  %v2824_v16 = vld [vmem:[#allocation3 + $0x18] sm:$0xe]  ;;  %v5319_v54 = vld [vmem:[#allocation3 + $0x24] sm:$0x1] }
 0x1e9   : > { %v4314_v42 = vld [vmem:[#allocation3 + $0x3c] sm:$0xf0]  ;;  %v3167_v19 = vrot.slane %v3165_v17, 5  ;;  %v2849_v3 = vsel %vm4696_vm13, %v4043_v0, %v2848_v7  ;;  %v2593_v39 = vshrl.u32 %v2576_v8, 16  ;;  %v2596_v52 = vshll.u32 %v2576_v8, 16 }
 0x1ea   : > { %v3962_v10 = vor.u32 %v4314_v42, %v3961_v37  ;;  %v2051_v6 = vrot.slane %v2050_v9, 4  ;;  %v3154_v25 = vor.u32 %v3153_v22, %v3150_v61  ;;  %v3171_v11 = vshll.u32 %v5295_v33, 16  ;;  %v2825_v56 = vld [vmem:[#allocation3 + $0x20] sm:$0xe]  ;;  %v3137_v5 = vld [vmem:[#allocation3 + $0x28] sm:$0xf] }
 0x1eb   : > { %v3168_v47 = vor.u32 %v3167_v19, %v3164_v53  ;;  %v2896_v31 = vunpack.c.l.b16 %v2853_v55  ;;  %v3157_v30 = vshll.u32 %v5302_v18, 16  ;;  %v2042_v32 = vsel %vm4632_vm10, %v2037_v45, %v2041_v23  ;;  %v4339_v7 = vld [vmem:[#allocation3 + $0x14] sm:$0xf0]  ;;  %v2582_v19 = vld [vmem:[#allocation3 + $0x20] sm:$0xf] }
 0x1ec   : > { %2428 = vmatmul.bf16.gmra.mxu3 %v2352_v13  ;;  %2562 = vmatmul.bf16.gmra.mxu0 %v3962_v10  ;;  %v2056_v63 = vsel %vm4632_vm10, %v2051_v6, %v2055_v15  ;;  %v2895_v51 = vunpack.c.l.b16 %v2849_v3  ;;  %v2607_v2 = vshrl.u32 %v2578_v20, 16  ;;  %v2595_v4 = vrot.slane %v2593_v39, 4  ;;  %v4117_v6 = vld [vmem:[#allocation3 + $0x10] sm:$0xf]  ;;  %v2580_v61 = vld [vmem:[#allocation3 + $0x18] sm:$0xf] }
 0x1ed   : > { %v3169_v14 = vrot.slane %v3168_v47, 4  ;;  %v2081_v38 = vunpack.c.l.b16 %v2056_v63  ;;  %v2598_v40 = vrot.slane %v2596_v52, 5  ;;  %v2610_v35 = vshll.u32 %v2578_v20, 16  ;;  %v4364_v23 = vld [vmem:[%s5556_s4 + $0x228] sm:$0xff]  ;;  %v5332_v63 = vld [vmem:[#allocation3 + $0x24] sm:$0x1] }
 0x1ee   : > { %v3155_v57 = vrot.slane %v3154_v25, 4  ;;  %v3173_v36 = vrot.slane %v3171_v11, 5  ;;  %v2080_v1 = vunpack.c.l.b16 %v2042_v32  ;;  %v2903_v29 = vpack.c.b16 %v2896_v31, %v2895_v51  ;;  %v5334_v25 = vld [vmem:[#allocation3 + $0x2c] sm:$0x1]  ;;  %3516 = vmatpush.bf16.msra.mxu1 %v4364_v23  ;;  %v4363_v31 = vld [vmem:[%s5556_s4 + $0x220] sm:$0xff] }
 0x1ef   : > { %v3159_v34 = vrot.slane %v3157_v30, 5  ;;  %v2609_v24 = vrot.slane %v2607_v2, 4  ;;  %v2612_v43 = vrot.slane %v2610_v35, 5  ;;  %v2599_v48 = vor.u32 %v2598_v40, %v2595_v4 }
 0x1f0   : > { %v3174_v44 = vsel %vm4632_vm10, %v3169_v14, %v3173_v36  ;;  %v2085_v41 = vpack.c.b16 %v2081_v38, %v2080_v1  ;;  %v2602_v0 = vshll.u32 %v5290_v59, 16  ;;  %v4045_v13 = vrot.slane %v2824_v16, 9 }
 0x1f1   : > { %v3160_v60 = vsel %vm4632_vm10, %v3155_v57, %v3159_v34  ;;  %v2856_v37 = vrot.slane %v5315_v21, 5  ;;  %v3176_v9 = vshrl.u32 %v3135_v12, 16  ;;  %v3277_v58 = vunpack.c.l.b16 %v3174_v44 }
 0x1f2   : > { %v4046_v8 = vrot.slane %v2825_v56, 9  ;;  %v2860_v42 = vrot.slane %v5319_v54, 5  ;;  %v3179_v45 = vshll.u32 %v3135_v12, 16  ;;  %v2613_v27 = vor.u32 %v2612_v43, %v2609_v24  ;;  %3517 = vmatpush.bf16.msra.mxu1 %v4363_v31  ;;  %v5347_v56 = vld [vmem:[#allocation3 + $0x34] sm:$0x1] }
 0x1f3   : > { %v3178_v28 = vrot.slane %v3176_v9, 4  ;;  %v3190_v17 = vshrl.u32 %v3137_v5, 16  ;;  %v3193_v10 = vshll.u32 %v3137_v5, 16  ;;  %v3276_v59 = vunpack.c.l.b16 %v3160_v60  ;;  %v3139_v5 = vld [vmem:[#allocation3 + $0x30] sm:$0xf] }
 0x1f4   : > { %2967 = vmatmul.bf16.vlgmr.msra.gmra.mxu2 %v2903_v29  ;;  %v3181_v15 = vrot.slane %v3179_v45, 5  ;;  %v4118_v49 = vor.u32 %v4339_v7, %v4117_v6  ;;  %v2616_v55 = vshll.u32 %v5280_v46, 16  ;;  %v2600_v20 = vrot.slane %v2599_v48, 4  ;;  %v3141_v60 = vld [vmem:[#allocation3 + $0x38] sm:$0xf] }
 0x1f5   : > { %v3192_v22 = vrot.slane %v3190_v17, 4  ;;  %v3195_v53 = vrot.slane %v3193_v10, 5  ;;  %v3284_v3 = vpack.c.b16 %v3277_v58, %v3276_v59  ;;  %v2604_v39 = vrot.slane %v2602_v0, 5  ;;  %v5354_v58 = vld [vmem:[#allocation3 + $0x2c] sm:$0x1] }
 0x1f6   : > { %v2857_v52 = vsel %vm4696_vm13, %v4045_v13, %v2856_v37  ;;  %v2614_v47 = vrot.slane %v2613_v27, 4  ;;  %v2861_v46 = vsel %vm4696_vm13, %v4046_v8, %v2860_v42  ;;  %v3182_v11 = vor.u32 %v3181_v15, %v3178_v28  ;;  %v2826_v8 = vld [vmem:[#allocation3 + $0x28] sm:$0xe] }
 0x1f7   : > { %v3196_v26 = vor.u32 %v3195_v53, %v3192_v22  ;;  %v2621_v30 = vshrl.u32 %v2580_v61, 16  ;;  %v2624_v32 = vshll.u32 %v2580_v61, 16  ;;  %v2635_v51 = vshrl.u32 %v2582_v19, 16  ;;  %v4340_v17 = vld [vmem:[#allocation3 + $0x24] sm:$0xf0] }
 0x1f8   : > { %2161 = vmatmul.bf16.gmra.mxu1 %v2085_v41  ;;  %v2638_v14 = vshll.u32 %v2582_v19, 16  ;;  %v2618_v2 = vrot.slane %v2616_v55, 5  ;;  %v3185_v38 = vshll.u32 %v5332_v63, 16  ;;  %v3199_v4 = vshll.u32 %v5334_v25, 16  ;;  %v2827_v41 = vld [vmem:[#allocation3 + $0x30] sm:$0xe] }
 0x1f9   : > { %v2605_v40 = vsel %vm4632_vm10, %v2600_v20, %v2604_v39  ;;  %v2898_v35 = vunpack.c.l.b16 %v2861_v46  ;;  %v2897_v36 = vunpack.c.l.b16 %v2857_v52  ;;  %v3183_v1 = vrot.slane %v3182_v11, 4  ;;  %v4121_v61 = vld [vmem:[#allocation3 + $0x20] sm:$0xf]  ;;  %v5359_v19 = vld [vmem:[#allocation3 + $0x34] sm:$0x1] }
 0x1fa   : > { %v2619_v57 = vsel %vm4632_vm10, %v2614_v47, %v2618_v2  ;;  %v3197_v29 = vrot.slane %v3196_v26, 4  ;;  %v2623_v34 = vrot.slane %v2621_v30, 4  ;;  %v2626_v16 = vrot.slane %v2624_v32, 5  ;;  %v2584_v20 = vld [vmem:[#allocation3 + $0x28] sm:$0xf] }
 0x1fb   : > { %v2637_v12 = vrot.slane %v2635_v51, 4  ;;  %v2640_v44 = vrot.slane %v2638_v14, 5  ;;  %v3187_v24 = vrot.slane %v3185_v38, 5  ;;  %v3201_v43 = vrot.slane %v3199_v4, 5  ;;  %v4362_v30 = vld [vmem:[%s5556_s4 + $0x218] sm:$0xff] }
 0x1fc   : > { %3102 = vmatmul.bf16.vlgmr.msra.gmra.mxu3 %v4118_v49  ;;  %3348 = vmatmul.bf16.vlgmr.msra.gmra.mxu0 %v3284_v3  ;;  %v2721_v48 = vunpack.c.l.b16 %v2605_v40  ;;  %v2904_v0 = vpack.c.b16 %v2898_v35, %v2897_v36  ;;  %v2722_v13 = vunpack.c.l.b16 %v2619_v57  ;;  %v2630_v7 = vshll.u32 %v5315_v21, 16  ;;  %v5366_v14 = vld [vmem:[#allocation3 + $0x3c] sm:$0x1]  ;;  %v4361_v36 = vld [vmem:[%s5556_s4 + $0x210] sm:$0xff] }
 0x1fd   : > { %v3188_v37 = vsel %vm4632_vm10, %v3183_v1, %v3187_v24  ;;  %v3202_v9 = vsel %vm4632_vm10, %v3197_v29, %v3201_v43  ;;  %v2627_v42 = vor.u32 %v2626_v16, %v2623_v34  ;;  %v2641_v45 = vor.u32 %v2640_v44, %v2637_v12  ;;  %3518 = vmatpush.bf16.msra.mxu1 %v4362_v30 }
 0x1fe   : > { %v4048_v27 = vrot.slane %v2827_v41, 9  ;;  %v2868_v28 = vrot.slane %v5347_v56, 5  ;;  %v3204_v10 = vshrl.u32 %v3139_v5, 16  ;;  %v3207_v6 = vshll.u32 %v3139_v5, 16  ;;  %v2828_v5 = vld [vmem:[#allocation3 + $0x38] sm:$0xe] }
 0x1ff   : > { %v3218_v59 = vshrl.u32 %v3141_v60, 16  ;;  %v3221_v15 = vshll.u32 %v3141_v60, 16  ;;  %v3279_v49 = vunpack.c.l.b16 %v3202_v9  ;;  %v2644_v55 = vshll.u32 %v5319_v54, 16  ;;  %v2586_v54 = vld [vmem:[#allocation3 + $0x30] sm:$0xf] }
 0x200   : > { %v4047_v22 = vrot.slane %v2826_v8, 9  ;;  %v2864_v21 = vrot.slane %v5354_v58, 5  ;;  %v2729_v53 = vpack.c.b16 %v2722_v13, %v2721_v48  ;;  %v4122_v39 = vor.u32 %v4340_v17, %v4121_v61  ;;  %v2829_v9 = vld [vmem:[#allocation3 + $0x40] sm:$0xe]  ;;  %v3145_v17 = vld [vmem:[#allocation3 + $0x48] sm:$0xf] }
 0x201   : > { %v3220_v23 = vrot.slane %v3218_v59, 4  ;;  %v3223_v3 = vrot.slane %v3221_v15, 5  ;;  %v3278_v52 = vunpack.c.l.b16 %v3188_v37  ;;  %v2628_v47 = vrot.slane %v2627_v42, 4  ;;  %3519 = vmatpush.bf16.msra.mxu1 %v4361_v36  ;;  %v4341_v61 = vld [vmem:[#allocation3 + $0x34] sm:$0xf0] }
 0x202   : > { %v2642_v46 = vrot.slane %v2641_v45, 4  ;;  %v2869_v11 = vsel %vm4696_vm13, %v4048_v27, %v2868_v28  ;;  %v3206_v26 = vrot.slane %v3204_v10, 4  ;;  %v3209_v31 = vrot.slane %v3207_v6, 5  ;;  %v5381_v28 = vld [vmem:[#allocation3 + $0x3c] sm:$0x1] }
 0x203   : > { %v3285_v32 = vpack.c.b16 %v3279_v49, %v3278_v52  ;;  %v2632_v51 = vrot.slane %v2630_v7, 5  ;;  %v3213_v2 = vshll.u32 %v5359_v19, 16  ;;  %v2649_v38 = vshrl.u32 %v2584_v20, 16  ;;  %v3143_v7 = vld [vmem:[#allocation3 + $0x40] sm:$0xf] }
 0x204   : > { %2972 = vmatmul.bf16.gmra.mxu2 %v2904_v0  ;;  %v2646_v4 = vrot.slane %v2644_v55, 5  ;;  %v2865_v40 = vsel %vm4696_vm13, %v4047_v22, %v2864_v21  ;;  %v3224_v35 = vor.u32 %v3223_v3, %v3220_v23  ;;  %v2652_v57 = vshll.u32 %v2584_v20, 16  ;;  %v5379_v0 = vld [vmem:[#allocation3 + $0x44] sm:$0x1] }
 0x205   : > { %v2633_v1 = vsel %vm4632_vm10, %v2628_v47, %v2632_v51  ;;  %v2900_v29 = vunpack.c.l.b16 %v2869_v11  ;;  %v2663_v34 = vshrl.u32 %v2586_v54, 16  ;;  %v2666_v16 = vshll.u32 %v2586_v54, 16 }
 0x206   : > { %v2647_v12 = vsel %vm4632_vm10, %v2642_v46, %v2646_v4  ;;  %v3210_v44 = vor.u32 %v3209_v31, %v3206_v26  ;;  %v3227_v24 = vshll.u32 %v5366_v14, 16  ;;  %v2899_v43 = vunpack.c.l.b16 %v2865_v40  ;;  %v3377_v31 = vld [vmem:[#allocation3 + $0x10] sm:$0xe] }
 0x207   : > { %v3215_v41 = vrot.slane %v3213_v2, 5  ;;  %v2651_v48 = vrot.slane %v2649_v38, 4  ;;  %v2723_v60 = vunpack.c.l.b16 %v2633_v1  ;;  %v3225_v13 = vrot.slane %v3224_v35, 4  ;;  %v3378_v2 = vld [vmem:[#allocation3 + $0x18] sm:$0xe] }
 0x208   : > { %2793 = vmatmul.bf16.vlgmr.msrb.gmra.mxu1 %v2729_v53  ;;  %v2654_v37 = vrot.slane %v2652_v57, 5  ;;  %v2724_v8 = vunpack.c.l.b16 %v2647_v12  ;;  %v2905_v42 = vpack.c.b16 %v2900_v29, %v2899_v43  ;;  %v2665_v45 = vrot.slane %v2663_v34, 4  ;;  %v3379_v57 = vld [vmem:[#allocation3 + $0x20] sm:$0xe]  ;;  %v5399_v29 = vld [vmem:[#allocation3 + $0x4c] sm:$0x1] }
 0x209   : > { %v2668_v27 = vrot.slane %v2666_v16, 5  ;;  %v3211_v10 = vrot.slane %v3210_v44, 4  ;;  %v3229_v6 = vrot.slane %v3227_v24, 5  ;;  %v2658_v59 = vshll.u32 %v5354_v58, 16  ;;  %v5401_v12 = vld [vmem:[#allocation3 + $0x44] sm:$0x1] }
 0x20a   : > { %v4049_v15 = vrot.slane %v2828_v5, 9  ;;  %v4050_v49 = vrot.slane %v2829_v9, 9  ;;  %v2876_v55 = vrot.slane %v5379_v0, 5  ;;  %v3232_v22 = vshrl.u32 %v3143_v7, 16  ;;  %v4360_v24 = vld [vmem:[%s5556_s4 + $0x208] sm:$0xff] }
 0x20b   : > { %v3235_v21 = vshll.u32 %v3143_v7, 16  ;;  %v3230_v53 = vsel %vm4632_vm10, %v3225_v13, %v3229_v6  ;;  %v2872_v23 = vrot.slane %v5381_v28, 5  ;;  %v3246_v3 = vshrl.u32 %v3145_v17, 16  ;;  %3520 = vmatpush.bf16.msra.mxu1 %v4360_v24  ;;  %v4359_v7 = vld [vmem:[%s5556_s4 + $0x200] sm:$0xff] }
 0x20c   : > { %3107 = vmatmul.bf16.gmra.mxu3 %v4122_v39  ;;  %3353 = vmatmul.bf16.gmra.mxu0 %v3285_v32  ;;  %v3249_v20 = vshll.u32 %v3145_v17, 16  ;;  %v4125_v39 = vld [vmem:[#allocation3 + $0x30] sm:$0xf]  ;;  %v2655_v52 = vor.u32 %v2654_v37, %v2651_v48  ;;  %v2669_v47 = vor.u32 %v2668_v27, %v2665_v45  ;;  %v2730_v46 = vpack.c.b16 %v2724_v8, %v2723_v60  ;;  %v3380_v37 = vld [vmem:[#allocation3 + $0x28] sm:$0xe] }
 0x20d   : > { %v4126_v58 = vor.u32 %v4341_v61, %v4125_v39  ;;  %v3216_v11 = vsel %vm4632_vm10, %v3211_v10, %v3215_v41  ;;  %v2672_v26 = vshll.u32 %v5347_v56, 16  ;;  %v3281_v54 = vunpack.c.l.b16 %v3230_v53  ;;  %v3381_v6 = vld [vmem:[#allocation3 + $0x30] sm:$0xe]  ;;  %v2590_v61 = vld [vmem:[#allocation3 + $0x40] sm:$0xf] }
 0x20e   : > { %v2877_v30 = vsel %vm4696_vm13, %v4050_v49, %v2876_v55  ;;  %v3234_v32 = vrot.slane %v3232_v22, 4  ;;  %v3237_v51 = vrot.slane %v3235_v21, 5  ;;  %v5393_v38 = vrot.slane %v2658_v59, 5 }
 0x20f   : > { %v2873_v4 = vsel %vm4696_vm13, %v4049_v15, %v2872_v23  ;;  %v3248_v40 = vrot.slane %v3246_v3, 4  ;;  %v3251_v35 = vrot.slane %v3249_v20, 5  ;;  %v3280_v36 = vunpack.c.l.b16 %v3216_v11  ;;  %v2588_v20 = vld [vmem:[#allocation3 + $0x38] sm:$0xf]  ;;  %3521 = vmatpush.bf16.msra.mxu1 %v4359_v7 }
 0x210   : > { %v5397_v1 = vrot.slane %v2655_v52, 4  ;;  %v2670_v56 = vrot.slane %v2669_v47, 4  ;;  %v4211_v34 = vrot.slane %v3377_v31, 9  ;;  %v2902_v16 = vunpack.c.l.b16 %v2877_v30  ;;  %v3382_v11 = vld [vmem:[#allocation3 + $0x38] sm:$0xe] }
 0x211   : > { %v3255_v44 = vshll.u32 %v5399_v29, 16  ;;  %v3403_v43 = vrot.slane %v5302_v18, 5  ;;  %v4212_v41 = vrot.slane %v3378_v2, 9  ;;  %v3286_v48 = vpack.c.b16 %v3281_v54, %v3280_v36 }
 0x212   : > { %v2674_v5 = vrot.slane %v2672_v26, 5  ;;  %v2901_v60 = vunpack.c.l.b16 %v2873_v4  ;;  %v3238_v13 = vor.u32 %v3237_v51, %v3234_v32  ;;  %v3252_v9 = vor.u32 %v3251_v35, %v3248_v40 }
 0x213   : > { %v3404_v8 = vsel %vm4696_vm13, %v4211_v34, %v3403_v43  ;;  %v4213_v45 = vrot.slane %v3379_v57, 9  ;;  %v2661_v18 = vsel %vm4632_vm10, %v5397_v1, %v5393_v38  ;;  %v3241_v17 = vshll.u32 %v5401_v12, 16 }
 0x214   : > { %2977 = vmatmul.bf16.gmra.mxu2 %v2905_v42  ;;  %v3407_v42 = vrot.slane %v5295_v33, 5  ;;  %v2675_v27 = vsel %vm4632_vm10, %v2670_v56, %v2674_v5  ;;  %v3411_v10 = vrot.slane %v5332_v63, 5  ;;  %v2906_v59 = vpack.c.b16 %v2902_v16, %v2901_v60 }
 0x215   : > { %v3257_v15 = vrot.slane %v3255_v44, 5  ;;  %v4214_v49 = vrot.slane %v3380_v37, 9  ;;  %v3450_v55 = vunpack.c.l.b16 %v3404_v8  ;;  %v3415_v53 = vrot.slane %v5334_v25, 5  ;;  %v3384_v37 = vld [vmem:[#allocation3 + $0x48] sm:$0xe] }
 0x216   : > { %v3408_v33 = vsel %vm4696_vm13, %v4212_v41, %v3407_v42  ;;  %v3412_v21 = vsel %vm4696_vm13, %v4213_v45, %v3411_v10  ;;  %v3239_v23 = vrot.slane %v3238_v13, 4  ;;  %v3253_v3 = vrot.slane %v3252_v9, 4  ;;  %v4129_v41 = vld [vmem:[#allocation3 + $0x40] sm:$0xf] }
 0x217   : > { %v3451_v22 = vunpack.c.l.b16 %v3408_v33  ;;  %v4215_v63 = vrot.slane %v3381_v6, 9  ;;  %v3419_v39 = vrot.slane %v5359_v19, 5  ;;  %v2691_v52 = vshrl.u32 %v2590_v61, 16  ;;  %v3383_v13 = vld [vmem:[#allocation3 + $0x40] sm:$0xe] }
 0x218   : > { %2798 = vmatmul.bf16.gmra.mxu1 %v2730_v46  ;;  %v2694_v47 = vshll.u32 %v2590_v61, 16  ;;  %v3243_v26 = vrot.slane %v3241_v17, 5  ;;  %v3452_v31 = vunpack.c.l.b16 %v3412_v21  ;;  %v4216_v30 = vrot.slane %v3382_v11, 9 }
 0x219   : > { %v3458_v46 = vpack.c.b16 %v3451_v22, %v3450_v55  ;;  %v2677_v32 = vshrl.u32 %v2588_v20, 16  ;;  %v2680_v25 = vshll.u32 %v2588_v20, 16  ;;  %v3420_v51 = vsel %vm4696_vm13, %v4215_v63, %v3419_v39 }
 0x21a   : > { %v3423_v2 = vrot.slane %v5366_v14, 5  ;;  %v2726_v38 = vunpack.c.l.b16 %v2675_v27  ;;  %v3244_v19 = vsel %vm4632_vm10, %v3239_v23, %v3243_v26  ;;  %v3258_v4 = vsel %vm4632_vm10, %v3253_v3, %v3257_v15 }
 0x21b   : > { %v2693_v35 = vrot.slane %v2691_v52, 4  ;;  %v2696_v57 = vrot.slane %v2694_v47, 5  ;;  %v2725_v1 = vunpack.c.l.b16 %v2661_v18  ;;  %v3454_v56 = vunpack.c.l.b16 %v3420_v51 }
 0x21c   : > { %3112 = vmatmul.bf16.gmra.mxu3 %v4126_v58  ;;  %3358 = vmatmul.bf16.gmra.mxu0 %v3286_v48  ;;  %v3416_v58 = vsel %vm4696_vm13, %v4214_v49, %v3415_v53  ;;  %v3424_v36 = vsel %vm4696_vm13, %v4216_v30, %v3423_v2  ;;  %v3282_v16 = vunpack.c.l.b16 %v3244_v19  ;;  %v3283_v44 = vunpack.c.l.b16 %v3258_v4  ;;  %v4342_v48 = vld [vmem:[#allocation3 + $0x44] sm:$0xf0] }
 0x21d   : > { %v3453_v54 = vunpack.c.l.b16 %v3416_v58  ;;  %v3455_v34 = vunpack.c.l.b16 %v3424_v36  ;;  %v2679_v14 = vrot.slane %v2677_v32, 4  ;;  %v2682_v24 = vrot.slane %v2680_v25, 5 }
 0x21e   : > { %v2731_v43 = vpack.c.b16 %v2726_v38, %v2725_v1  ;;  %v2697_v60 = vor.u32 %v2696_v57, %v2693_v35  ;;  %v4217_v9 = vrot.slane %v3383_v13, 9  ;;  %v3427_v7 = vrot.slane %v5401_v12, 5 }
 0x21f   : > { %v3459_v40 = vpack.c.b16 %v3453_v54, %v3452_v31  ;;  %v3460_v5 = vpack.c.b16 %v3455_v34, %v3454_v56  ;;  %v4218_v8 = vrot.slane %v3384_v37, 9  ;;  %v3431_v42 = vrot.slane %v5399_v29, 5 }
 0x220   : > { %v4130_v45 = vor.u32 %v4342_v48, %v4129_v41  ;;  %v3287_v18 = vpack.c.b16 %v3283_v44, %v3282_v16  ;;  %v2683_v27 = vor.u32 %v2682_v24, %v2679_v14  ;;  %v2700_v17 = vshll.u32 %v5379_v0, 16 }
 0x221   : > { %v3428_v10 = vsel %vm4696_vm13, %v4217_v9, %v3427_v7  ;;  %v3432_v6 = vsel %vm4696_vm13, %v4218_v8, %v3431_v42  ;;  %v2698_v15 = vrot.slane %v2697_v60, 4 }
 0x222   : > { %v3456_v12 = vunpack.c.l.b16 %v3428_v10  ;;  %v3457_v61 = vunpack.c.l.b16 %v3432_v6  ;;  %v2684_v33 = vrot.slane %v2683_v27, 4  ;;  %v2702_v29 = vrot.slane %v2700_v17, 5 }
 0x224   : > { %2982 = vmatmul.bf16.gmra.mxu2 %v2906_v59  ;;  %v2686_v59 = vshll.u32 %v5381_v28, 16  ;;  %v3461_v49 = vpack.c.b16 %v3457_v61, %v3456_v12  ;;  %v2703_v0 = vsel %vm4632_vm10, %v2698_v15, %v2702_v29 }
 0x225   : > { %v2728_v21 = vunpack.c.l.b16 %v2703_v0 }
 0x226   : > { %v2688_v55 = vrot.slane %v2686_v59, 5 }
 0x228   : > { %2803 = vmatmul.bf16.gmra.mxu1 %v2731_v43  ;;  %v2689_v22 = vsel %vm4632_vm10, %v2684_v33, %v2688_v55 }
 0x229   : > { %v2727_v50 = vunpack.c.l.b16 %v2689_v22 }
 0x22b   : > { %v2732_v53 = vpack.c.b16 %v2728_v21, %v2727_v50  ;;  %v5492_v21 = vld [vmem:[%s5557_s5] ss:$0 sm:$0xff] }
 0x22c   : > { %3117 = vmatmul.bf16.gmra.mxu3 %v4130_v45  ;;  %3363 = vmatmul.bf16.gmra.mxu0 %v3287_v18 }
 0x237   : > { %v2248_v20 = vpop.f32.mrf.mxu2 }
 0x238   : > { %2808 = vmatmul.bf16.gmra.mxu1 %v2732_v53 }
 0x239   : > { %v2548_v52 = vpop.f32.mrf.mxu0 }
 0x23d   : > { %v2414_v39 = vpop.f32.mrf.mxu3 }
 0x23f   : > { %v2250_v58 = vpop.f32.mrf.mxu2 }
 0x241   : > { %v2550_v26 = vpop.f32.mrf.mxu0 }
 0x243   : > { %v2147_v23 = vpop.f32.mrf.mxu1 }
 0x244   : > { %v2249_v13 = vadd.f32 %v2248_v20, %v2147_v23 }
 0x245   : > { %v2416_v11 = vpop.f32.mrf.mxu3 }
 0x246   : > { %v2434_v9 = vadd.f32 %v2414_v39, %v2249_v13 }
 0x247   : > { %v2253_v31 = vpop.f32.mrf.mxu2 }
 0x248   : > { %3522 = vmatmul.bf16.vlgmr.msra.gmra.mxu1 %v3458_v46  ;;  %v2568_v45 = vadd.f32 %v2548_v52, %v2434_v9 }
 0x249   : > { %v2553_v46 = vpop.f32.mrf.mxu0 }
 0x24b   : > { %v2149_v28 = vpop.f32.mrf.mxu1 }
 0x24c   : > { %v2251_v42 = vadd.f32 %v2250_v58, %v2149_v28 }
 0x24e   : > { %v2435_v17 = vadd.f32 %v2416_v11, %v2251_v42 }
 0x24f   : > { %v2419_v54 = vpop.f32.mrf.mxu3  ;;  %v2255_v32 = vpop.f32.mrf.mxu2 }
 0x250   : > { %v2569_v12 = vadd.f32 %v2550_v26, %v2435_v17 }
 0x251   : > { %v2555_v2 = vpop.f32.mrf.mxu0 }
 0x255   : > { %v2152_v3 = vpop.f32.mrf.mxu1 }
 0x256   : > { %v2254_v15 = vadd.f32 %v2253_v31, %v2152_v3  ;;  %v5497_v3 = vld [vmem:[%s5558_s6] ss:$0 sm:$0xff] }
 0x257   : > { %v2421_v51 = vpop.f32.mrf.mxu3  ;;  %v2258_v38 = vpop.f32.mrf.mxu2 }
 0x258   : > { %3527 = vmatmul.bf16.gmra.mxu1 %v3459_v40  ;;  %v2436_v55 = vadd.f32 %v2419_v54, %v2254_v15 }
 0x259   : > { %v5461_v40 = vpop.f32.mrf.mxu0 }
 0x25a   : > { %v2570_v28 = vadd.f32 %v2553_v46, %v2436_v55 }
 0x25d   : > { %v2154_v63 = vpop.f32.mrf.mxu1 }
 0x25e   : > { %v2256_v23 = vadd.f32 %v2255_v32, %v2154_v63 }
 0x25f   : > { %v5459_v4 = vpop.f32.mrf.mxu3  ;;  %v5463_v57 = vpop.f32.mrf.mxu2 }
 0x260   : > { %v2437_v26 = vadd.f32 %v2421_v51, %v2256_v23 }
 0x261   : > { %v5467_v56 = vpop.f32.mrf.mxu0 }
 0x265   : > { %v5451_v47 = vpop.f32.mrf.mxu1 }
 0x267   : > { %v5465_v36 = vpop.f32.mrf.mxu3  ;;  %v5469_v34 = vpop.f32.mrf.mxu2 }
 0x268   : > { %3532 = vmatmul.bf16.gmra.mxu1 %v3460_v5 }
 0x269   : > { %v5473_v14 = vpop.f32.mrf.mxu0 }
 0x26d   : > { %v5453_v62 = vpop.f32.mrf.mxu1 }
 0x26f   : > { %v5471_v16 = vpop.f32.mrf.mxu3  ;;  %v5475_v24 = vpop.f32.mrf.mxu2 }
 0x271   : > { %v5481_v48 = vpop.f32.mrf.mxu0 }
 0x275   : > { %v5455_v30 = vpop.f32.mrf.mxu1 }
 0x277   : > { %v5479_v41 = vpop.f32.mrf.mxu3  ;;  %v2968_v5 = vpop.f32.mrf.mxu2 }
 0x278   : > { %3537 = vmatmul.bf16.gmra.mxu1 %v3461_v49 }
 0x279   : > { %v3349_v7 = vpop.f32.mrf.mxu0 }
 0x27d   : > { %v5457_v25 = vpop.f32.mrf.mxu1 }
 0x27f   : > { %v3103_v37 = vpop.f32.mrf.mxu3  ;;  %v2970_v18 = vpop.f32.mrf.mxu2 }
 0x281   : > { %v3351_v61 = vpop.f32.mrf.mxu0 }
 0x285   : > { %v2794_v19 = vpop.f32.mrf.mxu1 }
 0x286   : > { %v2814_v27 = vadd.f32 %v2794_v19, %v2568_v45 }
 0x287   : > { %v3105_v10 = vpop.f32.mrf.mxu3  ;;  %v2973_v49 = vpop.f32.mrf.mxu2 }
 0x288   : > { %v2988_v6 = vadd.f32 %v2968_v5, %v2814_v27 }
 0x289   : > { %v3354_v11 = vpop.f32.mrf.mxu0 }
 0x28a   : > { %v3123_v33 = vadd.f32 %v3103_v37, %v2988_v6 }
 0x28c   : > { %v3369_v22 = vadd.f32 %v3349_v7, %v3123_v33 }
 0x28d   : > { %v2796_v35 = vpop.f32.mrf.mxu1 }
 0x28e   : > { %v2815_v29 = vadd.f32 %v2796_v35, %v2569_v12  ;;  %v2259_v35 = vadd.f32 %v2258_v38, %v5451_v47  ;;  %v2261_v47 = vadd.f32 %v5463_v57, %v5453_v62 }
 0x28f   : > { %v3108_v50 = vpop.f32.mrf.mxu3  ;;  %v2975_v54 = vpop.f32.mrf.mxu2 }
 0x290   : > { %v2989_v0 = vadd.f32 %v2970_v18, %v2815_v29  ;;  %v2438_v7 = vadd.f32 %v5459_v4, %v2259_v35 }
 0x291   : > { %v3356_v45 = vpop.f32.mrf.mxu0 }
 0x292   : > { %v3124_v39 = vadd.f32 %v3105_v10, %v2989_v0 }
 0x294   : > { %v3370_v32 = vadd.f32 %v3351_v61, %v3124_v39  ;;  %v2439_v61 = vadd.f32 %v5465_v36, %v2261_v47 }
 0x295   : > { %v2799_v1 = vpop.f32.mrf.mxu1 }
 0x296   : > { %v2816_v52 = vadd.f32 %v2799_v1, %v2570_v28  ;;  %v2571_v1 = vadd.f32 %v2555_v2, %v2437_v26  ;;  %v2572_v2 = vadd.f32 %v5461_v40, %v2438_v7  ;;  %v2264_v40 = vadd.f32 %v5469_v34, %v5455_v30 }
 0x297   : > { %v3110_v5 = vpop.f32.mrf.mxu3  ;;  %v2978_v10 = vpop.f32.mrf.mxu2  ;;  %v2573_v57 = vadd.f32 %v5467_v56, %v2439_v61  ;;  %v2266_v56 = vadd.f32 %v5475_v24, %v5457_v25 }
 0x298   : > { %v2990_v63 = vadd.f32 %v2973_v49, %v2816_v52  ;;  %v2440_v23 = vadd.f32 %v5471_v16, %v2264_v40 }
 0x299   : > { %v3359_v0 = vpop.f32.mrf.mxu0 }
 0x29a   : > { %v3125_v13 = vadd.f32 %v3108_v50, %v2990_v63  ;;  %v2574_v34 = vadd.f32 %v5473_v14, %v2440_v23  ;;  %v2441_v63 = vadd.f32 %v5479_v41, %v2266_v56 }
 0x29c   : > { %v3371_v17 = vadd.f32 %v3354_v11, %v3125_v13  ;;  %v2575_v24 = vadd.f32 %v5481_v48, %v2441_v63 }
 0x29d   : > { %v2801_v44 = vpop.f32.mrf.mxu1 }
 0x29e   : > { %v2817_v37 = vadd.f32 %v2801_v44, %v2571_v1 }
 0x29f   : > { %v3113_v12 = vpop.f32.mrf.mxu3 }
 0x2a0   : > { %v2991_v18 = vadd.f32 %v2975_v54, %v2817_v37 }
 0x2a2   : > { %v3126_v44 = vadd.f32 %v3110_v5, %v2991_v18 }
 0x2a4   : > { %v3372_v55 = vadd.f32 %v3356_v45, %v3126_v44 }
 0x2a5   : > { %v5477_v43 = vpop.f32.mrf.mxu1 }
 0x2a6   : > { %v2818_v15 = vadd.f32 %v5477_v43, %v2572_v2 }
 0x2a8   : > { %v2992_v29 = vadd.f32 %v2978_v10, %v2818_v15 }
 0x2aa   : > { %v3127_v50 = vadd.f32 %v3113_v12, %v2992_v29 }
 0x2ad   : > { %v5483_v60 = vpop.f32.mrf.mxu1 }
 0x2b5   : > { %v5485_v8 = vpop.f32.mrf.mxu1 }
 0x2bd   : > { %v5487_v59 = vpop.f32.mrf.mxu1 }
 0x2c5   : > { %v3523_v53 = vpop.f32.mrf.mxu1 }
 0x2c6   : > { %v3543_v20 = vadd.f32 %v3523_v53, %v3369_v22  ;;  %v2980_v22 = vpop.f32.mrf.mxu2  ;;  %v2819_v53 = vadd.f32 %v5483_v60, %v2573_v57  ;;  %v3361_v60 = vpop.f32.mrf.mxu0 }
 0x2c8   : > { %v3555_v58 = vmul.f32 %v5492_v21, %v3543_v20  ;;  %v3115_v20 = vpop.f32.mrf.mxu3  ;;  %v2993_v39 = vadd.f32 %v2980_v22, %v2819_v53 }
 0x2ca   : > { %v3567_v31 = vadd.f32 %v5497_v3, %v3555_v58  ;;  %v3373_v58 = vadd.f32 %v3359_v0, %v3127_v50  ;;  %v3128_v26 = vadd.f32 %v3115_v20, %v2993_v39 }
 0x2cc   : > { %v3575_v46 = vmax.f32 %v3567_v31, 0.0  ;;  %v2820_v31 = vadd.f32 %v5485_v8, %v2574_v34  ;;  %v3374_v35 = vadd.f32 %v3361_v60, %v3128_v26  ;;  %v2821_v8 = vadd.f32 %v5487_v59, %v2575_v24 }
 0x2cd   : > { %v3525_v19 = vpop.f32.mrf.mxu1 }
 0x2ce   : > { %3583 = vst [vmem:[%s5506_s20] sm:$0xff] %v3575_v46  ;;  %v3544_v51 = vadd.f32 %v3525_v19, %v3370_v32  ;;  %v2983_v54 = vpop.f32.mrf.mxu2  ;;  %v3364_v13 = vpop.f32.mrf.mxu0 }
 0x2cf   : > { %v2994_v32 = vadd.f32 %v2983_v54, %v2820_v31 }
 0x2d0   : > { %v3556_v9 = vmul.f32 %v5492_v21, %v3544_v51  ;;  %v3118_v25 = vpop.f32.mrf.mxu3 }
 0x2d1   : > { %v3129_v51 = vadd.f32 %v3118_v25, %v2994_v32 }
 0x2d2   : > { %v3568_v42 = vadd.f32 %v5497_v3, %v3556_v9 }
 0x2d4   : > { %v3576_v27 = vmax.f32 %v3568_v42, 0.0  ;;  %v3375_v42 = vadd.f32 %v3364_v13, %v3129_v51 }
 0x2d5   : > { %v3528_v6 = vpop.f32.mrf.mxu1 }
 0x2d6   : > { %3584 = vst [vmem:[%s5506_s20 + $0x8] sm:$0xff] %v3576_v27  ;;  %v3545_v38 = vadd.f32 %v3528_v6, %v3371_v17  ;;  %v2985_v37 = vpop.f32.mrf.mxu2  ;;  %v3366_v10 = vpop.f32.mrf.mxu0 }
 0x2d7   : > { %v2995_v9 = vadd.f32 %v2985_v37, %v2821_v8 }
 0x2d8   : > { %v3557_v4 = vmul.f32 %v5492_v21, %v3545_v38  ;;  %v3120_v48 = vpop.f32.mrf.mxu3 }
 0x2d9   : > { %v3130_v27 = vadd.f32 %v3120_v48, %v2995_v9 }
 0x2da   : > { %v3569_v33 = vadd.f32 %v5497_v3, %v3557_v4 }
 0x2db   : > { %v3376_v47 = vadd.f32 %v3366_v10, %v3130_v27 }
 0x2dc   : > { %v3577_v49 = vmax.f32 %v3569_v33, 0.0 }
 0x2dd   : > { %v3530_v62 = vpop.f32.mrf.mxu1 }
 0x2de   : > { %3585 = vst [vmem:[%s5506_s20 + $0x10] sm:$0xff] %v3577_v49  ;;  %v3546_v43 = vadd.f32 %v3530_v62, %v3372_v55 }
 0x2e0   : > { %v3558_v36 = vmul.f32 %v5492_v21, %v3546_v43 }
 0x2e2   : > { %v3570_v28 = vadd.f32 %v5497_v3, %v3558_v36 }
 0x2e4   : > { %v3578_v52 = vmax.f32 %v3570_v28, 0.0 }
 0x2e5   : > { %v3533_v30 = vpop.f32.mrf.mxu1 }
 0x2e6   : > { %3586 = vst [vmem:[%s5506_s20 + $0x18] sm:$0xff] %v3578_v52  ;;  %v3547_v11 = vadd.f32 %v3533_v30, %v3373_v58 }
 0x2e8   : > { %v3559_v16 = vmul.f32 %v5492_v21, %v3547_v11 }
 0x2ea   : > { %v3571_v46 = vadd.f32 %v5497_v3, %v3559_v16 }
 0x2ec   : > { %v3579_v19 = vmax.f32 %v3571_v46, 0.0 }
 0x2ed   : > { %v3535_v14 = vpop.f32.mrf.mxu1 }
 0x2ee   : > { %3587 = vst [vmem:[%s5506_s20 + $0x20] sm:$0xff] %v3579_v19  ;;  %v3548_v1 = vadd.f32 %v3535_v14, %v3374_v35 }
 0x2f0   : > { %v3560_v5 = vmul.f32 %v5492_v21, %v3548_v1 }
 0x2f2   : > { %v3572_v41 = vadd.f32 %v5497_v3, %v3560_v5 }
 0x2f4   : > { %v3580_v7 = vmax.f32 %v3572_v41, 0.0 }
 0x2f5   : > { %v3538_v45 = vpop.f32.mrf.mxu1 }
 0x2f6   : > { %3588 = vst [vmem:[%s5506_s20 + $0x28] sm:$0xff] %v3580_v7  ;;  %v3549_v18 = vadd.f32 %v3538_v45, %v3375_v42 }
 0x2f8   : > { %v3561_v17 = vmul.f32 %v5492_v21, %v3549_v18 }
 0x2fa   : > { %v3573_v59 = vadd.f32 %v5497_v3, %v3561_v17 }
 0x2fc   : > { %v3581_v6 = vmax.f32 %v3573_v59, 0.0 }
 0x2fd   : > { %v3540_v2 = vpop.f32.mrf.mxu1 }
 0x2fe   : > { %3589 = vst [vmem:[%s5506_s20 + $0x30] sm:$0xff] %v3581_v6  ;;  %v3550_v38 = vadd.f32 %v3540_v2, %v3376_v47 }
 0x300   : > { %v3562_v44 = vmul.f32 %v5492_v21, %v3550_v38 }
 0x302   : > { %v3574_v15 = vadd.f32 %v5497_v3, %v3562_v44 }
 0x304   : > { %v3582_v4 = vmax.f32 %v3574_v15, 0.0 }
 0x306   : > { %3590 = vst [vmem:[%s5506_s20 + $0x38] sm:$0xff] %v3582_v4 }
 0x307 PF: > { %s17_s24 = sadd.s32 1, %s4404_s24  }
 0x308   : > { %p14_p4 = scmp.ge.s32.totalorder %s17_s24, 4  }
 0x30a   :  { %16 = sbr.rel (!%p14_p4) target bundleno = 1 (0x1), region = 99 }

</bundles_post_ra>
